<compile_context>
chip_gen: v5e
topology: v5e:2x2
jax: 0.10.0
libtpu: 0.0.40
codegen_flags: <defaults>
</compile_context>

<pallas_src>
import functools

import jax
import jax.numpy as jnp
from jax.experimental import pallas as pl
from jax.experimental.pallas import tpu as pltpu


# ----------------------------------------------------------------------------
# Fused kernel: all LSTM layers (both directions) + decoder.
#
# refs layout (all VMEM):
#   [0]              x_ref     (seq*batch, embed)   bf16   layer-0 input
#   [1+4l+0]         wx_ref    (in_dim_l, 8H)       bf16   [W_ih_f | W_ih_b]^T
#   [1+4l+1]         whf_ref   (H, 4H)              bf16   W_hh_f^T
#   [1+4l+2]         whb_ref   (H, 4H)              bf16   W_hh_b^T
#   [1+4l+3]         b_ref     (1, 8H)              f32    [b_f | b_b] (ih+hh)
#   [1+4L]           dec_w_ref (4H, 2)              f32
#   [1+4L+1]         dec_b_ref (1, 2)               f32
#   [1+4L+2]         out_ref   (batch, 2)           f32    (output)
#   scratch:         yf_sc, yb_sc (seq*batch, H)    f32    per-direction outputs
# Gate order follows PyTorch: i, f, g, o.
# ----------------------------------------------------------------------------
def _rnn_fused_kernel(*refs, seq_len, batch, hidden, num_layers):
    x_ref = refs[0]
    dec_w_ref = refs[1 + 4 * num_layers]
    dec_b_ref = refs[2 + 4 * num_layers]
    out_ref = refs[3 + 4 * num_layers]
    yf_sc = refs[4 + 4 * num_layers]
    yb_sc = refs[5 + 4 * num_layers]

    H = hidden

    def run_direction(gx_dir, wh, y_sc, reverse):
        # gx_dir : (seq*batch, 4H) f32 precomputed x-projection (+ bias)
        # wh     : (H, 4H) bf16 recurrent weights (loaded once, hoisted)
        h = jnp.zeros((batch, H), jnp.float32)
        c = jnp.zeros((batch, H), jnp.float32)
        order = range(seq_len - 1, -1, -1) if reverse else range(seq_len)
        for t in order:                       # static -> fully unrolled
            r0 = t * batch
            gates = (gx_dir[r0:r0 + batch, :]
                     + jnp.dot(h.astype(jnp.bfloat16), wh,
                               preferred_element_type=jnp.float32))
            # Two full-width EUP passes + cheap lane selects instead of four
            # quarter-width transcendental calls on sub-vreg slices.
            sg = jax.nn.sigmoid(gates)
            th = jnp.tanh(gates)
            i = sg[:, 0 * H:1 * H]
            f = sg[:, 1 * H:2 * H]
            g = th[:, 2 * H:3 * H]
            o = sg[:, 3 * H:4 * H]
            c = f * c + i * g
            h = o * jnp.tanh(c)
            y_sc[r0:r0 + batch, :] = h

    for l in range(num_layers):
        wx_ref, whf_ref, whb_ref, b_ref = refs[1 + 4 * l: 5 + 4 * l]
        wx = wx_ref[...]                              # (in_dim, 8H) bf16
        b = b_ref[...]                                # (1, 8H)      f32

        # Hoisted input projection for BOTH directions in one wide matmul:
        #   gx = x @ [W_ih_f | W_ih_b] + [b_f | b_b]      (seq*batch, 8H)
        if l == 0:
            gx = jnp.dot(x_ref[...], wx, preferred_element_type=jnp.float32)
        else:
            # previous layer output is [fwd | bwd]; reads happen before this
            # layer's stores overwrite the scratches (program order on refs).
            yf_prev = yf_sc[...].astype(jnp.bfloat16)   # (seq*batch, H)
            yb_prev = yb_sc[...].astype(jnp.bfloat16)
            gx = (jnp.dot(yf_prev, wx[0:H, :],
                          preferred_element_type=jnp.float32)
                  + jnp.dot(yb_prev, wx[H:2 * H, :],
                            preferred_element_type=jnp.float32))
        gx = gx + b
        gx_f = gx[:, 0:4 * H]
        gx_b = gx[:, 4 * H:8 * H]

        run_direction(gx_f, whf_ref[...], yf_sc, reverse=False)
        run_direction(gx_b, whb_ref[...], yb_sc, reverse=True)

    # Decoder epilogue on cat(output[0], output[-1]) without materializing
    # the concat: feat = [yf[0] | yb[0] | yf[-1] | yb[-1]]  (batch, 4H)
    last = (seq_len - 1) * batch
    dw = dec_w_ref[...]                                # (4H, 2) f32
    logits = (jnp.dot(yf_sc[0:batch, :], dw[0 * H:1 * H, :],
                      preferred_element_type=jnp.float32)
              + jnp.dot(yb_sc[0:batch, :], dw[1 * H:2 * H, :],
                        preferred_element_type=jnp.float32)
              + jnp.dot(yf_sc[last:last + batch, :], dw[2 * H:3 * H, :],
                        preferred_element_type=jnp.float32)
              + jnp.dot(yb_sc[last:last + batch, :], dw[3 * H:4 * H, :],
                        preferred_element_type=jnp.float32)
              + dec_b_ref[...])
    out_ref[...] = logits.astype(out_ref.dtype)


# ----------------------------------------------------------------------------
# Weight prep (fuse per-layer weights for the kernel's layout)
# ----------------------------------------------------------------------------
def _prep_layer(layer):
    # PyTorch-shaped: w_ih (4H, in_dim), w_hh (4H, H), biases (4H,)
    wx = jnp.concatenate([layer['w_ih_f'].T, layer['w_ih_b'].T], axis=1)  # (in,8H)
    whf = layer['w_hh_f'].T                                               # (H,4H)
    whb = layer['w_hh_b'].T
    b = jnp.concatenate([layer['b_ih_f'] + layer['b_hh_f'],
                         layer['b_ih_b'] + layer['b_hh_b']]).reshape(1, -1)
    return (wx.astype(jnp.bfloat16), whf.astype(jnp.bfloat16),
            whb.astype(jnp.bfloat16), b.astype(jnp.float32))


# ----------------------------------------------------------------------------
# Parameter initialization (deterministic, PyTorch-like default init).
# ----------------------------------------------------------------------------
def init_params(key, vocab, embed_size, num_hiddens, num_layers):
    keys = iter(jax.random.split(key, 4 + 8 * num_layers))
    params = {}
    params['embedding'] = jax.random.normal(next(keys), (vocab, embed_size),
                                            jnp.float32)
    k_lstm = 1.0 / jnp.sqrt(jnp.float32(num_hiddens))
    layers = []
    for layer_idx in range(num_layers):
        in_dim = embed_size if layer_idx == 0 else 2 * num_hiddens
        layer = {}
        for d in ('f', 'b'):
            layer[f'w_ih_{d}'] = jax.random.uniform(
                next(keys), (4 * num_hiddens, in_dim), jnp.float32,
                -k_lstm, k_lstm)
            layer[f'w_hh_{d}'] = jax.random.uniform(
                next(keys), (4 * num_hiddens, num_hiddens), jnp.float32,
                -k_lstm, k_lstm)
            layer[f'b_ih_{d}'] = jax.random.uniform(
                next(keys), (4 * num_hiddens,), jnp.float32, -k_lstm, k_lstm)
            layer[f'b_hh_{d}'] = jax.random.uniform(
                next(keys), (4 * num_hiddens,), jnp.float32, -k_lstm, k_lstm)
        layers.append(layer)
    params['lstm'] = layers
    k_dec = 1.0 / jnp.sqrt(jnp.float32(4 * num_hiddens))
    params['dec_w'] = jax.random.uniform(next(keys), (2, 4 * num_hiddens),
                                         jnp.float32, -k_dec, k_dec)
    params['dec_b'] = jax.random.uniform(next(keys), (2,), jnp.float32,
                                         -k_dec, k_dec)
    return params


# ----------------------------------------------------------------------------
# Forward pass matching Rnn_simple.forward
# ----------------------------------------------------------------------------
def rnn_simple_forward(params, X):
    # X: (batch, seq) int32 token ids
    batch, seq_len = X.shape
    # embedding(X.permute(1,0)) -> (seq, batch, embed); data-dependent gather
    # stays in plain JAX — the recurrent/matmul hot path is the fused kernel.
    emb = jnp.take(params['embedding'], X.T, axis=0)
    embed = emb.shape[-1]
    hidden = params['lstm'][0]['w_hh_f'].shape[1]
    num_layers = len(params['lstm'])

    args = [emb.reshape(seq_len * batch, embed).astype(jnp.bfloat16)]
    for layer in params['lstm']:
        args.extend(_prep_layer(layer))
    args.append(params['dec_w'].T.astype(jnp.float32))          # (4H, 2)
    args.append(params['dec_b'].reshape(1, -1).astype(jnp.float32))

    kernel = functools.partial(_rnn_fused_kernel, seq_len=seq_len, batch=batch,
                               hidden=hidden, num_layers=num_layers)
    return pl.pallas_call(
        kernel,
        out_shape=jax.ShapeDtypeStruct((batch, 2), jnp.float32),
        in_specs=[pl.BlockSpec(memory_space=pltpu.MemorySpace.VMEM)] * len(args),
        out_specs=pl.BlockSpec(memory_space=pltpu.MemorySpace.VMEM),
        scratch_shapes=[pltpu.VMEM((seq_len * batch, hidden), jnp.float32),
                        pltpu.VMEM((seq_len * batch, hidden), jnp.float32)],
    )(*args)


if __name__ == "__main__":
    vocab = 50
    embed_size = 32
    num_hiddens = 32
    num_layers = 2
    batch = 2
    seq = 8

    root = jax.random.PRNGKey(0)
    k_params, k_tokens = jax.random.split(root)

    params = init_params(k_params, vocab, embed_size, num_hiddens, num_layers)
    X = jax.random.randint(k_tokens, (batch, seq), 0, vocab, dtype=jnp.int32)

    out = rnn_simple_forward(params, X)
    out = jax.block_until_ready(out)
    assert out.shape == (batch, 2), out.shape
    print("KERNEL_OK")
</pallas_src>

<mosaic_0001>
module attributes {stable_mosaic.version = 11 : i64} {
  func.func @_rnn_fused_kernel(%arg0: memref<16x32xbf16, #tpu.memory_space<vmem>>, %arg1: memref<32x256xbf16, #tpu.memory_space<vmem>>, %arg2: memref<32x128xbf16, #tpu.memory_space<vmem>>, %arg3: memref<32x128xbf16, #tpu.memory_space<vmem>>, %arg4: memref<1x256xf32, #tpu.memory_space<vmem>>, %arg5: memref<64x256xbf16, #tpu.memory_space<vmem>>, %arg6: memref<32x128xbf16, #tpu.memory_space<vmem>>, %arg7: memref<32x128xbf16, #tpu.memory_space<vmem>>, %arg8: memref<1x256xf32, #tpu.memory_space<vmem>>, %arg9: memref<128x2xf32, #tpu.memory_space<vmem>>, %arg10: memref<1x2xf32, #tpu.memory_space<vmem>>, %arg11: memref<2x2xf32, #tpu.memory_space<vmem>>, %arg12: memref<16x32xf32, #tpu.memory_space<vmem>>, %arg13: memref<16x32xf32, #tpu.memory_space<vmem>>) attributes {dimension_semantics = [], scalar_prefetch = 0 : i64, scratch_operands = 2 : i64, tpu.core_type = #tpu.core_type<tc>} {
    %c0 = arith.constant 0 : index
    %c0_0 = arith.constant 0 : index
    %0 = vector.load %arg1[%c0, %c0_0] : memref<32x256xbf16, #tpu.memory_space<vmem>>, vector<32x256xbf16>
    %c0_1 = arith.constant 0 : index
    %c0_2 = arith.constant 0 : index
    %1 = vector.load %arg4[%c0_1, %c0_2] : memref<1x256xf32, #tpu.memory_space<vmem>>, vector<1x256xf32>
    %c0_3 = arith.constant 0 : index
    %c0_4 = arith.constant 0 : index
    %2 = vector.load %arg0[%c0_3, %c0_4] : memref<16x32xbf16, #tpu.memory_space<vmem>>, vector<16x32xbf16>
    %cst = arith.constant dense<0.000000e+00> : vector<16x256xf32>
    %3 = tpu.matmul %2, %0, %cst {dimension_numbers = #tpu.dot_dimension_numbers<[1], [0], [0], [1], [0, 0, 1, 1], [], []>} : vector<16x32xbf16>, vector<32x256xbf16>, vector<16x256xf32> -> vector<16x256xf32>
    %4 = vector.broadcast %1 : vector<1x256xf32> to vector<16x256xf32>
    %5 = arith.addf %3, %4 : vector<16x256xf32>
    %6 = vector.extract_strided_slice %5 {offsets = [0, 0], sizes = [16, 128], strides = [1, 1]} : vector<16x256xf32> to vector<16x128xf32>
    %7 = vector.extract_strided_slice %5 {offsets = [0, 128], sizes = [16, 128], strides = [1, 1]} : vector<16x256xf32> to vector<16x128xf32>
    %c0_5 = arith.constant 0 : index
    %c0_6 = arith.constant 0 : index
    %8 = vector.load %arg2[%c0_5, %c0_6] : memref<32x128xbf16, #tpu.memory_space<vmem>>, vector<32x128xbf16>
    %cst_7 = arith.constant 0.000000e+00 : f32
    %9 = vector.broadcast %cst_7 : f32 to vector<2x32xf32>
    %cst_8 = arith.constant 0.000000e+00 : f32
    %10 = vector.broadcast %cst_8 : f32 to vector<2x32xf32>
    %11 = vector.extract_strided_slice %6 {offsets = [0, 0], sizes = [2, 128], strides = [1, 1]} : vector<16x128xf32> to vector<2x128xf32>
    %12 = arith.truncf %9 : vector<2x32xf32> to vector<2x32xbf16>
    %cst_9 = arith.constant dense<0.000000e+00> : vector<2x128xf32>
    %13 = tpu.matmul %12, %8, %cst_9 {dimension_numbers = #tpu.dot_dimension_numbers<[1], [0], [0], [1], [0, 0, 1, 1], [], []>} : vector<2x32xbf16>, vector<32x128xbf16>, vector<2x128xf32> -> vector<2x128xf32>
    %14 = arith.addf %11, %13 : vector<2x128xf32>
    %15 = arith.negf %14 : vector<2x128xf32>
    %16 = math.exp %15 : vector<2x128xf32>
    %cst_10 = arith.constant 1.000000e+00 : f32
    %17 = vector.broadcast %cst_10 : f32 to vector<2x128xf32>
    %18 = arith.addf %17, %16 : vector<2x128xf32>
    %19 = arith.divf %17, %18 : vector<2x128xf32>
    %20 = math.tanh %14 : vector<2x128xf32>
    %21 = vector.extract_strided_slice %19 {offsets = [0, 0], sizes = [2, 32], strides = [1, 1]} : vector<2x128xf32> to vector<2x32xf32>
    %22 = vector.extract_strided_slice %19 {offsets = [0, 32], sizes = [2, 32], strides = [1, 1]} : vector<2x128xf32> to vector<2x32xf32>
    %23 = vector.extract_strided_slice %20 {offsets = [0, 64], sizes = [2, 32], strides = [1, 1]} : vector<2x128xf32> to vector<2x32xf32>
    %24 = vector.extract_strided_slice %19 {offsets = [0, 96], sizes = [2, 32], strides = [1, 1]} : vector<2x128xf32> to vector<2x32xf32>
    %25 = arith.mulf %22, %10 : vector<2x32xf32>
    %26 = arith.mulf %21, %23 : vector<2x32xf32>
    %27 = arith.addf %25, %26 : vector<2x32xf32>
    %28 = math.tanh %27 : vector<2x32xf32>
    %29 = arith.mulf %24, %28 : vector<2x32xf32>
    %c0_11 = arith.constant 0 : index
    %c0_12 = arith.constant 0 : index
    %30 = vector.load %arg12[%c0_11, %c0_12] : memref<16x32xf32, #tpu.memory_space<vmem>>, vector<2x32xf32>
    tpu.vector_store %arg12[%c0_11, %c0_12], %29 {strides = array<i32>} : memref<16x32xf32, #tpu.memory_space<vmem>>, vector<2x32xf32>,
    %31 = vector.extract_strided_slice %6 {offsets = [2, 0], sizes = [2, 128], strides = [1, 1]} : vector<16x128xf32> to vector<2x128xf32>
    %32 = arith.truncf %29 : vector<2x32xf32> to vector<2x32xbf16>
    %cst_13 = arith.constant dense<0.000000e+00> : vector<2x128xf32>
    %33 = tpu.matmul %32, %8, %cst_13 {dimension_numbers = #tpu.dot_dimension_numbers<[1], [0], [0], [1], [0, 0, 1, 1], [], []>} : vector<2x32xbf16>, vector<32x128xbf16>, vector<2x128xf32> -> vector<2x128xf32>
    %34 = arith.addf %31, %33 : vector<2x128xf32>
    %35 = arith.negf %34 : vector<2x128xf32>
    %36 = math.exp %35 : vector<2x128xf32>
    %cst_14 = arith.constant 1.000000e+00 : f32
    %37 = vector.broadcast %cst_14 : f32 to vector<2x128xf32>
    %38 = arith.addf %37, %36 : vector<2x128xf32>
    %39 = arith.divf %37, %38 : vector<2x128xf32>
    %40 = math.tanh %34 : vector<2x128xf32>
    %41 = vector.extract_strided_slice %39 {offsets = [0, 0], sizes = [2, 32], strides = [1, 1]} : vector<2x128xf32> to vector<2x32xf32>
    %42 = vector.extract_strided_slice %39 {offsets = [0, 32], sizes = [2, 32], strides = [1, 1]} : vector<2x128xf32> to vector<2x32xf32>
    %43 = vector.extract_strided_slice %40 {offsets = [0, 64], sizes = [2, 32], strides = [1, 1]} : vector<2x128xf32> to vector<2x32xf32>
    %44 = vector.extract_strided_slice %39 {offsets = [0, 96], sizes = [2, 32], strides = [1, 1]} : vector<2x128xf32> to vector<2x32xf32>
    %45 = arith.mulf %42, %27 : vector<2x32xf32>
    %46 = arith.mulf %41, %43 : vector<2x32xf32>
    %47 = arith.addf %45, %46 : vector<2x32xf32>
    %48 = math.tanh %47 : vector<2x32xf32>
    %49 = arith.mulf %44, %48 : vector<2x32xf32>
    %c2 = arith.constant 2 : index
    %c0_15 = arith.constant 0 : index
    %50 = vector.load %arg12[%c2, %c0_15] : memref<16x32xf32, #tpu.memory_space<vmem>>, vector<2x32xf32>
    tpu.vector_store %arg12[%c2, %c0_15], %49 {strides = array<i32>} : memref<16x32xf32, #tpu.memory_space<vmem>>, vector<2x32xf32>,
    %51 = vector.extract_strided_slice %6 {offsets = [4, 0], sizes = [2, 128], strides = [1, 1]} : vector<16x128xf32> to vector<2x128xf32>
    %52 = arith.truncf %49 : vector<2x32xf32> to vector<2x32xbf16>
    %cst_16 = arith.constant dense<0.000000e+00> : vector<2x128xf32>
    %53 = tpu.matmul %52, %8, %cst_16 {dimension_numbers = #tpu.dot_dimension_numbers<[1], [0], [0], [1], [0, 0, 1, 1], [], []>} : vector<2x32xbf16>, vector<32x128xbf16>, vector<2x128xf32> -> vector<2x128xf32>
    %54 = arith.addf %51, %53 : vector<2x128xf32>
    %55 = arith.negf %54 : vector<2x128xf32>
    %56 = math.exp %55 : vector<2x128xf32>
    %cst_17 = arith.constant 1.000000e+00 : f32
    %57 = vector.broadcast %cst_17 : f32 to vector<2x128xf32>
    %58 = arith.addf %57, %56 : vector<2x128xf32>
    %59 = arith.divf %57, %58 : vector<2x128xf32>
    %60 = math.tanh %54 : vector<2x128xf32>
    %61 = vector.extract_strided_slice %59 {offsets = [0, 0], sizes = [2, 32], strides = [1, 1]} : vector<2x128xf32> to vector<2x32xf32>
    %62 = vector.extract_strided_slice %59 {offsets = [0, 32], sizes = [2, 32], strides = [1, 1]} : vector<2x128xf32> to vector<2x32xf32>
    %63 = vector.extract_strided_slice %60 {offsets = [0, 64], sizes = [2, 32], strides = [1, 1]} : vector<2x128xf32> to vector<2x32xf32>
    %64 = vector.extract_strided_slice %59 {offsets = [0, 96], sizes = [2, 32], strides = [1, 1]} : vector<2x128xf32> to vector<2x32xf32>
    %65 = arith.mulf %62, %47 : vector<2x32xf32>
    %66 = arith.mulf %61, %63 : vector<2x32xf32>
    %67 = arith.addf %65, %66 : vector<2x32xf32>
    %68 = math.tanh %67 : vector<2x32xf32>
    %69 = arith.mulf %64, %68 : vector<2x32xf32>
    %c4 = arith.constant 4 : index
    %c0_18 = arith.constant 0 : index
    %70 = vector.load %arg12[%c4, %c0_18] : memref<16x32xf32, #tpu.memory_space<vmem>>, vector<2x32xf32>
    tpu.vector_store %arg12[%c4, %c0_18], %69 {strides = array<i32>} : memref<16x32xf32, #tpu.memory_space<vmem>>, vector<2x32xf32>,
    %71 = vector.extract_strided_slice %6 {offsets = [6, 0], sizes = [2, 128], strides = [1, 1]} : vector<16x128xf32> to vector<2x128xf32>
    %72 = arith.truncf %69 : vector<2x32xf32> to vector<2x32xbf16>
    %cst_19 = arith.constant dense<0.000000e+00> : vector<2x128xf32>
    %73 = tpu.matmul %72, %8, %cst_19 {dimension_numbers = #tpu.dot_dimension_numbers<[1], [0], [0], [1], [0, 0, 1, 1], [], []>} : vector<2x32xbf16>, vector<32x128xbf16>, vector<2x128xf32> -> vector<2x128xf32>
    %74 = arith.addf %71, %73 : vector<2x128xf32>
    %75 = arith.negf %74 : vector<2x128xf32>
    %76 = math.exp %75 : vector<2x128xf32>
    %cst_20 = arith.constant 1.000000e+00 : f32
    %77 = vector.broadcast %cst_20 : f32 to vector<2x128xf32>
    %78 = arith.addf %77, %76 : vector<2x128xf32>
    %79 = arith.divf %77, %78 : vector<2x128xf32>
    %80 = math.tanh %74 : vector<2x128xf32>
    %81 = vector.extract_strided_slice %79 {offsets = [0, 0], sizes = [2, 32], strides = [1, 1]} : vector<2x128xf32> to vector<2x32xf32>
    %82 = vector.extract_strided_slice %79 {offsets = [0, 32], sizes = [2, 32], strides = [1, 1]} : vector<2x128xf32> to vector<2x32xf32>
    %83 = vector.extract_strided_slice %80 {offsets = [0, 64], sizes = [2, 32], strides = [1, 1]} : vector<2x128xf32> to vector<2x32xf32>
    %84 = vector.extract_strided_slice %79 {offsets = [0, 96], sizes = [2, 32], strides = [1, 1]} : vector<2x128xf32> to vector<2x32xf32>
    %85 = arith.mulf %82, %67 : vector<2x32xf32>
    %86 = arith.mulf %81, %83 : vector<2x32xf32>
    %87 = arith.addf %85, %86 : vector<2x32xf32>
    %88 = math.tanh %87 : vector<2x32xf32>
    %89 = arith.mulf %84, %88 : vector<2x32xf32>
    %c6 = arith.constant 6 : index
    %c0_21 = arith.constant 0 : index
    %90 = vector.load %arg12[%c6, %c0_21] : memref<16x32xf32, #tpu.memory_space<vmem>>, vector<2x32xf32>
    tpu.vector_store %arg12[%c6, %c0_21], %89 {strides = array<i32>} : memref<16x32xf32, #tpu.memory_space<vmem>>, vector<2x32xf32>,
    %91 = vector.extract_strided_slice %6 {offsets = [8, 0], sizes = [2, 128], strides = [1, 1]} : vector<16x128xf32> to vector<2x128xf32>
    %92 = arith.truncf %89 : vector<2x32xf32> to vector<2x32xbf16>
    %cst_22 = arith.constant dense<0.000000e+00> : vector<2x128xf32>
    %93 = tpu.matmul %92, %8, %cst_22 {dimension_numbers = #tpu.dot_dimension_numbers<[1], [0], [0], [1], [0, 0, 1, 1], [], []>} : vector<2x32xbf16>, vector<32x128xbf16>, vector<2x128xf32> -> vector<2x128xf32>
    %94 = arith.addf %91, %93 : vector<2x128xf32>
    %95 = arith.negf %94 : vector<2x128xf32>
    %96 = math.exp %95 : vector<2x128xf32>
    %cst_23 = arith.constant 1.000000e+00 : f32
    %97 = vector.broadcast %cst_23 : f32 to vector<2x128xf32>
    %98 = arith.addf %97, %96 : vector<2x128xf32>
    %99 = arith.divf %97, %98 : vector<2x128xf32>
    %100 = math.tanh %94 : vector<2x128xf32>
    %101 = vector.extract_strided_slice %99 {offsets = [0, 0], sizes = [2, 32], strides = [1, 1]} : vector<2x128xf32> to vector<2x32xf32>
    %102 = vector.extract_strided_slice %99 {offsets = [0, 32], sizes = [2, 32], strides = [1, 1]} : vector<2x128xf32> to vector<2x32xf32>
    %103 = vector.extract_strided_slice %100 {offsets = [0, 64], sizes = [2, 32], strides = [1, 1]} : vector<2x128xf32> to vector<2x32xf32>
    %104 = vector.extract_strided_slice %99 {offsets = [0, 96], sizes = [2, 32], strides = [1, 1]} : vector<2x128xf32> to vector<2x32xf32>
    %105 = arith.mulf %102, %87 : vector<2x32xf32>
    %106 = arith.mulf %101, %103 : vector<2x32xf32>
    %107 = arith.addf %105, %106 : vector<2x32xf32>
    %108 = math.tanh %107 : vector<2x32xf32>
    %109 = arith.mulf %104, %108 : vector<2x32xf32>
    %c8 = arith.constant 8 : index
    %c0_24 = arith.constant 0 : index
    %110 = vector.load %arg12[%c8, %c0_24] : memref<16x32xf32, #tpu.memory_space<vmem>>, vector<2x32xf32>
    tpu.vector_store %arg12[%c8, %c0_24], %109 {strides = array<i32>} : memref<16x32xf32, #tpu.memory_space<vmem>>, vector<2x32xf32>,
    %111 = vector.extract_strided_slice %6 {offsets = [10, 0], sizes = [2, 128], strides = [1, 1]} : vector<16x128xf32> to vector<2x128xf32>
    %112 = arith.truncf %109 : vector<2x32xf32> to vector<2x32xbf16>
    %cst_25 = arith.constant dense<0.000000e+00> : vector<2x128xf32>
    %113 = tpu.matmul %112, %8, %cst_25 {dimension_numbers = #tpu.dot_dimension_numbers<[1], [0], [0], [1], [0, 0, 1, 1], [], []>} : vector<2x32xbf16>, vector<32x128xbf16>, vector<2x128xf32> -> vector<2x128xf32>
    %114 = arith.addf %111, %113 : vector<2x128xf32>
    %115 = arith.negf %114 : vector<2x128xf32>
    %116 = math.exp %115 : vector<2x128xf32>
    %cst_26 = arith.constant 1.000000e+00 : f32
    %117 = vector.broadcast %cst_26 : f32 to vector<2x128xf32>
    %118 = arith.addf %117, %116 : vector<2x128xf32>
    %119 = arith.divf %117, %118 : vector<2x128xf32>
    %120 = math.tanh %114 : vector<2x128xf32>
    %121 = vector.extract_strided_slice %119 {offsets = [0, 0], sizes = [2, 32], strides = [1, 1]} : vector<2x128xf32> to vector<2x32xf32>
    %122 = vector.extract_strided_slice %119 {offsets = [0, 32], sizes = [2, 32], strides = [1, 1]} : vector<2x128xf32> to vector<2x32xf32>
    %123 = vector.extract_strided_slice %120 {offsets = [0, 64], sizes = [2, 32], strides = [1, 1]} : vector<2x128xf32> to vector<2x32xf32>
    %124 = vector.extract_strided_slice %119 {offsets = [0, 96], sizes = [2, 32], strides = [1, 1]} : vector<2x128xf32> to vector<2x32xf32>
    %125 = arith.mulf %122, %107 : vector<2x32xf32>
    %126 = arith.mulf %121, %123 : vector<2x32xf32>
    %127 = arith.addf %125, %126 : vector<2x32xf32>
    %128 = math.tanh %127 : vector<2x32xf32>
    %129 = arith.mulf %124, %128 : vector<2x32xf32>
    %c10 = arith.constant 10 : index
    %c0_27 = arith.constant 0 : index
    %130 = vector.load %arg12[%c10, %c0_27] : memref<16x32xf32, #tpu.memory_space<vmem>>, vector<2x32xf32>
    tpu.vector_store %arg12[%c10, %c0_27], %129 {strides = array<i32>} : memref<16x32xf32, #tpu.memory_space<vmem>>, vector<2x32xf32>,
    %131 = vector.extract_strided_slice %6 {offsets = [12, 0], sizes = [2, 128], strides = [1, 1]} : vector<16x128xf32> to vector<2x128xf32>
    %132 = arith.truncf %129 : vector<2x32xf32> to vector<2x32xbf16>
    %cst_28 = arith.constant dense<0.000000e+00> : vector<2x128xf32>
    %133 = tpu.matmul %132, %8, %cst_28 {dimension_numbers = #tpu.dot_dimension_numbers<[1], [0], [0], [1], [0, 0, 1, 1], [], []>} : vector<2x32xbf16>, vector<32x128xbf16>, vector<2x128xf32> -> vector<2x128xf32>
    %134 = arith.addf %131, %133 : vector<2x128xf32>
    %135 = arith.negf %134 : vector<2x128xf32>
    %136 = math.exp %135 : vector<2x128xf32>
    %cst_29 = arith.constant 1.000000e+00 : f32
    %137 = vector.broadcast %cst_29 : f32 to vector<2x128xf32>
    %138 = arith.addf %137, %136 : vector<2x128xf32>
    %139 = arith.divf %137, %138 : vector<2x128xf32>
    %140 = math.tanh %134 : vector<2x128xf32>
    %141 = vector.extract_strided_slice %139 {offsets = [0, 0], sizes = [2, 32], strides = [1, 1]} : vector<2x128xf32> to vector<2x32xf32>
    %142 = vector.extract_strided_slice %139 {offsets = [0, 32], sizes = [2, 32], strides = [1, 1]} : vector<2x128xf32> to vector<2x32xf32>
    %143 = vector.extract_strided_slice %140 {offsets = [0, 64], sizes = [2, 32], strides = [1, 1]} : vector<2x128xf32> to vector<2x32xf32>
    %144 = vector.extract_strided_slice %139 {offsets = [0, 96], sizes = [2, 32], strides = [1, 1]} : vector<2x128xf32> to vector<2x32xf32>
    %145 = arith.mulf %142, %127 : vector<2x32xf32>
    %146 = arith.mulf %141, %143 : vector<2x32xf32>
    %147 = arith.addf %145, %146 : vector<2x32xf32>
    %148 = math.tanh %147 : vector<2x32xf32>
    %149 = arith.mulf %144, %148 : vector<2x32xf32>
    %c12 = arith.constant 12 : index
    %c0_30 = arith.constant 0 : index
    %150 = vector.load %arg12[%c12, %c0_30] : memref<16x32xf32, #tpu.memory_space<vmem>>, vector<2x32xf32>
    tpu.vector_store %arg12[%c12, %c0_30], %149 {strides = array<i32>} : memref<16x32xf32, #tpu.memory_space<vmem>>, vector<2x32xf32>,
    %151 = vector.extract_strided_slice %6 {offsets = [14, 0], sizes = [2, 128], strides = [1, 1]} : vector<16x128xf32> to vector<2x128xf32>
    %152 = arith.truncf %149 : vector<2x32xf32> to vector<2x32xbf16>
    %cst_31 = arith.constant dense<0.000000e+00> : vector<2x128xf32>
    %153 = tpu.matmul %152, %8, %cst_31 {dimension_numbers = #tpu.dot_dimension_numbers<[1], [0], [0], [1], [0, 0, 1, 1], [], []>} : vector<2x32xbf16>, vector<32x128xbf16>, vector<2x128xf32> -> vector<2x128xf32>
    %154 = arith.addf %151, %153 : vector<2x128xf32>
    %155 = arith.negf %154 : vector<2x128xf32>
    %156 = math.exp %155 : vector<2x128xf32>
    %cst_32 = arith.constant 1.000000e+00 : f32
    %157 = vector.broadcast %cst_32 : f32 to vector<2x128xf32>
    %158 = arith.addf %157, %156 : vector<2x128xf32>
    %159 = arith.divf %157, %158 : vector<2x128xf32>
    %160 = math.tanh %154 : vector<2x128xf32>
    %161 = vector.extract_strided_slice %159 {offsets = [0, 0], sizes = [2, 32], strides = [1, 1]} : vector<2x128xf32> to vector<2x32xf32>
    %162 = vector.extract_strided_slice %159 {offsets = [0, 32], sizes = [2, 32], strides = [1, 1]} : vector<2x128xf32> to vector<2x32xf32>
    %163 = vector.extract_strided_slice %160 {offsets = [0, 64], sizes = [2, 32], strides = [1, 1]} : vector<2x128xf32> to vector<2x32xf32>
    %164 = vector.extract_strided_slice %159 {offsets = [0, 96], sizes = [2, 32], strides = [1, 1]} : vector<2x128xf32> to vector<2x32xf32>
    %165 = arith.mulf %162, %147 : vector<2x32xf32>
    %166 = arith.mulf %161, %163 : vector<2x32xf32>
    %167 = arith.addf %165, %166 : vector<2x32xf32>
    %168 = math.tanh %167 : vector<2x32xf32>
    %169 = arith.mulf %164, %168 : vector<2x32xf32>
    %c14 = arith.constant 14 : index
    %c0_33 = arith.constant 0 : index
    %170 = vector.load %arg12[%c14, %c0_33] : memref<16x32xf32, #tpu.memory_space<vmem>>, vector<2x32xf32>
    tpu.vector_store %arg12[%c14, %c0_33], %169 {strides = array<i32>} : memref<16x32xf32, #tpu.memory_space<vmem>>, vector<2x32xf32>,
    %c0_34 = arith.constant 0 : index
    %c0_35 = arith.constant 0 : index
    %171 = vector.load %arg3[%c0_34, %c0_35] : memref<32x128xbf16, #tpu.memory_space<vmem>>, vector<32x128xbf16>
    %cst_36 = arith.constant 0.000000e+00 : f32
    %172 = vector.broadcast %cst_36 : f32 to vector<2x32xf32>
    %cst_37 = arith.constant 0.000000e+00 : f32
    %173 = vector.broadcast %cst_37 : f32 to vector<2x32xf32>
    %174 = vector.extract_strided_slice %7 {offsets = [14, 0], sizes = [2, 128], strides = [1, 1]} : vector<16x128xf32> to vector<2x128xf32>
    %175 = arith.truncf %172 : vector<2x32xf32> to vector<2x32xbf16>
    %cst_38 = arith.constant dense<0.000000e+00> : vector<2x128xf32>
    %176 = tpu.matmul %175, %171, %cst_38 {dimension_numbers = #tpu.dot_dimension_numbers<[1], [0], [0], [1], [0, 0, 1, 1], [], []>} : vector<2x32xbf16>, vector<32x128xbf16>, vector<2x128xf32> -> vector<2x128xf32>
    %177 = arith.addf %174, %176 : vector<2x128xf32>
    %178 = arith.negf %177 : vector<2x128xf32>
    %179 = math.exp %178 : vector<2x128xf32>
    %cst_39 = arith.constant 1.000000e+00 : f32
    %180 = vector.broadcast %cst_39 : f32 to vector<2x128xf32>
    %181 = arith.addf %180, %179 : vector<2x128xf32>
    %182 = arith.divf %180, %181 : vector<2x128xf32>
    %183 = math.tanh %177 : vector<2x128xf32>
    %184 = vector.extract_strided_slice %182 {offsets = [0, 0], sizes = [2, 32], strides = [1, 1]} : vector<2x128xf32> to vector<2x32xf32>
    %185 = vector.extract_strided_slice %182 {offsets = [0, 32], sizes = [2, 32], strides = [1, 1]} : vector<2x128xf32> to vector<2x32xf32>
    %186 = vector.extract_strided_slice %183 {offsets = [0, 64], sizes = [2, 32], strides = [1, 1]} : vector<2x128xf32> to vector<2x32xf32>
    %187 = vector.extract_strided_slice %182 {offsets = [0, 96], sizes = [2, 32], strides = [1, 1]} : vector<2x128xf32> to vector<2x32xf32>
    %188 = arith.mulf %185, %173 : vector<2x32xf32>
    %189 = arith.mulf %184, %186 : vector<2x32xf32>
    %190 = arith.addf %188, %189 : vector<2x32xf32>
    %191 = math.tanh %190 : vector<2x32xf32>
    %192 = arith.mulf %187, %191 : vector<2x32xf32>
    %c14_40 = arith.constant 14 : index
    %c0_41 = arith.constant 0 : index
    %193 = vector.load %arg13[%c14_40, %c0_41] : memref<16x32xf32, #tpu.memory_space<vmem>>, vector<2x32xf32>
    tpu.vector_store %arg13[%c14_40, %c0_41], %192 {strides = array<i32>} : memref<16x32xf32, #tpu.memory_space<vmem>>, vector<2x32xf32>,
    %194 = vector.extract_strided_slice %7 {offsets = [12, 0], sizes = [2, 128], strides = [1, 1]} : vector<16x128xf32> to vector<2x128xf32>
    %195 = arith.truncf %192 : vector<2x32xf32> to vector<2x32xbf16>
    %cst_42 = arith.constant dense<0.000000e+00> : vector<2x128xf32>
    %196 = tpu.matmul %195, %171, %cst_42 {dimension_numbers = #tpu.dot_dimension_numbers<[1], [0], [0], [1], [0, 0, 1, 1], [], []>} : vector<2x32xbf16>, vector<32x128xbf16>, vector<2x128xf32> -> vector<2x128xf32>
    %197 = arith.addf %194, %196 : vector<2x128xf32>
    %198 = arith.negf %197 : vector<2x128xf32>
    %199 = math.exp %198 : vector<2x128xf32>
    %cst_43 = arith.constant 1.000000e+00 : f32
    %200 = vector.broadcast %cst_43 : f32 to vector<2x128xf32>
    %201 = arith.addf %200, %199 : vector<2x128xf32>
    %202 = arith.divf %200, %201 : vector<2x128xf32>
    %203 = math.tanh %197 : vector<2x128xf32>
    %204 = vector.extract_strided_slice %202 {offsets = [0, 0], sizes = [2, 32], strides = [1, 1]} : vector<2x128xf32> to vector<2x32xf32>
    %205 = vector.extract_strided_slice %202 {offsets = [0, 32], sizes = [2, 32], strides = [1, 1]} : vector<2x128xf32> to vector<2x32xf32>
    %206 = vector.extract_strided_slice %203 {offsets = [0, 64], sizes = [2, 32], strides = [1, 1]} : vector<2x128xf32> to vector<2x32xf32>
    %207 = vector.extract_strided_slice %202 {offsets = [0, 96], sizes = [2, 32], strides = [1, 1]} : vector<2x128xf32> to vector<2x32xf32>
    %208 = arith.mulf %205, %190 : vector<2x32xf32>
    %209 = arith.mulf %204, %206 : vector<2x32xf32>
    %210 = arith.addf %208, %209 : vector<2x32xf32>
    %211 = math.tanh %210 : vector<2x32xf32>
    %212 = arith.mulf %207, %211 : vector<2x32xf32>
    %c12_44 = arith.constant 12 : index
    %c0_45 = arith.constant 0 : index
    %213 = vector.load %arg13[%c12_44, %c0_45] : memref<16x32xf32, #tpu.memory_space<vmem>>, vector<2x32xf32>
    tpu.vector_store %arg13[%c12_44, %c0_45], %212 {strides = array<i32>} : memref<16x32xf32, #tpu.memory_space<vmem>>, vector<2x32xf32>,
    %214 = vector.extract_strided_slice %7 {offsets = [10, 0], sizes = [2, 128], strides = [1, 1]} : vector<16x128xf32> to vector<2x128xf32>
    %215 = arith.truncf %212 : vector<2x32xf32> to vector<2x32xbf16>
    %cst_46 = arith.constant dense<0.000000e+00> : vector<2x128xf32>
    %216 = tpu.matmul %215, %171, %cst_46 {dimension_numbers = #tpu.dot_dimension_numbers<[1], [0], [0], [1], [0, 0, 1, 1], [], []>} : vector<2x32xbf16>, vector<32x128xbf16>, vector<2x128xf32> -> vector<2x128xf32>
    %217 = arith.addf %214, %216 : vector<2x128xf32>
    %218 = arith.negf %217 : vector<2x128xf32>
    %219 = math.exp %218 : vector<2x128xf32>
    %cst_47 = arith.constant 1.000000e+00 : f32
    %220 = vector.broadcast %cst_47 : f32 to vector<2x128xf32>
    %221 = arith.addf %220, %219 : vector<2x128xf32>
    %222 = arith.divf %220, %221 : vector<2x128xf32>
    %223 = math.tanh %217 : vector<2x128xf32>
    %224 = vector.extract_strided_slice %222 {offsets = [0, 0], sizes = [2, 32], strides = [1, 1]} : vector<2x128xf32> to vector<2x32xf32>
    %225 = vector.extract_strided_slice %222 {offsets = [0, 32], sizes = [2, 32], strides = [1, 1]} : vector<2x128xf32> to vector<2x32xf32>
    %226 = vector.extract_strided_slice %223 {offsets = [0, 64], sizes = [2, 32], strides = [1, 1]} : vector<2x128xf32> to vector<2x32xf32>
    %227 = vector.extract_strided_slice %222 {offsets = [0, 96], sizes = [2, 32], strides = [1, 1]} : vector<2x128xf32> to vector<2x32xf32>
    %228 = arith.mulf %225, %210 : vector<2x32xf32>
    %229 = arith.mulf %224, %226 : vector<2x32xf32>
    %230 = arith.addf %228, %229 : vector<2x32xf32>
    %231 = math.tanh %230 : vector<2x32xf32>
    %232 = arith.mulf %227, %231 : vector<2x32xf32>
    %c10_48 = arith.constant 10 : index
    %c0_49 = arith.constant 0 : index
    %233 = vector.load %arg13[%c10_48, %c0_49] : memref<16x32xf32, #tpu.memory_space<vmem>>, vector<2x32xf32>
    tpu.vector_store %arg13[%c10_48, %c0_49], %232 {strides = array<i32>} : memref<16x32xf32, #tpu.memory_space<vmem>>, vector<2x32xf32>,
    %234 = vector.extract_strided_slice %7 {offsets = [8, 0], sizes = [2, 128], strides = [1, 1]} : vector<16x128xf32> to vector<2x128xf32>
    %235 = arith.truncf %232 : vector<2x32xf32> to vector<2x32xbf16>
    %cst_50 = arith.constant dense<0.000000e+00> : vector<2x128xf32>
    %236 = tpu.matmul %235, %171, %cst_50 {dimension_numbers = #tpu.dot_dimension_numbers<[1], [0], [0], [1], [0, 0, 1, 1], [], []>} : vector<2x32xbf16>, vector<32x128xbf16>, vector<2x128xf32> -> vector<2x128xf32>
    %237 = arith.addf %234, %236 : vector<2x128xf32>
    %238 = arith.negf %237 : vector<2x128xf32>
    %239 = math.exp %238 : vector<2x128xf32>
    %cst_51 = arith.constant 1.000000e+00 : f32
    %240 = vector.broadcast %cst_51 : f32 to vector<2x128xf32>
    %241 = arith.addf %240, %239 : vector<2x128xf32>
    %242 = arith.divf %240, %241 : vector<2x128xf32>
    %243 = math.tanh %237 : vector<2x128xf32>
    %244 = vector.extract_strided_slice %242 {offsets = [0, 0], sizes = [2, 32], strides = [1, 1]} : vector<2x128xf32> to vector<2x32xf32>
    %245 = vector.extract_strided_slice %242 {offsets = [0, 32], sizes = [2, 32], strides = [1, 1]} : vector<2x128xf32> to vector<2x32xf32>
    %246 = vector.extract_strided_slice %243 {offsets = [0, 64], sizes = [2, 32], strides = [1, 1]} : vector<2x128xf32> to vector<2x32xf32>
    %247 = vector.extract_strided_slice %242 {offsets = [0, 96], sizes = [2, 32], strides = [1, 1]} : vector<2x128xf32> to vector<2x32xf32>
    %248 = arith.mulf %245, %230 : vector<2x32xf32>
    %249 = arith.mulf %244, %246 : vector<2x32xf32>
    %250 = arith.addf %248, %249 : vector<2x32xf32>
    %251 = math.tanh %250 : vector<2x32xf32>
    %252 = arith.mulf %247, %251 : vector<2x32xf32>
    %c8_52 = arith.constant 8 : index
    %c0_53 = arith.constant 0 : index
    %253 = vector.load %arg13[%c8_52, %c0_53] : memref<16x32xf32, #tpu.memory_space<vmem>>, vector<2x32xf32>
    tpu.vector_store %arg13[%c8_52, %c0_53], %252 {strides = array<i32>} : memref<16x32xf32, #tpu.memory_space<vmem>>, vector<2x32xf32>,
    %254 = vector.extract_strided_slice %7 {offsets = [6, 0], sizes = [2, 128], strides = [1, 1]} : vector<16x128xf32> to vector<2x128xf32>
    %255 = arith.truncf %252 : vector<2x32xf32> to vector<2x32xbf16>
    %cst_54 = arith.constant dense<0.000000e+00> : vector<2x128xf32>
    %256 = tpu.matmul %255, %171, %cst_54 {dimension_numbers = #tpu.dot_dimension_numbers<[1], [0], [0], [1], [0, 0, 1, 1], [], []>} : vector<2x32xbf16>, vector<32x128xbf16>, vector<2x128xf32> -> vector<2x128xf32>
    %257 = arith.addf %254, %256 : vector<2x128xf32>
    %258 = arith.negf %257 : vector<2x128xf32>
    %259 = math.exp %258 : vector<2x128xf32>
    %cst_55 = arith.constant 1.000000e+00 : f32
    %260 = vector.broadcast %cst_55 : f32 to vector<2x128xf32>
    %261 = arith.addf %260, %259 : vector<2x128xf32>
    %262 = arith.divf %260, %261 : vector<2x128xf32>
    %263 = math.tanh %257 : vector<2x128xf32>
    %264 = vector.extract_strided_slice %262 {offsets = [0, 0], sizes = [2, 32], strides = [1, 1]} : vector<2x128xf32> to vector<2x32xf32>
    %265 = vector.extract_strided_slice %262 {offsets = [0, 32], sizes = [2, 32], strides = [1, 1]} : vector<2x128xf32> to vector<2x32xf32>
    %266 = vector.extract_strided_slice %263 {offsets = [0, 64], sizes = [2, 32], strides = [1, 1]} : vector<2x128xf32> to vector<2x32xf32>
    %267 = vector.extract_strided_slice %262 {offsets = [0, 96], sizes = [2, 32], strides = [1, 1]} : vector<2x128xf32> to vector<2x32xf32>
    %268 = arith.mulf %265, %250 : vector<2x32xf32>
    %269 = arith.mulf %264, %266 : vector<2x32xf32>
    %270 = arith.addf %268, %269 : vector<2x32xf32>
    %271 = math.tanh %270 : vector<2x32xf32>
    %272 = arith.mulf %267, %271 : vector<2x32xf32>
    %c6_56 = arith.constant 6 : index
    %c0_57 = arith.constant 0 : index
    %273 = vector.load %arg13[%c6_56, %c0_57] : memref<16x32xf32, #tpu.memory_space<vmem>>, vector<2x32xf32>
    tpu.vector_store %arg13[%c6_56, %c0_57], %272 {strides = array<i32>} : memref<16x32xf32, #tpu.memory_space<vmem>>, vector<2x32xf32>,
    %274 = vector.extract_strided_slice %7 {offsets = [4, 0], sizes = [2, 128], strides = [1, 1]} : vector<16x128xf32> to vector<2x128xf32>
    %275 = arith.truncf %272 : vector<2x32xf32> to vector<2x32xbf16>
    %cst_58 = arith.constant dense<0.000000e+00> : vector<2x128xf32>
    %276 = tpu.matmul %275, %171, %cst_58 {dimension_numbers = #tpu.dot_dimension_numbers<[1], [0], [0], [1], [0, 0, 1, 1], [], []>} : vector<2x32xbf16>, vector<32x128xbf16>, vector<2x128xf32> -> vector<2x128xf32>
    %277 = arith.addf %274, %276 : vector<2x128xf32>
    %278 = arith.negf %277 : vector<2x128xf32>
    %279 = math.exp %278 : vector<2x128xf32>
    %cst_59 = arith.constant 1.000000e+00 : f32
    %280 = vector.broadcast %cst_59 : f32 to vector<2x128xf32>
    %281 = arith.addf %280, %279 : vector<2x128xf32>
    %282 = arith.divf %280, %281 : vector<2x128xf32>
    %283 = math.tanh %277 : vector<2x128xf32>
    %284 = vector.extract_strided_slice %282 {offsets = [0, 0], sizes = [2, 32], strides = [1, 1]} : vector<2x128xf32> to vector<2x32xf32>
    %285 = vector.extract_strided_slice %282 {offsets = [0, 32], sizes = [2, 32], strides = [1, 1]} : vector<2x128xf32> to vector<2x32xf32>
    %286 = vector.extract_strided_slice %283 {offsets = [0, 64], sizes = [2, 32], strides = [1, 1]} : vector<2x128xf32> to vector<2x32xf32>
    %287 = vector.extract_strided_slice %282 {offsets = [0, 96], sizes = [2, 32], strides = [1, 1]} : vector<2x128xf32> to vector<2x32xf32>
    %288 = arith.mulf %285, %270 : vector<2x32xf32>
    %289 = arith.mulf %284, %286 : vector<2x32xf32>
    %290 = arith.addf %288, %289 : vector<2x32xf32>
    %291 = math.tanh %290 : vector<2x32xf32>
    %292 = arith.mulf %287, %291 : vector<2x32xf32>
    %c4_60 = arith.constant 4 : index
    %c0_61 = arith.constant 0 : index
    %293 = vector.load %arg13[%c4_60, %c0_61] : memref<16x32xf32, #tpu.memory_space<vmem>>, vector<2x32xf32>
    tpu.vector_store %arg13[%c4_60, %c0_61], %292 {strides = array<i32>} : memref<16x32xf32, #tpu.memory_space<vmem>>, vector<2x32xf32>,
    %294 = vector.extract_strided_slice %7 {offsets = [2, 0], sizes = [2, 128], strides = [1, 1]} : vector<16x128xf32> to vector<2x128xf32>
    %295 = arith.truncf %292 : vector<2x32xf32> to vector<2x32xbf16>
    %cst_62 = arith.constant dense<0.000000e+00> : vector<2x128xf32>
    %296 = tpu.matmul %295, %171, %cst_62 {dimension_numbers = #tpu.dot_dimension_numbers<[1], [0], [0], [1], [0, 0, 1, 1], [], []>} : vector<2x32xbf16>, vector<32x128xbf16>, vector<2x128xf32> -> vector<2x128xf32>
    %297 = arith.addf %294, %296 : vector<2x128xf32>
    %298 = arith.negf %297 : vector<2x128xf32>
    %299 = math.exp %298 : vector<2x128xf32>
    %cst_63 = arith.constant 1.000000e+00 : f32
    %300 = vector.broadcast %cst_63 : f32 to vector<2x128xf32>
    %301 = arith.addf %300, %299 : vector<2x128xf32>
    %302 = arith.divf %300, %301 : vector<2x128xf32>
    %303 = math.tanh %297 : vector<2x128xf32>
    %304 = vector.extract_strided_slice %302 {offsets = [0, 0], sizes = [2, 32], strides = [1, 1]} : vector<2x128xf32> to vector<2x32xf32>
    %305 = vector.extract_strided_slice %302 {offsets = [0, 32], sizes = [2, 32], strides = [1, 1]} : vector<2x128xf32> to vector<2x32xf32>
    %306 = vector.extract_strided_slice %303 {offsets = [0, 64], sizes = [2, 32], strides = [1, 1]} : vector<2x128xf32> to vector<2x32xf32>
    %307 = vector.extract_strided_slice %302 {offsets = [0, 96], sizes = [2, 32], strides = [1, 1]} : vector<2x128xf32> to vector<2x32xf32>
    %308 = arith.mulf %305, %290 : vector<2x32xf32>
    %309 = arith.mulf %304, %306 : vector<2x32xf32>
    %310 = arith.addf %308, %309 : vector<2x32xf32>
    %311 = math.tanh %310 : vector<2x32xf32>
    %312 = arith.mulf %307, %311 : vector<2x32xf32>
    %c2_64 = arith.constant 2 : index
    %c0_65 = arith.constant 0 : index
    %313 = vector.load %arg13[%c2_64, %c0_65] : memref<16x32xf32, #tpu.memory_space<vmem>>, vector<2x32xf32>
    tpu.vector_store %arg13[%c2_64, %c0_65], %312 {strides = array<i32>} : memref<16x32xf32, #tpu.memory_space<vmem>>, vector<2x32xf32>,
    %314 = vector.extract_strided_slice %7 {offsets = [0, 0], sizes = [2, 128], strides = [1, 1]} : vector<16x128xf32> to vector<2x128xf32>
    %315 = arith.truncf %312 : vector<2x32xf32> to vector<2x32xbf16>
    %cst_66 = arith.constant dense<0.000000e+00> : vector<2x128xf32>
    %316 = tpu.matmul %315, %171, %cst_66 {dimension_numbers = #tpu.dot_dimension_numbers<[1], [0], [0], [1], [0, 0, 1, 1], [], []>} : vector<2x32xbf16>, vector<32x128xbf16>, vector<2x128xf32> -> vector<2x128xf32>
    %317 = arith.addf %314, %316 : vector<2x128xf32>
    %318 = arith.negf %317 : vector<2x128xf32>
    %319 = math.exp %318 : vector<2x128xf32>
    %cst_67 = arith.constant 1.000000e+00 : f32
    %320 = vector.broadcast %cst_67 : f32 to vector<2x128xf32>
    %321 = arith.addf %320, %319 : vector<2x128xf32>
    %322 = arith.divf %320, %321 : vector<2x128xf32>
    %323 = math.tanh %317 : vector<2x128xf32>
    %324 = vector.extract_strided_slice %322 {offsets = [0, 0], sizes = [2, 32], strides = [1, 1]} : vector<2x128xf32> to vector<2x32xf32>
    %325 = vector.extract_strided_slice %322 {offsets = [0, 32], sizes = [2, 32], strides = [1, 1]} : vector<2x128xf32> to vector<2x32xf32>
    %326 = vector.extract_strided_slice %323 {offsets = [0, 64], sizes = [2, 32], strides = [1, 1]} : vector<2x128xf32> to vector<2x32xf32>
    %327 = vector.extract_strided_slice %322 {offsets = [0, 96], sizes = [2, 32], strides = [1, 1]} : vector<2x128xf32> to vector<2x32xf32>
    %328 = arith.mulf %325, %310 : vector<2x32xf32>
    %329 = arith.mulf %324, %326 : vector<2x32xf32>
    %330 = arith.addf %328, %329 : vector<2x32xf32>
    %331 = math.tanh %330 : vector<2x32xf32>
    %332 = arith.mulf %327, %331 : vector<2x32xf32>
    %c0_68 = arith.constant 0 : index
    %c0_69 = arith.constant 0 : index
    %333 = vector.load %arg13[%c0_68, %c0_69] : memref<16x32xf32, #tpu.memory_space<vmem>>, vector<2x32xf32>
    tpu.vector_store %arg13[%c0_68, %c0_69], %332 {strides = array<i32>} : memref<16x32xf32, #tpu.memory_space<vmem>>, vector<2x32xf32>,
    %c0_70 = arith.constant 0 : index
    %c0_71 = arith.constant 0 : index
    %334 = vector.load %arg5[%c0_70, %c0_71] : memref<64x256xbf16, #tpu.memory_space<vmem>>, vector<64x256xbf16>
    %c0_72 = arith.constant 0 : index
    %c0_73 = arith.constant 0 : index
    %335 = vector.load %arg8[%c0_72, %c0_73] : memref<1x256xf32, #tpu.memory_space<vmem>>, vector<1x256xf32>
    %c0_74 = arith.constant 0 : index
    %c0_75 = arith.constant 0 : index
    %336 = vector.load %arg12[%c0_74, %c0_75] : memref<16x32xf32, #tpu.memory_space<vmem>>, vector<16x32xf32>
    %337 = arith.truncf %336 : vector<16x32xf32> to vector<16x32xbf16>
    %c0_76 = arith.constant 0 : index
    %c0_77 = arith.constant 0 : index
    %338 = vector.load %arg13[%c0_76, %c0_77] : memref<16x32xf32, #tpu.memory_space<vmem>>, vector<16x32xf32>
    %339 = arith.truncf %338 : vector<16x32xf32> to vector<16x32xbf16>
    %340 = vector.extract_strided_slice %334 {offsets = [0, 0], sizes = [32, 256], strides = [1, 1]} : vector<64x256xbf16> to vector<32x256xbf16>
    %cst_78 = arith.constant dense<0.000000e+00> : vector<16x256xf32>
    %341 = tpu.matmul %337, %340, %cst_78 {dimension_numbers = #tpu.dot_dimension_numbers<[1], [0], [0], [1], [0, 0, 1, 1], [], []>} : vector<16x32xbf16>, vector<32x256xbf16>, vector<16x256xf32> -> vector<16x256xf32>
    %342 = vector.extract_strided_slice %334 {offsets = [32, 0], sizes = [32, 256], strides = [1, 1]} : vector<64x256xbf16> to vector<32x256xbf16>
    %cst_79 = arith.constant dense<0.000000e+00> : vector<16x256xf32>
    %343 = tpu.matmul %339, %342, %cst_79 {dimension_numbers = #tpu.dot_dimension_numbers<[1], [0], [0], [1], [0, 0, 1, 1], [], []>} : vector<16x32xbf16>, vector<32x256xbf16>, vector<16x256xf32> -> vector<16x256xf32>
    %344 = arith.addf %341, %343 : vector<16x256xf32>
    %345 = vector.broadcast %335 : vector<1x256xf32> to vector<16x256xf32>
    %346 = arith.addf %344, %345 : vector<16x256xf32>
    %347 = vector.extract_strided_slice %346 {offsets = [0, 0], sizes = [16, 128], strides = [1, 1]} : vector<16x256xf32> to vector<16x128xf32>
    %348 = vector.extract_strided_slice %346 {offsets = [0, 128], sizes = [16, 128], strides = [1, 1]} : vector<16x256xf32> to vector<16x128xf32>
    %c0_80 = arith.constant 0 : index
    %c0_81 = arith.constant 0 : index
    %349 = vector.load %arg6[%c0_80, %c0_81] : memref<32x128xbf16, #tpu.memory_space<vmem>>, vector<32x128xbf16>
    %cst_82 = arith.constant 0.000000e+00 : f32
    %350 = vector.broadcast %cst_82 : f32 to vector<2x32xf32>
    %cst_83 = arith.constant 0.000000e+00 : f32
    %351 = vector.broadcast %cst_83 : f32 to vector<2x32xf32>
    %352 = vector.extract_strided_slice %347 {offsets = [0, 0], sizes = [2, 128], strides = [1, 1]} : vector<16x128xf32> to vector<2x128xf32>
    %353 = arith.truncf %350 : vector<2x32xf32> to vector<2x32xbf16>
    %cst_84 = arith.constant dense<0.000000e+00> : vector<2x128xf32>
    %354 = tpu.matmul %353, %349, %cst_84 {dimension_numbers = #tpu.dot_dimension_numbers<[1], [0], [0], [1], [0, 0, 1, 1], [], []>} : vector<2x32xbf16>, vector<32x128xbf16>, vector<2x128xf32> -> vector<2x128xf32>
    %355 = arith.addf %352, %354 : vector<2x128xf32>
    %356 = arith.negf %355 : vector<2x128xf32>
    %357 = math.exp %356 : vector<2x128xf32>
    %cst_85 = arith.constant 1.000000e+00 : f32
    %358 = vector.broadcast %cst_85 : f32 to vector<2x128xf32>
    %359 = arith.addf %358, %357 : vector<2x128xf32>
    %360 = arith.divf %358, %359 : vector<2x128xf32>
    %361 = math.tanh %355 : vector<2x128xf32>
    %362 = vector.extract_strided_slice %360 {offsets = [0, 0], sizes = [2, 32], strides = [1, 1]} : vector<2x128xf32> to vector<2x32xf32>
    %363 = vector.extract_strided_slice %360 {offsets = [0, 32], sizes = [2, 32], strides = [1, 1]} : vector<2x128xf32> to vector<2x32xf32>
    %364 = vector.extract_strided_slice %361 {offsets = [0, 64], sizes = [2, 32], strides = [1, 1]} : vector<2x128xf32> to vector<2x32xf32>
    %365 = vector.extract_strided_slice %360 {offsets = [0, 96], sizes = [2, 32], strides = [1, 1]} : vector<2x128xf32> to vector<2x32xf32>
    %366 = arith.mulf %363, %351 : vector<2x32xf32>
    %367 = arith.mulf %362, %364 : vector<2x32xf32>
    %368 = arith.addf %366, %367 : vector<2x32xf32>
    %369 = math.tanh %368 : vector<2x32xf32>
    %370 = arith.mulf %365, %369 : vector<2x32xf32>
    %c0_86 = arith.constant 0 : index
    %c0_87 = arith.constant 0 : index
    %371 = vector.load %arg12[%c0_86, %c0_87] : memref<16x32xf32, #tpu.memory_space<vmem>>, vector<2x32xf32>
    tpu.vector_store %arg12[%c0_86, %c0_87], %370 {strides = array<i32>} : memref<16x32xf32, #tpu.memory_space<vmem>>, vector<2x32xf32>,
    %372 = vector.extract_strided_slice %347 {offsets = [2, 0], sizes = [2, 128], strides = [1, 1]} : vector<16x128xf32> to vector<2x128xf32>
    %373 = arith.truncf %370 : vector<2x32xf32> to vector<2x32xbf16>
    %cst_88 = arith.constant dense<0.000000e+00> : vector<2x128xf32>
    %374 = tpu.matmul %373, %349, %cst_88 {dimension_numbers = #tpu.dot_dimension_numbers<[1], [0], [0], [1], [0, 0, 1, 1], [], []>} : vector<2x32xbf16>, vector<32x128xbf16>, vector<2x128xf32> -> vector<2x128xf32>
    %375 = arith.addf %372, %374 : vector<2x128xf32>
    %376 = arith.negf %375 : vector<2x128xf32>
    %377 = math.exp %376 : vector<2x128xf32>
    %cst_89 = arith.constant 1.000000e+00 : f32
    %378 = vector.broadcast %cst_89 : f32 to vector<2x128xf32>
    %379 = arith.addf %378, %377 : vector<2x128xf32>
    %380 = arith.divf %378, %379 : vector<2x128xf32>
    %381 = math.tanh %375 : vector<2x128xf32>
    %382 = vector.extract_strided_slice %380 {offsets = [0, 0], sizes = [2, 32], strides = [1, 1]} : vector<2x128xf32> to vector<2x32xf32>
    %383 = vector.extract_strided_slice %380 {offsets = [0, 32], sizes = [2, 32], strides = [1, 1]} : vector<2x128xf32> to vector<2x32xf32>
    %384 = vector.extract_strided_slice %381 {offsets = [0, 64], sizes = [2, 32], strides = [1, 1]} : vector<2x128xf32> to vector<2x32xf32>
    %385 = vector.extract_strided_slice %380 {offsets = [0, 96], sizes = [2, 32], strides = [1, 1]} : vector<2x128xf32> to vector<2x32xf32>
    %386 = arith.mulf %383, %368 : vector<2x32xf32>
    %387 = arith.mulf %382, %384 : vector<2x32xf32>
    %388 = arith.addf %386, %387 : vector<2x32xf32>
    %389 = math.tanh %388 : vector<2x32xf32>
    %390 = arith.mulf %385, %389 : vector<2x32xf32>
    %c2_90 = arith.constant 2 : index
    %c0_91 = arith.constant 0 : index
    %391 = vector.load %arg12[%c2_90, %c0_91] : memref<16x32xf32, #tpu.memory_space<vmem>>, vector<2x32xf32>
    tpu.vector_store %arg12[%c2_90, %c0_91], %390 {strides = array<i32>} : memref<16x32xf32, #tpu.memory_space<vmem>>, vector<2x32xf32>,
    %392 = vector.extract_strided_slice %347 {offsets = [4, 0], sizes = [2, 128], strides = [1, 1]} : vector<16x128xf32> to vector<2x128xf32>
    %393 = arith.truncf %390 : vector<2x32xf32> to vector<2x32xbf16>
    %cst_92 = arith.constant dense<0.000000e+00> : vector<2x128xf32>
    %394 = tpu.matmul %393, %349, %cst_92 {dimension_numbers = #tpu.dot_dimension_numbers<[1], [0], [0], [1], [0, 0, 1, 1], [], []>} : vector<2x32xbf16>, vector<32x128xbf16>, vector<2x128xf32> -> vector<2x128xf32>
    %395 = arith.addf %392, %394 : vector<2x128xf32>
    %396 = arith.negf %395 : vector<2x128xf32>
    %397 = math.exp %396 : vector<2x128xf32>
    %cst_93 = arith.constant 1.000000e+00 : f32
    %398 = vector.broadcast %cst_93 : f32 to vector<2x128xf32>
    %399 = arith.addf %398, %397 : vector<2x128xf32>
    %400 = arith.divf %398, %399 : vector<2x128xf32>
    %401 = math.tanh %395 : vector<2x128xf32>
    %402 = vector.extract_strided_slice %400 {offsets = [0, 0], sizes = [2, 32], strides = [1, 1]} : vector<2x128xf32> to vector<2x32xf32>
    %403 = vector.extract_strided_slice %400 {offsets = [0, 32], sizes = [2, 32], strides = [1, 1]} : vector<2x128xf32> to vector<2x32xf32>
    %404 = vector.extract_strided_slice %401 {offsets = [0, 64], sizes = [2, 32], strides = [1, 1]} : vector<2x128xf32> to vector<2x32xf32>
    %405 = vector.extract_strided_slice %400 {offsets = [0, 96], sizes = [2, 32], strides = [1, 1]} : vector<2x128xf32> to vector<2x32xf32>
    %406 = arith.mulf %403, %388 : vector<2x32xf32>
    %407 = arith.mulf %402, %404 : vector<2x32xf32>
    %408 = arith.addf %406, %407 : vector<2x32xf32>
    %409 = math.tanh %408 : vector<2x32xf32>
    %410 = arith.mulf %405, %409 : vector<2x32xf32>
    %c4_94 = arith.constant 4 : index
    %c0_95 = arith.constant 0 : index
    %411 = vector.load %arg12[%c4_94, %c0_95] : memref<16x32xf32, #tpu.memory_space<vmem>>, vector<2x32xf32>
    tpu.vector_store %arg12[%c4_94, %c0_95], %410 {strides = array<i32>} : memref<16x32xf32, #tpu.memory_space<vmem>>, vector<2x32xf32>,
    %412 = vector.extract_strided_slice %347 {offsets = [6, 0], sizes = [2, 128], strides = [1, 1]} : vector<16x128xf32> to vector<2x128xf32>
    %413 = arith.truncf %410 : vector<2x32xf32> to vector<2x32xbf16>
    %cst_96 = arith.constant dense<0.000000e+00> : vector<2x128xf32>
    %414 = tpu.matmul %413, %349, %cst_96 {dimension_numbers = #tpu.dot_dimension_numbers<[1], [0], [0], [1], [0, 0, 1, 1], [], []>} : vector<2x32xbf16>, vector<32x128xbf16>, vector<2x128xf32> -> vector<2x128xf32>
    %415 = arith.addf %412, %414 : vector<2x128xf32>
    %416 = arith.negf %415 : vector<2x128xf32>
    %417 = math.exp %416 : vector<2x128xf32>
    %cst_97 = arith.constant 1.000000e+00 : f32
    %418 = vector.broadcast %cst_97 : f32 to vector<2x128xf32>
    %419 = arith.addf %418, %417 : vector<2x128xf32>
    %420 = arith.divf %418, %419 : vector<2x128xf32>
    %421 = math.tanh %415 : vector<2x128xf32>
    %422 = vector.extract_strided_slice %420 {offsets = [0, 0], sizes = [2, 32], strides = [1, 1]} : vector<2x128xf32> to vector<2x32xf32>
    %423 = vector.extract_strided_slice %420 {offsets = [0, 32], sizes = [2, 32], strides = [1, 1]} : vector<2x128xf32> to vector<2x32xf32>
    %424 = vector.extract_strided_slice %421 {offsets = [0, 64], sizes = [2, 32], strides = [1, 1]} : vector<2x128xf32> to vector<2x32xf32>
    %425 = vector.extract_strided_slice %420 {offsets = [0, 96], sizes = [2, 32], strides = [1, 1]} : vector<2x128xf32> to vector<2x32xf32>
    %426 = arith.mulf %423, %408 : vector<2x32xf32>
    %427 = arith.mulf %422, %424 : vector<2x32xf32>
    %428 = arith.addf %426, %427 : vector<2x32xf32>
    %429 = math.tanh %428 : vector<2x32xf32>
    %430 = arith.mulf %425, %429 : vector<2x32xf32>
    %c6_98 = arith.constant 6 : index
    %c0_99 = arith.constant 0 : index
    %431 = vector.load %arg12[%c6_98, %c0_99] : memref<16x32xf32, #tpu.memory_space<vmem>>, vector<2x32xf32>
    tpu.vector_store %arg12[%c6_98, %c0_99], %430 {strides = array<i32>} : memref<16x32xf32, #tpu.memory_space<vmem>>, vector<2x32xf32>,
    %432 = vector.extract_strided_slice %347 {offsets = [8, 0], sizes = [2, 128], strides = [1, 1]} : vector<16x128xf32> to vector<2x128xf32>
    %433 = arith.truncf %430 : vector<2x32xf32> to vector<2x32xbf16>
    %cst_100 = arith.constant dense<0.000000e+00> : vector<2x128xf32>
    %434 = tpu.matmul %433, %349, %cst_100 {dimension_numbers = #tpu.dot_dimension_numbers<[1], [0], [0], [1], [0, 0, 1, 1], [], []>} : vector<2x32xbf16>, vector<32x128xbf16>, vector<2x128xf32> -> vector<2x128xf32>
    %435 = arith.addf %432, %434 : vector<2x128xf32>
    %436 = arith.negf %435 : vector<2x128xf32>
    %437 = math.exp %436 : vector<2x128xf32>
    %cst_101 = arith.constant 1.000000e+00 : f32
    %438 = vector.broadcast %cst_101 : f32 to vector<2x128xf32>
    %439 = arith.addf %438, %437 : vector<2x128xf32>
    %440 = arith.divf %438, %439 : vector<2x128xf32>
    %441 = math.tanh %435 : vector<2x128xf32>
    %442 = vector.extract_strided_slice %440 {offsets = [0, 0], sizes = [2, 32], strides = [1, 1]} : vector<2x128xf32> to vector<2x32xf32>
    %443 = vector.extract_strided_slice %440 {offsets = [0, 32], sizes = [2, 32], strides = [1, 1]} : vector<2x128xf32> to vector<2x32xf32>
    %444 = vector.extract_strided_slice %441 {offsets = [0, 64], sizes = [2, 32], strides = [1, 1]} : vector<2x128xf32> to vector<2x32xf32>
    %445 = vector.extract_strided_slice %440 {offsets = [0, 96], sizes = [2, 32], strides = [1, 1]} : vector<2x128xf32> to vector<2x32xf32>
    %446 = arith.mulf %443, %428 : vector<2x32xf32>
    %447 = arith.mulf %442, %444 : vector<2x32xf32>
    %448 = arith.addf %446, %447 : vector<2x32xf32>
    %449 = math.tanh %448 : vector<2x32xf32>
    %450 = arith.mulf %445, %449 : vector<2x32xf32>
    %c8_102 = arith.constant 8 : index
    %c0_103 = arith.constant 0 : index
    %451 = vector.load %arg12[%c8_102, %c0_103] : memref<16x32xf32, #tpu.memory_space<vmem>>, vector<2x32xf32>
    tpu.vector_store %arg12[%c8_102, %c0_103], %450 {strides = array<i32>} : memref<16x32xf32, #tpu.memory_space<vmem>>, vector<2x32xf32>,
    %452 = vector.extract_strided_slice %347 {offsets = [10, 0], sizes = [2, 128], strides = [1, 1]} : vector<16x128xf32> to vector<2x128xf32>
    %453 = arith.truncf %450 : vector<2x32xf32> to vector<2x32xbf16>
    %cst_104 = arith.constant dense<0.000000e+00> : vector<2x128xf32>
    %454 = tpu.matmul %453, %349, %cst_104 {dimension_numbers = #tpu.dot_dimension_numbers<[1], [0], [0], [1], [0, 0, 1, 1], [], []>} : vector<2x32xbf16>, vector<32x128xbf16>, vector<2x128xf32> -> vector<2x128xf32>
    %455 = arith.addf %452, %454 : vector<2x128xf32>
    %456 = arith.negf %455 : vector<2x128xf32>
    %457 = math.exp %456 : vector<2x128xf32>
    %cst_105 = arith.constant 1.000000e+00 : f32
    %458 = vector.broadcast %cst_105 : f32 to vector<2x128xf32>
    %459 = arith.addf %458, %457 : vector<2x128xf32>
    %460 = arith.divf %458, %459 : vector<2x128xf32>
    %461 = math.tanh %455 : vector<2x128xf32>
    %462 = vector.extract_strided_slice %460 {offsets = [0, 0], sizes = [2, 32], strides = [1, 1]} : vector<2x128xf32> to vector<2x32xf32>
    %463 = vector.extract_strided_slice %460 {offsets = [0, 32], sizes = [2, 32], strides = [1, 1]} : vector<2x128xf32> to vector<2x32xf32>
    %464 = vector.extract_strided_slice %461 {offsets = [0, 64], sizes = [2, 32], strides = [1, 1]} : vector<2x128xf32> to vector<2x32xf32>
    %465 = vector.extract_strided_slice %460 {offsets = [0, 96], sizes = [2, 32], strides = [1, 1]} : vector<2x128xf32> to vector<2x32xf32>
    %466 = arith.mulf %463, %448 : vector<2x32xf32>
    %467 = arith.mulf %462, %464 : vector<2x32xf32>
    %468 = arith.addf %466, %467 : vector<2x32xf32>
    %469 = math.tanh %468 : vector<2x32xf32>
    %470 = arith.mulf %465, %469 : vector<2x32xf32>
    %c10_106 = arith.constant 10 : index
    %c0_107 = arith.constant 0 : index
    %471 = vector.load %arg12[%c10_106, %c0_107] : memref<16x32xf32, #tpu.memory_space<vmem>>, vector<2x32xf32>
    tpu.vector_store %arg12[%c10_106, %c0_107], %470 {strides = array<i32>} : memref<16x32xf32, #tpu.memory_space<vmem>>, vector<2x32xf32>,
    %472 = vector.extract_strided_slice %347 {offsets = [12, 0], sizes = [2, 128], strides = [1, 1]} : vector<16x128xf32> to vector<2x128xf32>
    %473 = arith.truncf %470 : vector<2x32xf32> to vector<2x32xbf16>
    %cst_108 = arith.constant dense<0.000000e+00> : vector<2x128xf32>
    %474 = tpu.matmul %473, %349, %cst_108 {dimension_numbers = #tpu.dot_dimension_numbers<[1], [0], [0], [1], [0, 0, 1, 1], [], []>} : vector<2x32xbf16>, vector<32x128xbf16>, vector<2x128xf32> -> vector<2x128xf32>
    %475 = arith.addf %472, %474 : vector<2x128xf32>
    %476 = arith.negf %475 : vector<2x128xf32>
    %477 = math.exp %476 : vector<2x128xf32>
    %cst_109 = arith.constant 1.000000e+00 : f32
    %478 = vector.broadcast %cst_109 : f32 to vector<2x128xf32>
    %479 = arith.addf %478, %477 : vector<2x128xf32>
    %480 = arith.divf %478, %479 : vector<2x128xf32>
    %481 = math.tanh %475 : vector<2x128xf32>
    %482 = vector.extract_strided_slice %480 {offsets = [0, 0], sizes = [2, 32], strides = [1, 1]} : vector<2x128xf32> to vector<2x32xf32>
    %483 = vector.extract_strided_slice %480 {offsets = [0, 32], sizes = [2, 32], strides = [1, 1]} : vector<2x128xf32> to vector<2x32xf32>
    %484 = vector.extract_strided_slice %481 {offsets = [0, 64], sizes = [2, 32], strides = [1, 1]} : vector<2x128xf32> to vector<2x32xf32>
    %485 = vector.extract_strided_slice %480 {offsets = [0, 96], sizes = [2, 32], strides = [1, 1]} : vector<2x128xf32> to vector<2x32xf32>
    %486 = arith.mulf %483, %468 : vector<2x32xf32>
    %487 = arith.mulf %482, %484 : vector<2x32xf32>
    %488 = arith.addf %486, %487 : vector<2x32xf32>
    %489 = math.tanh %488 : vector<2x32xf32>
    %490 = arith.mulf %485, %489 : vector<2x32xf32>
    %c12_110 = arith.constant 12 : index
    %c0_111 = arith.constant 0 : index
    %491 = vector.load %arg12[%c12_110, %c0_111] : memref<16x32xf32, #tpu.memory_space<vmem>>, vector<2x32xf32>
    tpu.vector_store %arg12[%c12_110, %c0_111], %490 {strides = array<i32>} : memref<16x32xf32, #tpu.memory_space<vmem>>, vector<2x32xf32>,
    %492 = vector.extract_strided_slice %347 {offsets = [14, 0], sizes = [2, 128], strides = [1, 1]} : vector<16x128xf32> to vector<2x128xf32>
    %493 = arith.truncf %490 : vector<2x32xf32> to vector<2x32xbf16>
    %cst_112 = arith.constant dense<0.000000e+00> : vector<2x128xf32>
    %494 = tpu.matmul %493, %349, %cst_112 {dimension_numbers = #tpu.dot_dimension_numbers<[1], [0], [0], [1], [0, 0, 1, 1], [], []>} : vector<2x32xbf16>, vector<32x128xbf16>, vector<2x128xf32> -> vector<2x128xf32>
    %495 = arith.addf %492, %494 : vector<2x128xf32>
    %496 = arith.negf %495 : vector<2x128xf32>
    %497 = math.exp %496 : vector<2x128xf32>
    %cst_113 = arith.constant 1.000000e+00 : f32
    %498 = vector.broadcast %cst_113 : f32 to vector<2x128xf32>
    %499 = arith.addf %498, %497 : vector<2x128xf32>
    %500 = arith.divf %498, %499 : vector<2x128xf32>
    %501 = math.tanh %495 : vector<2x128xf32>
    %502 = vector.extract_strided_slice %500 {offsets = [0, 0], sizes = [2, 32], strides = [1, 1]} : vector<2x128xf32> to vector<2x32xf32>
    %503 = vector.extract_strided_slice %500 {offsets = [0, 32], sizes = [2, 32], strides = [1, 1]} : vector<2x128xf32> to vector<2x32xf32>
    %504 = vector.extract_strided_slice %501 {offsets = [0, 64], sizes = [2, 32], strides = [1, 1]} : vector<2x128xf32> to vector<2x32xf32>
    %505 = vector.extract_strided_slice %500 {offsets = [0, 96], sizes = [2, 32], strides = [1, 1]} : vector<2x128xf32> to vector<2x32xf32>
    %506 = arith.mulf %503, %488 : vector<2x32xf32>
    %507 = arith.mulf %502, %504 : vector<2x32xf32>
    %508 = arith.addf %506, %507 : vector<2x32xf32>
    %509 = math.tanh %508 : vector<2x32xf32>
    %510 = arith.mulf %505, %509 : vector<2x32xf32>
    %c14_114 = arith.constant 14 : index
    %c0_115 = arith.constant 0 : index
    %511 = vector.load %arg12[%c14_114, %c0_115] : memref<16x32xf32, #tpu.memory_space<vmem>>, vector<2x32xf32>
    tpu.vector_store %arg12[%c14_114, %c0_115], %510 {strides = array<i32>} : memref<16x32xf32, #tpu.memory_space<vmem>>, vector<2x32xf32>,
    %c0_116 = arith.constant 0 : index
    %c0_117 = arith.constant 0 : index
    %512 = vector.load %arg7[%c0_116, %c0_117] : memref<32x128xbf16, #tpu.memory_space<vmem>>, vector<32x128xbf16>
    %cst_118 = arith.constant 0.000000e+00 : f32
    %513 = vector.broadcast %cst_118 : f32 to vector<2x32xf32>
    %cst_119 = arith.constant 0.000000e+00 : f32
    %514 = vector.broadcast %cst_119 : f32 to vector<2x32xf32>
    %515 = vector.extract_strided_slice %348 {offsets = [14, 0], sizes = [2, 128], strides = [1, 1]} : vector<16x128xf32> to vector<2x128xf32>
    %516 = arith.truncf %513 : vector<2x32xf32> to vector<2x32xbf16>
    %cst_120 = arith.constant dense<0.000000e+00> : vector<2x128xf32>
    %517 = tpu.matmul %516, %512, %cst_120 {dimension_numbers = #tpu.dot_dimension_numbers<[1], [0], [0], [1], [0, 0, 1, 1], [], []>} : vector<2x32xbf16>, vector<32x128xbf16>, vector<2x128xf32> -> vector<2x128xf32>
    %518 = arith.addf %515, %517 : vector<2x128xf32>
    %519 = arith.negf %518 : vector<2x128xf32>
    %520 = math.exp %519 : vector<2x128xf32>
    %cst_121 = arith.constant 1.000000e+00 : f32
    %521 = vector.broadcast %cst_121 : f32 to vector<2x128xf32>
    %522 = arith.addf %521, %520 : vector<2x128xf32>
    %523 = arith.divf %521, %522 : vector<2x128xf32>
    %524 = math.tanh %518 : vector<2x128xf32>
    %525 = vector.extract_strided_slice %523 {offsets = [0, 0], sizes = [2, 32], strides = [1, 1]} : vector<2x128xf32> to vector<2x32xf32>
    %526 = vector.extract_strided_slice %523 {offsets = [0, 32], sizes = [2, 32], strides = [1, 1]} : vector<2x128xf32> to vector<2x32xf32>
    %527 = vector.extract_strided_slice %524 {offsets = [0, 64], sizes = [2, 32], strides = [1, 1]} : vector<2x128xf32> to vector<2x32xf32>
    %528 = vector.extract_strided_slice %523 {offsets = [0, 96], sizes = [2, 32], strides = [1, 1]} : vector<2x128xf32> to vector<2x32xf32>
    %529 = arith.mulf %526, %514 : vector<2x32xf32>
    %530 = arith.mulf %525, %527 : vector<2x32xf32>
    %531 = arith.addf %529, %530 : vector<2x32xf32>
    %532 = math.tanh %531 : vector<2x32xf32>
    %533 = arith.mulf %528, %532 : vector<2x32xf32>
    %c14_122 = arith.constant 14 : index
    %c0_123 = arith.constant 0 : index
    %534 = vector.load %arg13[%c14_122, %c0_123] : memref<16x32xf32, #tpu.memory_space<vmem>>, vector<2x32xf32>
    tpu.vector_store %arg13[%c14_122, %c0_123], %533 {strides = array<i32>} : memref<16x32xf32, #tpu.memory_space<vmem>>, vector<2x32xf32>,
    %535 = vector.extract_strided_slice %348 {offsets = [12, 0], sizes = [2, 128], strides = [1, 1]} : vector<16x128xf32> to vector<2x128xf32>
    %536 = arith.truncf %533 : vector<2x32xf32> to vector<2x32xbf16>
    %cst_124 = arith.constant dense<0.000000e+00> : vector<2x128xf32>
    %537 = tpu.matmul %536, %512, %cst_124 {dimension_numbers = #tpu.dot_dimension_numbers<[1], [0], [0], [1], [0, 0, 1, 1], [], []>} : vector<2x32xbf16>, vector<32x128xbf16>, vector<2x128xf32> -> vector<2x128xf32>
    %538 = arith.addf %535, %537 : vector<2x128xf32>
    %539 = arith.negf %538 : vector<2x128xf32>
    %540 = math.exp %539 : vector<2x128xf32>
    %cst_125 = arith.constant 1.000000e+00 : f32
    %541 = vector.broadcast %cst_125 : f32 to vector<2x128xf32>
    %542 = arith.addf %541, %540 : vector<2x128xf32>
    %543 = arith.divf %541, %542 : vector<2x128xf32>
    %544 = math.tanh %538 : vector<2x128xf32>
    %545 = vector.extract_strided_slice %543 {offsets = [0, 0], sizes = [2, 32], strides = [1, 1]} : vector<2x128xf32> to vector<2x32xf32>
    %546 = vector.extract_strided_slice %543 {offsets = [0, 32], sizes = [2, 32], strides = [1, 1]} : vector<2x128xf32> to vector<2x32xf32>
    %547 = vector.extract_strided_slice %544 {offsets = [0, 64], sizes = [2, 32], strides = [1, 1]} : vector<2x128xf32> to vector<2x32xf32>
    %548 = vector.extract_strided_slice %543 {offsets = [0, 96], sizes = [2, 32], strides = [1, 1]} : vector<2x128xf32> to vector<2x32xf32>
    %549 = arith.mulf %546, %531 : vector<2x32xf32>
    %550 = arith.mulf %545, %547 : vector<2x32xf32>
    %551 = arith.addf %549, %550 : vector<2x32xf32>
    %552 = math.tanh %551 : vector<2x32xf32>
    %553 = arith.mulf %548, %552 : vector<2x32xf32>
    %c12_126 = arith.constant 12 : index
    %c0_127 = arith.constant 0 : index
    %554 = vector.load %arg13[%c12_126, %c0_127] : memref<16x32xf32, #tpu.memory_space<vmem>>, vector<2x32xf32>
    tpu.vector_store %arg13[%c12_126, %c0_127], %553 {strides = array<i32>} : memref<16x32xf32, #tpu.memory_space<vmem>>, vector<2x32xf32>,
    %555 = vector.extract_strided_slice %348 {offsets = [10, 0], sizes = [2, 128], strides = [1, 1]} : vector<16x128xf32> to vector<2x128xf32>
    %556 = arith.truncf %553 : vector<2x32xf32> to vector<2x32xbf16>
    %cst_128 = arith.constant dense<0.000000e+00> : vector<2x128xf32>
    %557 = tpu.matmul %556, %512, %cst_128 {dimension_numbers = #tpu.dot_dimension_numbers<[1], [0], [0], [1], [0, 0, 1, 1], [], []>} : vector<2x32xbf16>, vector<32x128xbf16>, vector<2x128xf32> -> vector<2x128xf32>
    %558 = arith.addf %555, %557 : vector<2x128xf32>
    %559 = arith.negf %558 : vector<2x128xf32>
    %560 = math.exp %559 : vector<2x128xf32>
    %cst_129 = arith.constant 1.000000e+00 : f32
    %561 = vector.broadcast %cst_129 : f32 to vector<2x128xf32>
    %562 = arith.addf %561, %560 : vector<2x128xf32>
    %563 = arith.divf %561, %562 : vector<2x128xf32>
    %564 = math.tanh %558 : vector<2x128xf32>
    %565 = vector.extract_strided_slice %563 {offsets = [0, 0], sizes = [2, 32], strides = [1, 1]} : vector<2x128xf32> to vector<2x32xf32>
    %566 = vector.extract_strided_slice %563 {offsets = [0, 32], sizes = [2, 32], strides = [1, 1]} : vector<2x128xf32> to vector<2x32xf32>
    %567 = vector.extract_strided_slice %564 {offsets = [0, 64], sizes = [2, 32], strides = [1, 1]} : vector<2x128xf32> to vector<2x32xf32>
    %568 = vector.extract_strided_slice %563 {offsets = [0, 96], sizes = [2, 32], strides = [1, 1]} : vector<2x128xf32> to vector<2x32xf32>
    %569 = arith.mulf %566, %551 : vector<2x32xf32>
    %570 = arith.mulf %565, %567 : vector<2x32xf32>
    %571 = arith.addf %569, %570 : vector<2x32xf32>
    %572 = math.tanh %571 : vector<2x32xf32>
    %573 = arith.mulf %568, %572 : vector<2x32xf32>
    %c10_130 = arith.constant 10 : index
    %c0_131 = arith.constant 0 : index
    %574 = vector.load %arg13[%c10_130, %c0_131] : memref<16x32xf32, #tpu.memory_space<vmem>>, vector<2x32xf32>
    tpu.vector_store %arg13[%c10_130, %c0_131], %573 {strides = array<i32>} : memref<16x32xf32, #tpu.memory_space<vmem>>, vector<2x32xf32>,
    %575 = vector.extract_strided_slice %348 {offsets = [8, 0], sizes = [2, 128], strides = [1, 1]} : vector<16x128xf32> to vector<2x128xf32>
    %576 = arith.truncf %573 : vector<2x32xf32> to vector<2x32xbf16>
    %cst_132 = arith.constant dense<0.000000e+00> : vector<2x128xf32>
    %577 = tpu.matmul %576, %512, %cst_132 {dimension_numbers = #tpu.dot_dimension_numbers<[1], [0], [0], [1], [0, 0, 1, 1], [], []>} : vector<2x32xbf16>, vector<32x128xbf16>, vector<2x128xf32> -> vector<2x128xf32>
    %578 = arith.addf %575, %577 : vector<2x128xf32>
    %579 = arith.negf %578 : vector<2x128xf32>
    %580 = math.exp %579 : vector<2x128xf32>
    %cst_133 = arith.constant 1.000000e+00 : f32
    %581 = vector.broadcast %cst_133 : f32 to vector<2x128xf32>
    %582 = arith.addf %581, %580 : vector<2x128xf32>
    %583 = arith.divf %581, %582 : vector<2x128xf32>
    %584 = math.tanh %578 : vector<2x128xf32>
    %585 = vector.extract_strided_slice %583 {offsets = [0, 0], sizes = [2, 32], strides = [1, 1]} : vector<2x128xf32> to vector<2x32xf32>
    %586 = vector.extract_strided_slice %583 {offsets = [0, 32], sizes = [2, 32], strides = [1, 1]} : vector<2x128xf32> to vector<2x32xf32>
    %587 = vector.extract_strided_slice %584 {offsets = [0, 64], sizes = [2, 32], strides = [1, 1]} : vector<2x128xf32> to vector<2x32xf32>
    %588 = vector.extract_strided_slice %583 {offsets = [0, 96], sizes = [2, 32], strides = [1, 1]} : vector<2x128xf32> to vector<2x32xf32>
    %589 = arith.mulf %586, %571 : vector<2x32xf32>
    %590 = arith.mulf %585, %587 : vector<2x32xf32>
    %591 = arith.addf %589, %590 : vector<2x32xf32>
    %592 = math.tanh %591 : vector<2x32xf32>
    %593 = arith.mulf %588, %592 : vector<2x32xf32>
    %c8_134 = arith.constant 8 : index
    %c0_135 = arith.constant 0 : index
    %594 = vector.load %arg13[%c8_134, %c0_135] : memref<16x32xf32, #tpu.memory_space<vmem>>, vector<2x32xf32>
    tpu.vector_store %arg13[%c8_134, %c0_135], %593 {strides = array<i32>} : memref<16x32xf32, #tpu.memory_space<vmem>>, vector<2x32xf32>,
    %595 = vector.extract_strided_slice %348 {offsets = [6, 0], sizes = [2, 128], strides = [1, 1]} : vector<16x128xf32> to vector<2x128xf32>
    %596 = arith.truncf %593 : vector<2x32xf32> to vector<2x32xbf16>
    %cst_136 = arith.constant dense<0.000000e+00> : vector<2x128xf32>
    %597 = tpu.matmul %596, %512, %cst_136 {dimension_numbers = #tpu.dot_dimension_numbers<[1], [0], [0], [1], [0, 0, 1, 1], [], []>} : vector<2x32xbf16>, vector<32x128xbf16>, vector<2x128xf32> -> vector<2x128xf32>
    %598 = arith.addf %595, %597 : vector<2x128xf32>
    %599 = arith.negf %598 : vector<2x128xf32>
    %600 = math.exp %599 : vector<2x128xf32>
    %cst_137 = arith.constant 1.000000e+00 : f32
    %601 = vector.broadcast %cst_137 : f32 to vector<2x128xf32>
    %602 = arith.addf %601, %600 : vector<2x128xf32>
    %603 = arith.divf %601, %602 : vector<2x128xf32>
    %604 = math.tanh %598 : vector<2x128xf32>
    %605 = vector.extract_strided_slice %603 {offsets = [0, 0], sizes = [2, 32], strides = [1, 1]} : vector<2x128xf32> to vector<2x32xf32>
    %606 = vector.extract_strided_slice %603 {offsets = [0, 32], sizes = [2, 32], strides = [1, 1]} : vector<2x128xf32> to vector<2x32xf32>
    %607 = vector.extract_strided_slice %604 {offsets = [0, 64], sizes = [2, 32], strides = [1, 1]} : vector<2x128xf32> to vector<2x32xf32>
    %608 = vector.extract_strided_slice %603 {offsets = [0, 96], sizes = [2, 32], strides = [1, 1]} : vector<2x128xf32> to vector<2x32xf32>
    %609 = arith.mulf %606, %591 : vector<2x32xf32>
    %610 = arith.mulf %605, %607 : vector<2x32xf32>
    %611 = arith.addf %609, %610 : vector<2x32xf32>
    %612 = math.tanh %611 : vector<2x32xf32>
    %613 = arith.mulf %608, %612 : vector<2x32xf32>
    %c6_138 = arith.constant 6 : index
    %c0_139 = arith.constant 0 : index
    %614 = vector.load %arg13[%c6_138, %c0_139] : memref<16x32xf32, #tpu.memory_space<vmem>>, vector<2x32xf32>
    tpu.vector_store %arg13[%c6_138, %c0_139], %613 {strides = array<i32>} : memref<16x32xf32, #tpu.memory_space<vmem>>, vector<2x32xf32>,
    %615 = vector.extract_strided_slice %348 {offsets = [4, 0], sizes = [2, 128], strides = [1, 1]} : vector<16x128xf32> to vector<2x128xf32>
    %616 = arith.truncf %613 : vector<2x32xf32> to vector<2x32xbf16>
    %cst_140 = arith.constant dense<0.000000e+00> : vector<2x128xf32>
    %617 = tpu.matmul %616, %512, %cst_140 {dimension_numbers = #tpu.dot_dimension_numbers<[1], [0], [0], [1], [0, 0, 1, 1], [], []>} : vector<2x32xbf16>, vector<32x128xbf16>, vector<2x128xf32> -> vector<2x128xf32>
    %618 = arith.addf %615, %617 : vector<2x128xf32>
    %619 = arith.negf %618 : vector<2x128xf32>
    %620 = math.exp %619 : vector<2x128xf32>
    %cst_141 = arith.constant 1.000000e+00 : f32
    %621 = vector.broadcast %cst_141 : f32 to vector<2x128xf32>
    %622 = arith.addf %621, %620 : vector<2x128xf32>
    %623 = arith.divf %621, %622 : vector<2x128xf32>
    %624 = math.tanh %618 : vector<2x128xf32>
    %625 = vector.extract_strided_slice %623 {offsets = [0, 0], sizes = [2, 32], strides = [1, 1]} : vector<2x128xf32> to vector<2x32xf32>
    %626 = vector.extract_strided_slice %623 {offsets = [0, 32], sizes = [2, 32], strides = [1, 1]} : vector<2x128xf32> to vector<2x32xf32>
    %627 = vector.extract_strided_slice %624 {offsets = [0, 64], sizes = [2, 32], strides = [1, 1]} : vector<2x128xf32> to vector<2x32xf32>
    %628 = vector.extract_strided_slice %623 {offsets = [0, 96], sizes = [2, 32], strides = [1, 1]} : vector<2x128xf32> to vector<2x32xf32>
    %629 = arith.mulf %626, %611 : vector<2x32xf32>
    %630 = arith.mulf %625, %627 : vector<2x32xf32>
    %631 = arith.addf %629, %630 : vector<2x32xf32>
    %632 = math.tanh %631 : vector<2x32xf32>
    %633 = arith.mulf %628, %632 : vector<2x32xf32>
    %c4_142 = arith.constant 4 : index
    %c0_143 = arith.constant 0 : index
    %634 = vector.load %arg13[%c4_142, %c0_143] : memref<16x32xf32, #tpu.memory_space<vmem>>, vector<2x32xf32>
    tpu.vector_store %arg13[%c4_142, %c0_143], %633 {strides = array<i32>} : memref<16x32xf32, #tpu.memory_space<vmem>>, vector<2x32xf32>,
    %635 = vector.extract_strided_slice %348 {offsets = [2, 0], sizes = [2, 128], strides = [1, 1]} : vector<16x128xf32> to vector<2x128xf32>
    %636 = arith.truncf %633 : vector<2x32xf32> to vector<2x32xbf16>
    %cst_144 = arith.constant dense<0.000000e+00> : vector<2x128xf32>
    %637 = tpu.matmul %636, %512, %cst_144 {dimension_numbers = #tpu.dot_dimension_numbers<[1], [0], [0], [1], [0, 0, 1, 1], [], []>} : vector<2x32xbf16>, vector<32x128xbf16>, vector<2x128xf32> -> vector<2x128xf32>
    %638 = arith.addf %635, %637 : vector<2x128xf32>
    %639 = arith.negf %638 : vector<2x128xf32>
    %640 = math.exp %639 : vector<2x128xf32>
    %cst_145 = arith.constant 1.000000e+00 : f32
    %641 = vector.broadcast %cst_145 : f32 to vector<2x128xf32>
    %642 = arith.addf %641, %640 : vector<2x128xf32>
    %643 = arith.divf %641, %642 : vector<2x128xf32>
    %644 = math.tanh %638 : vector<2x128xf32>
    %645 = vector.extract_strided_slice %643 {offsets = [0, 0], sizes = [2, 32], strides = [1, 1]} : vector<2x128xf32> to vector<2x32xf32>
    %646 = vector.extract_strided_slice %643 {offsets = [0, 32], sizes = [2, 32], strides = [1, 1]} : vector<2x128xf32> to vector<2x32xf32>
    %647 = vector.extract_strided_slice %644 {offsets = [0, 64], sizes = [2, 32], strides = [1, 1]} : vector<2x128xf32> to vector<2x32xf32>
    %648 = vector.extract_strided_slice %643 {offsets = [0, 96], sizes = [2, 32], strides = [1, 1]} : vector<2x128xf32> to vector<2x32xf32>
    %649 = arith.mulf %646, %631 : vector<2x32xf32>
    %650 = arith.mulf %645, %647 : vector<2x32xf32>
    %651 = arith.addf %649, %650 : vector<2x32xf32>
    %652 = math.tanh %651 : vector<2x32xf32>
    %653 = arith.mulf %648, %652 : vector<2x32xf32>
    %c2_146 = arith.constant 2 : index
    %c0_147 = arith.constant 0 : index
    %654 = vector.load %arg13[%c2_146, %c0_147] : memref<16x32xf32, #tpu.memory_space<vmem>>, vector<2x32xf32>
    tpu.vector_store %arg13[%c2_146, %c0_147], %653 {strides = array<i32>} : memref<16x32xf32, #tpu.memory_space<vmem>>, vector<2x32xf32>,
    %655 = vector.extract_strided_slice %348 {offsets = [0, 0], sizes = [2, 128], strides = [1, 1]} : vector<16x128xf32> to vector<2x128xf32>
    %656 = arith.truncf %653 : vector<2x32xf32> to vector<2x32xbf16>
    %cst_148 = arith.constant dense<0.000000e+00> : vector<2x128xf32>
    %657 = tpu.matmul %656, %512, %cst_148 {dimension_numbers = #tpu.dot_dimension_numbers<[1], [0], [0], [1], [0, 0, 1, 1], [], []>} : vector<2x32xbf16>, vector<32x128xbf16>, vector<2x128xf32> -> vector<2x128xf32>
    %658 = arith.addf %655, %657 : vector<2x128xf32>
    %659 = arith.negf %658 : vector<2x128xf32>
    %660 = math.exp %659 : vector<2x128xf32>
    %cst_149 = arith.constant 1.000000e+00 : f32
    %661 = vector.broadcast %cst_149 : f32 to vector<2x128xf32>
    %662 = arith.addf %661, %660 : vector<2x128xf32>
    %663 = arith.divf %661, %662 : vector<2x128xf32>
    %664 = math.tanh %658 : vector<2x128xf32>
    %665 = vector.extract_strided_slice %663 {offsets = [0, 0], sizes = [2, 32], strides = [1, 1]} : vector<2x128xf32> to vector<2x32xf32>
    %666 = vector.extract_strided_slice %663 {offsets = [0, 32], sizes = [2, 32], strides = [1, 1]} : vector<2x128xf32> to vector<2x32xf32>
    %667 = vector.extract_strided_slice %664 {offsets = [0, 64], sizes = [2, 32], strides = [1, 1]} : vector<2x128xf32> to vector<2x32xf32>
    %668 = vector.extract_strided_slice %663 {offsets = [0, 96], sizes = [2, 32], strides = [1, 1]} : vector<2x128xf32> to vector<2x32xf32>
    %669 = arith.mulf %666, %651 : vector<2x32xf32>
    %670 = arith.mulf %665, %667 : vector<2x32xf32>
    %671 = arith.addf %669, %670 : vector<2x32xf32>
    %672 = math.tanh %671 : vector<2x32xf32>
    %673 = arith.mulf %668, %672 : vector<2x32xf32>
    %c0_150 = arith.constant 0 : index
    %c0_151 = arith.constant 0 : index
    %674 = vector.load %arg13[%c0_150, %c0_151] : memref<16x32xf32, #tpu.memory_space<vmem>>, vector<2x32xf32>
    tpu.vector_store %arg13[%c0_150, %c0_151], %673 {strides = array<i32>} : memref<16x32xf32, #tpu.memory_space<vmem>>, vector<2x32xf32>,
    %c0_152 = arith.constant 0 : index
    %c0_153 = arith.constant 0 : index
    %675 = vector.load %arg9[%c0_152, %c0_153] : memref<128x2xf32, #tpu.memory_space<vmem>>, vector<128x2xf32>
    %c0_154 = arith.constant 0 : index
    %c0_155 = arith.constant 0 : index
    %676 = vector.load %arg12[%c0_154, %c0_155] : memref<16x32xf32, #tpu.memory_space<vmem>>, vector<2x32xf32>
    %677 = vector.extract_strided_slice %675 {offsets = [0, 0], sizes = [32, 2], strides = [1, 1]} : vector<128x2xf32> to vector<32x2xf32>
    %cst_156 = arith.constant dense<0.000000e+00> : vector<2x2xf32>
    %678 = tpu.matmul %676, %677, %cst_156 {dimension_numbers = #tpu.dot_dimension_numbers<[1], [0], [0], [1], [0, 0, 1, 1], [], []>} : vector<2x32xf32>, vector<32x2xf32>, vector<2x2xf32> -> vector<2x2xf32>
    %c0_157 = arith.constant 0 : index
    %c0_158 = arith.constant 0 : index
    %679 = vector.load %arg13[%c0_157, %c0_158] : memref<16x32xf32, #tpu.memory_space<vmem>>, vector<2x32xf32>
    %680 = vector.extract_strided_slice %675 {offsets = [32, 0], sizes = [32, 2], strides = [1, 1]} : vector<128x2xf32> to vector<32x2xf32>
    %cst_159 = arith.constant dense<0.000000e+00> : vector<2x2xf32>
    %681 = tpu.matmul %679, %680, %cst_159 {dimension_numbers = #tpu.dot_dimension_numbers<[1], [0], [0], [1], [0, 0, 1, 1], [], []>} : vector<2x32xf32>, vector<32x2xf32>, vector<2x2xf32> -> vector<2x2xf32>
    %682 = arith.addf %678, %681 : vector<2x2xf32>
    %c14_160 = arith.constant 14 : index
    %c0_161 = arith.constant 0 : index
    %683 = vector.load %arg12[%c14_160, %c0_161] : memref<16x32xf32, #tpu.memory_space<vmem>>, vector<2x32xf32>
    %684 = vector.extract_strided_slice %675 {offsets = [64, 0], sizes = [32, 2], strides = [1, 1]} : vector<128x2xf32> to vector<32x2xf32>
    %cst_162 = arith.constant dense<0.000000e+00> : vector<2x2xf32>
    %685 = tpu.matmul %683, %684, %cst_162 {dimension_numbers = #tpu.dot_dimension_numbers<[1], [0], [0], [1], [0, 0, 1, 1], [], []>} : vector<2x32xf32>, vector<32x2xf32>, vector<2x2xf32> -> vector<2x2xf32>
    %686 = arith.addf %682, %685 : vector<2x2xf32>
    %c14_163 = arith.constant 14 : index
    %c0_164 = arith.constant 0 : index
    %687 = vector.load %arg13[%c14_163, %c0_164] : memref<16x32xf32, #tpu.memory_space<vmem>>, vector<2x32xf32>
    %688 = vector.extract_strided_slice %675 {offsets = [96, 0], sizes = [32, 2], strides = [1, 1]} : vector<128x2xf32> to vector<32x2xf32>
    %cst_165 = arith.constant dense<0.000000e+00> : vector<2x2xf32>
    %689 = tpu.matmul %687, %688, %cst_165 {dimension_numbers = #tpu.dot_dimension_numbers<[1], [0], [0], [1], [0, 0, 1, 1], [], []>} : vector<2x32xf32>, vector<32x2xf32>, vector<2x2xf32> -> vector<2x2xf32>
    %690 = arith.addf %686, %689 : vector<2x2xf32>
    %c0_166 = arith.constant 0 : index
    %c0_167 = arith.constant 0 : index
    %691 = vector.load %arg10[%c0_166, %c0_167] : memref<1x2xf32, #tpu.memory_space<vmem>>, vector<1x2xf32>
    %692 = vector.broadcast %691 : vector<1x2xf32> to vector<2x2xf32>
    %693 = arith.addf %690, %692 : vector<2x2xf32>
    %c0_168 = arith.constant 0 : index
    %c0_169 = arith.constant 0 : index
    %694 = vector.load %arg11[%c0_168, %c0_169] : memref<2x2xf32, #tpu.memory_space<vmem>>, vector<2x2xf32>
    tpu.vector_store %arg11[%c0_168, %c0_169], %693 {strides = array<i32>} : memref<2x2xf32, #tpu.memory_space<vmem>>, vector<2x2xf32>,
    return
  }
}

</mosaic_0001>

<bundles_post_ra>
// kernel: tpu_custom_call.1
= control target key start
LH: loop header
LB: loop body
LE: loop exit
PB: predicated region body
PF: predicated region fallthrough
CT: control target
= control target key end

     0   :  { %16 = vsyncpa [#allocation5], 0  ;;  %s4003_s0 = inlined_call_operand.hbm [shape: bf16[16,32], index: 0, kind: input, shape index: {}]   ;;  %s4004_s1 = inlined_call_operand.vmem [shape: bf16[32,256], index: 1, kind: input, shape index: {}]   ;;  %s4005_s2 = inlined_call_operand.vmem [shape: bf16[32,128], index: 2, kind: input, shape index: {}]   ;;  %s4006_s3 = inlined_call_operand.vmem [shape: bf16[32,128], index: 3, kind: input, shape index: {}]   ;;  %s4007_s4 = inlined_call_operand.vmem [shape: f32[1,256], index: 4, kind: input, shape index: {}]   ;;  %s4008_s5 = inlined_call_operand.vmem [shape: bf16[64,256], index: 5, kind: input, shape index: {}]   ;;  %s4009_s6 = inlined_call_operand.hbm [shape: bf16[32,128], index: 6, kind: input, shape index: {}]   ;;  %s4010_s7 = inlined_call_operand.hbm [shape: bf16[32,128], index: 7, kind: input, shape index: {}]   ;;  %s4011_s8 = inlined_call_operand.vmem [shape: f32[1,256], index: 8, kind: input, shape index: {}]   ;;  %s4012_s9 = inlined_call_operand.vmem [shape: f32[128,2], index: 9, kind: input, shape index: {}]   ;;  %s4013_s10 = inlined_call_operand.vmem [shape: f32[1,2], index: 10, kind: input, shape index: {}]   ;;  %s4014_s11 = inlined_call_operand.hbm [shape: f32[2,2], index: 11, kind: output, shape index: {}]  }
   0x1   :  { %17 = vsyncpa [#allocation8], 0 }
   0x2   :  { %18 = vsyncpa [#allocation6], 0  ;;  %s46_s19 = sshll.u32 %s4009_s6, 4  ;;  %s3200_s20 = smov [#allocation7]   ;;  %s47_s19 = int_to_ptr.hbm [resolvable:$true] %s46_s19 }
   0x3   :  { %s48_s21 = sshll.u32 %s3200_s20, 4  ;;  %s23_s24 = sshll.u32 %s4003_s0, 4  ;;  %s49_s21 = int_to_ptr.vmem [resolvable:$true] %s48_s21  ;;  %s24_s24 = int_to_ptr.hbm [resolvable:$true] %s23_s24 }
   0x4   :  { %s3201_s25 = smov 64   ;;  %s3202_s26 = smov 4  }
   0x5   :  { %54 = dma.hbm_to_vmem [thread:$0]  %s47_s19, 256, %s49_s21, [#allocation8], %s3201_s25, %s3201_s25, %s3202_s26  }
   0x6   :  { %s3203_s27 = smov [#allocation4]   ;;  %s59_s6 = sshll.u32 %s4010_s7, 4  ;;  %s60_s6 = int_to_ptr.hbm [resolvable:$true] %s59_s6 }
   0x7   :  { %s25_s28 = sshll.u32 %s3203_s27, 4  ;;  %s3204_s12 = smov [#allocation9]   ;;  %s26_s28 = int_to_ptr.vmem [resolvable:$true] %s25_s28 }
   0x8   :  { %31 = dma.hbm_to_vmem [thread:$0]  %s24_s24, 128, %s26_s28, [#allocation5], %s3201_s25, %s3201_s25, %s3202_s26  }
   0x9   :  { %s61_s13 = sshll.u32 %s3204_s12, 4  ;;  %s62_s13 = int_to_ptr.vmem [resolvable:$true] %s61_s13 }
   0xa   :  { %67 = dma.hbm_to_vmem [thread:$0]  %s60_s6, 256, %s62_s13, [#allocation8], %s3201_s25, %s3201_s25, %s3202_s26  }
   0xb   :  { %3194 = dma.done.wait [#allocation5], 128  }
   0xc   :  { %3195 = vsyncadd [#allocation5], 4294967168 }
   0xd   :  { %3196 = dma.done.wait [#allocation8], 512  }
   0xe   :  { %3197 = vsyncadd [#allocation8], 4294966784  ;;  %v2672_v0 = vld [vmem:[%s4004_s1 + $0x10] sm:$0xf]  ;;  %v2815_v1 = vld [vmem:[%s4004_s1 + $0x14] sm:$0xf0] }
   0xf   :  { %v3292_v2 = vld [vmem:[%s4005_s2 + $0x8] sm:$0xff]  ;;  %v2673_v3 = vor.u32 %v2815_v1, %v2672_v0  ;;  %v2664_v4 = vld [vmem:[%s4004_s1] sm:$0xf]  ;;  %vm124_vm0 = vcmask 261120   ;;  %v3205_v9 = vmov 0   ;;  %s3207_s26 = smov [#allocation10]  }
  0x10   :  { %v2813_v5 = vld [vmem:[%s4004_s1 + $0x4] sm:$0xf0]  ;;  %181 = vmatpush.bf16.msra.mxu2 %v3292_v2  ;;  %v3304_v6 = vld [vmem:[%s4005_s2] sm:$0xff]  ;;  %245 = vmatpush.bf16.msra.mxu3 %v3292_v2  ;;  %s2645_s27 = sshll.u32 %s3207_s26, 4  ;;  %s2647_s30 = sshll.u32 %s4014_s11, 4  ;;  %s2646_s27 = int_to_ptr.vmem [resolvable:$true] %s2645_s27  ;;  %s2648_s30 = int_to_ptr.hbm [resolvable:$true] %s2647_s30 }
  0x11   :  { %134 = vmatpush.bf16.msra.mxu0 %v2673_v3  ;;  %v2665_v7 = vor.u32 %v2813_v5, %v2664_v4  ;;  %v3308_v8 = vld [vmem:[#allocation4] sm:$0xff] }
  0x12   :  { %v3325_v10 = vld [vmem:[%s4007_s4] sm:$0x3]  ;;  %s3206_s4 = smov 32  }
  0x13   :  { %v95_v11 = vperm.slane %v3325_v10, 0 }
  0x14   :  { %182 = vmatpush.bf16.msra.mxu2 %v3304_v6  ;;  %246 = vmatpush.bf16.msra.mxu3 %v3304_v6 }
  0x15   :  { %135 = vmatpush.bf16.msra.mxu0 %v2665_v7 }
  0x17   :  { %183 = vmatmul.bf16.vlgmr.msra.gmra.mxu2 %v3205_v9 }
  0x18   :  { %458 = vmatpush.bf16.msrb.mxu2 %v3292_v2  ;;  %524 = vmatpush.bf16.msrb.mxu3 %v3292_v2 }
  0x19   :  { %316 = vmatpush.bf16.msrb.mxu0 %v3292_v2 }
  0x1a   :  { %2678 = vmatmul.msk.bf16.vlgmr.msra.gmra.mxu0 %vm124_vm0, %v3308_v8 }
  0x1c   :  { %459 = vmatpush.bf16.msrb.mxu2 %v3304_v6  ;;  %525 = vmatpush.bf16.msrb.mxu3 %v3304_v6 }
  0x1d   :  { %317 = vmatpush.bf16.msrb.mxu0 %v3304_v6 }
  0x21   :  { %594 = vmatpush.bf16.msra.mxu0 %v3292_v2 }
  0x25   :  { %595 = vmatpush.bf16.msra.mxu0 %v3304_v6 }
  0x97   :  { %v137_v12 = vpop.f32.mrf.mxu0 }
  0x98   :  { %v3330_v13 = vadd.f32 %v137_v12, %v95_v11 }
  0x9a   :  { %v184_v14 = vpop.f32.mrf.mxu2 }
  0x9b   :  { %v188_v15 = vadd.f32 %v184_v14, %v3330_v13 }
  0x9d   :  { %2842 = vtanh.f32 %v188_v15  ;;  %v2688_v18 = vmul.f32 -1.442695, %v188_v15 }
  0x9f   :  { %2844 = vpow2.f32 %v2688_v18  ;;  %v3352_v14 = vpop.f32.mrf.mxu0 }
  0xa2   :  { %v186_v16 = vpop.f32.mrf.mxu2 }
  0xa3   :  { %v2843_v17 = vpop.eup %2842 }
  0xa4   :  { %211 = vrot.lane.b32.xlu0 %v2843_v17, %s3201_s25 }
  0xa5   :  { %v2845_v19 = vpop.eup %2844 }
  0xa6   :  { %v192_v20 = vadd.f32 1.0, %v2845_v19 }
  0xa8   :  { %2846 = vrcp.f32 %v192_v20  ;;  %v204_v26 = vand.u32 2147483648, %v192_v20  ;;  %vm198_vm2 = vweird.f32 %v192_v20  ;;  %v202_v27 = vand.u32 2147483647, %v192_v20 }
  0xaa   :  { %v205_v29 = vor.u32 1.1754944e-38, %v204_v26  ;;  %vm203_vm4 = vcmp.eq.f32.partialorder %v202_v27, 8.507059e+37 }
  0xae   :  { %v2847_v21 = vpop.eup %2846 }
  0xaf   :  { %v194_v22 = vmul.f32 %v2847_v21, %v192_v20  ;;  %vm199_vm1 = vweird.f32 %v2847_v21 }
  0xb0   :  { %vm200_vm3 = vmor %vm198_vm2, %vm199_vm1 }
  0xb1   :  { %v195_v23 = vsub.f32 1.0, %v194_v22 }
  0xb3   :  { %v196_v24 = vmul.f32 %v2847_v21, %v195_v23 }
  0xb5   :  { %v197_v25 = vadd.f32 %v2847_v21, %v196_v24 }
  0xb7   :  { %v201_v28 = vsel %vm200_vm3, %v2847_v21, %v197_v25 }
  0xb8   :  { %v206_v31 = vsel %vm203_vm4, %v205_v29, %v201_v28 }
  0xb9   :  { %v209_v33 = vmul.f32 0.0, %v206_v31 }
 0x116   :  { %v212_v30 = vpop.permute.xlu0 %211 }
 0x117   :  { %v214_v32 = vmul.f32 %v212_v30, %v206_v31 }
 0x119   :  { %216 = vrot.lane.b32.xlu0 %v214_v32, %s3206_s4 }
 0x18b   :  { %v217_v34 = vpop.permute.xlu0 %216 }
 0x18c   :  { %v219_v35 = vadd.f32 %v217_v34, %v209_v33 }
 0x18e   :  { %2848 = vtanh.f32 %v219_v35  ;;  %v277_v61 = vrot.slane %v219_v35, 6 }
 0x194   :  { %v2849_v36 = vpop.eup %2848 }
 0x195   :  { %222 = vrot.lane.b32.xlu1 %v2849_v36, %s3201_s25 }
 0x207   :  { %v223_v37 = vpop.permute.xlu1 %222 }
 0x208   :  { %v3336_v38 = vmul.f32 %v223_v37, %v206_v31 }
 0x20a   :  { %v232_v39 = vpack.c.bf16 %v3336_v38, %v3336_v38 }
 0x20c   :  { %234 = vrot.lane.b32.xlu1 %v232_v39, %s3206_s4 }
 0x27e   :  { %v235_v40 = vpop.permute.xlu1 %234 }
 0x27f   :  { %2689 = vmatmul.msk.bf16.vlgmr.msra.gmra.mxu3 %vm124_vm0, %v235_v40 }
 0x302   :  { %v248_v41 = vpop.f32.mrf.mxu3 }
 0x303   :  { %v253_v42 = vrot.slane %v248_v41, 6  ;;  %v2814_v41 = vld [vmem:[%s4004_s1 + $0x14] sm:$0xf] }
 0x305   :  { %v255_v43 = vadd.f32 %v253_v42, %v3330_v13  ;;  %v2674_v42 = vld [vmem:[%s4004_s1 + $0x18] sm:$0xf0] }
 0x307   :  { %2850 = vtanh.f32 %v255_v43  ;;  %v2690_v46 = vmul.f32 -1.442695, %v255_v43  ;;  %v2812_v43 = vld [vmem:[%s4004_s1 + $0x4] sm:$0xf] }
 0x309   :  { %2852 = vpow2.f32 %v2690_v46 }
 0x30a   :  { %v250_v44 = vpop.f32.mrf.mxu3 }
 0x30b   :  { %v2677_v44 = vor.u32 %v2814_v41, %v2674_v42 }
 0x30d   :  { %v2851_v45 = vpop.eup %2850  ;;  %148 = vmatpush.bf16.msra.mxu1 %v2677_v44 }
 0x30e   :  { %281 = vrot.lane.b32.xlu2 %v2851_v45, %s3201_s25  ;;  %v2666_v45 = vld [vmem:[%s4004_s1 + $0x8] sm:$0xf0] }
 0x30f   :  { %v2853_v47 = vpop.eup %2852  ;;  %v2669_v46 = vor.u32 %v2812_v43, %v2666_v45 }
 0x310   :  { %v259_v48 = vadd.f32 1.0, %v2853_v47 }
 0x311   :  { %149 = vmatpush.bf16.msra.mxu1 %v2669_v46 }
 0x312   :  { %2854 = vrcp.f32 %v259_v48  ;;  %v271_v54 = vand.u32 2147483648, %v259_v48  ;;  %vm265_vm6 = vweird.f32 %v259_v48  ;;  %v269_v55 = vand.u32 2147483647, %v259_v48 }
 0x314   :  { %v272_v57 = vor.u32 1.1754944e-38, %v271_v54  ;;  %vm270_vm8 = vcmp.eq.f32.partialorder %v269_v55, 8.507059e+37  ;;  %2679 = vmatmul.msk.bf16.vlgmr.msra.gmra.mxu1 %vm124_vm0, %v3308_v8  ;;  %v96_v8 = vperm.slane %v3325_v10, 1 }
 0x315   :  { %387 = vmatpush.bf16.msrb.mxu1 %v3292_v2 }
 0x318   :  { %v2855_v49 = vpop.eup %2854 }
 0x319   :  { %v261_v50 = vmul.f32 %v2855_v49, %v259_v48  ;;  %vm266_vm5 = vweird.f32 %v2855_v49  ;;  %388 = vmatpush.bf16.msrb.mxu1 %v3304_v6 }
 0x31a   :  { %vm267_vm7 = vmor %vm265_vm6, %vm266_vm5 }
 0x31b   :  { %v262_v51 = vsub.f32 1.0, %v261_v50 }
 0x31d   :  { %v263_v52 = vmul.f32 %v2855_v49, %v262_v51  ;;  %664 = vmatpush.bf16.msra.mxu1 %v3292_v2 }
 0x31f   :  { %v264_v53 = vadd.f32 %v2855_v49, %v263_v52 }
 0x321   :  { %v268_v56 = vsel %vm267_vm7, %v2855_v49, %v264_v53  ;;  %665 = vmatpush.bf16.msra.mxu1 %v3304_v6 }
 0x322   :  { %v273_v59 = vsel %vm270_vm8, %v272_v57, %v268_v56 }
 0x323   :  { %v279_v62 = vmul.f32 %v277_v61, %v273_v59 }
 0x368   :  { %v282_v58 = vpop.permute.xlu2 %281 }
 0x369   :  { %v284_v60 = vmul.f32 %v282_v58, %v273_v59 }
 0x36b   :  { %286 = vrot.lane.b32.xlu2 %v284_v60, %s3206_s4 }
 0x391   :  { %v151_v52 = vpop.f32.mrf.mxu1 }
 0x392   :  { %v3385_v2 = vadd.f32 %v151_v52, %v96_v8 }
 0x399   :  { %v3387_v6 = vpop.f32.mrf.mxu1 }
 0x3c5   :  { %v287_v63 = vpop.permute.xlu2 %286 }
 0x3c6   :  { %v289_v0 = vadd.f32 %v287_v63, %v279_v62 }
 0x3c8   :  { %2856 = vtanh.f32 %v289_v0  ;;  %v348_v35 = vrot.slane %v289_v0, 6 }
 0x3ce   :  { %v2857_v1 = vpop.eup %2856 }
 0x3cf   :  { %292 = vrot.lane.b32.xlu0 %v2857_v1, %s3201_s25 }
 0x441   :  { %v293_v3 = vpop.permute.xlu0 %292 }
 0x442   :  { %v3346_v4 = vmul.f32 %v293_v3, %v273_v59 }
 0x444   :  { %v302_v5 = vpack.c.bf16 %v3346_v4, %v3346_v4 }
 0x446   :  { %v304_v7 = vrot.slane %v302_v5, 1 }
 0x448   :  { %305 = vrot.lane.b32.xlu1 %v304_v7, %s3206_s4 }
 0x4ba   :  { %v306_v12 = vpop.permute.xlu1 %305 }
 0x4bb   :  { %2691 = vmatmul.msk.bf16.vlgmr.msrb.gmra.mxu0 %vm124_vm0, %v306_v12 }
 0x538   :  { %v319_v15 = vpop.f32.mrf.mxu0 }
 0x539   :  { %v324_v16 = vrot.slane %v319_v15, 4 }
 0x53b   :  { %v326_v17 = vadd.f32 %v324_v16, %v3330_v13 }
 0x53d   :  { %2858 = vtanh.f32 %v326_v17  ;;  %v2692_v20 = vmul.f32 -1.442695, %v326_v17 }
 0x53f   :  { %2860 = vpow2.f32 %v2692_v20 }
 0x540   :  { %v321_v18 = vpop.f32.mrf.mxu0 }
 0x543   :  { %v2859_v19 = vpop.eup %2858 }
 0x544   :  { %352 = vrot.lane.b32.xlu2 %v2859_v19, %s3201_s25 }
 0x545   :  { %v2861_v21 = vpop.eup %2860 }
 0x546   :  { %v330_v22 = vadd.f32 1.0, %v2861_v21 }
 0x548   :  { %2862 = vrcp.f32 %v330_v22  ;;  %v342_v28 = vand.u32 2147483648, %v330_v22  ;;  %vm336_vm10 = vweird.f32 %v330_v22  ;;  %v340_v29 = vand.u32 2147483647, %v330_v22 }
 0x54a   :  { %v343_v31 = vor.u32 1.1754944e-38, %v342_v28  ;;  %vm341_vm12 = vcmp.eq.f32.partialorder %v340_v29, 8.507059e+37  ;;  %v3426_v29 = vadd.f32 %v3352_v14, %v95_v11 }
 0x54e   :  { %v2863_v23 = vpop.eup %2862 }
 0x54f   :  { %v332_v24 = vmul.f32 %v2863_v23, %v330_v22  ;;  %vm337_vm9 = vweird.f32 %v2863_v23 }
 0x550   :  { %vm338_vm11 = vmor %vm336_vm10, %vm337_vm9 }
 0x551   :  { %v333_v25 = vsub.f32 1.0, %v332_v24 }
 0x553   :  { %v334_v26 = vmul.f32 %v2863_v23, %v333_v25 }
 0x555   :  { %v335_v27 = vadd.f32 %v2863_v23, %v334_v26  ;;  %v3404_v26 = vld [vmem:[%s4006_s3 + $0x8] sm:$0xff] }
 0x556   :  { %742 = vmatpush.bf16.msra.mxu2 %v3404_v26  ;;  %809 = vmatpush.bf16.msra.mxu3 %v3404_v26 }
 0x557   :  { %v339_v30 = vsel %vm338_vm11, %v2863_v23, %v335_v27  ;;  %v3410_v27 = vld [vmem:[%s4006_s3] sm:$0xff]  ;;  %879 = vmatpush.bf16.msrb.mxu0 %v3404_v26 }
 0x558   :  { %v344_v33 = vsel %vm341_vm12, %v343_v31, %v339_v30 }
 0x559   :  { %v350_v36 = vmul.f32 %v348_v35, %v344_v33  ;;  %v3433_v35 = vadd.f32 %v3387_v6, %v96_v8 }
 0x55a   :  { %743 = vmatpush.bf16.msra.mxu2 %v3410_v27  ;;  %810 = vmatpush.bf16.msra.mxu3 %v3410_v27 }
 0x55b   :  { %880 = vmatpush.bf16.msrb.mxu0 %v3410_v27 }
 0x59e   :  { %v353_v32 = vpop.permute.xlu2 %352 }
 0x59f   :  { %v355_v34 = vmul.f32 %v353_v32, %v344_v33 }
 0x5a1   :  { %357 = vrot.lane.b32.xlu0 %v355_v34, %s3206_s4 }
 0x613   :  { %v358_v37 = vpop.permute.xlu0 %357 }
 0x614   :  { %v360_v39 = vadd.f32 %v358_v37, %v350_v36 }
 0x616   :  { %2864 = vtanh.f32 %v360_v39  ;;  %v419_v17 = vrot.slane %v360_v39, 6 }
 0x61c   :  { %v2865_v40 = vpop.eup %2864 }
 0x61d   :  { %363 = vrot.lane.b32.xlu1 %v2865_v40, %s3201_s25 }
 0x68f   :  { %v364_v47 = vpop.permute.xlu1 %363 }
 0x690   :  { %v3376_v48 = vmul.f32 %v364_v47, %v344_v33 }
 0x692   :  { %v373_v49 = vpack.c.bf16 %v3376_v48, %v3376_v48 }
 0x694   :  { %v375_v50 = vrot.slane %v373_v49, 2 }
 0x696   :  { %376 = vrot.lane.b32.xlu2 %v375_v50, %s3206_s4 }
 0x6f0   :  { %v377_v51 = vpop.permute.xlu2 %376 }
 0x6f1   :  { %2693 = vmatmul.msk.bf16.vlgmr.msrb.gmra.mxu1 %vm124_vm0, %v377_v51 }
 0x6f2   :  { %949 = vmatpush.bf16.msrb.mxu1 %v3404_v26 }
 0x6f6   :  { %950 = vmatpush.bf16.msrb.mxu1 %v3410_v27 }
 0x76e   :  { %v390_v53 = vpop.f32.mrf.mxu1 }
 0x76f   :  { %v395_v54 = vrot.slane %v390_v53, 2 }
 0x771   :  { %v397_v55 = vadd.f32 %v395_v54, %v3330_v13 }
 0x773   :  { %2866 = vtanh.f32 %v397_v55  ;;  %v2694_v58 = vmul.f32 -1.442695, %v397_v55 }
 0x775   :  { %2868 = vpow2.f32 %v2694_v58 }
 0x776   :  { %v392_v56 = vpop.f32.mrf.mxu1 }
 0x779   :  { %v2867_v57 = vpop.eup %2866 }
 0x77a   :  { %423 = vrot.lane.b32.xlu0 %v2867_v57, %s3201_s25 }
 0x77b   :  { %v2869_v59 = vpop.eup %2868 }
 0x77c   :  { %v401_v60 = vadd.f32 1.0, %v2869_v59 }
 0x77e   :  { %2870 = vrcp.f32 %v401_v60  ;;  %v413_v3 = vand.u32 2147483648, %v401_v60  ;;  %vm407_vm14 = vweird.f32 %v401_v60  ;;  %v411_v5 = vand.u32 2147483647, %v401_v60 }
 0x780   :  { %v414_v7 = vor.u32 1.1754944e-38, %v413_v3  ;;  %vm412_vm1 = vcmp.eq.f32.partialorder %v411_v5, 8.507059e+37 }
 0x784   :  { %v2871_v61 = vpop.eup %2870 }
 0x785   :  { %v403_v62 = vmul.f32 %v2871_v61, %v401_v60  ;;  %vm408_vm13 = vweird.f32 %v2871_v61 }
 0x786   :  { %vm409_vm15 = vmor %vm407_vm14, %vm408_vm13 }
 0x787   :  { %v404_v63 = vsub.f32 1.0, %v403_v62 }
 0x789   :  { %v405_v0 = vmul.f32 %v2871_v61, %v404_v63 }
 0x78b   :  { %v406_v1 = vadd.f32 %v2871_v61, %v405_v0 }
 0x78d   :  { %v410_v13 = vsel %vm409_vm15, %v2871_v61, %v406_v1 }
 0x78e   :  { %v415_v15 = vsel %vm412_vm1, %v414_v7, %v410_v13 }
 0x78f   :  { %v421_v18 = vmul.f32 %v419_v17, %v415_v15 }
 0x7ec   :  { %v424_v12 = vpop.permute.xlu0 %423 }
 0x7ed   :  { %v426_v16 = vmul.f32 %v424_v12, %v415_v15 }
 0x7ef   :  { %428 = vrot.lane.b32.xlu1 %v426_v16, %s3206_s4 }
 0x861   :  { %v429_v19 = vpop.permute.xlu1 %428 }
 0x862   :  { %v3392_v20 = vadd.f32 %v429_v19, %v421_v18 }
 0x864   :  { %2872 = vtanh.f32 %v3392_v20  ;;  %v487_v12 = vrot.slane %v3392_v20, 6 }
 0x86a   :  { %v2873_v21 = vpop.eup %2872 }
 0x86b   :  { %434 = vrot.lane.b32.xlu2 %v2873_v21, %s3201_s25 }
 0x8c5   :  { %v435_v22 = vpop.permute.xlu2 %434 }
 0x8c6   :  { %v3396_v23 = vmul.f32 %v435_v22, %v415_v15 }
 0x8c8   :  { %v444_v24 = vpack.c.bf16 %v3396_v23, %v3396_v23 }
 0x8ca   :  { %v446_v25 = vrot.slane %v444_v24, 3 }
 0x8cc   :  { %447 = vrot.lane.b32.xlu0 %v446_v25, %s3206_s4 }
 0x93e   :  { %v448_v28 = vpop.permute.xlu0 %447 }
 0x93f   :  { %2695 = vmatmul.msk.bf16.vlgmr.msrb.gmra.mxu2 %vm124_vm0, %v448_v28 }
 0x940   :  { %1015 = vmatpush.bf16.msrb.mxu2 %v3404_v26 }
 0x944   :  { %1016 = vmatpush.bf16.msrb.mxu2 %v3410_v27 }
 0x94f   :  { %744 = vmatmul.bf16.vlgmr.msra.gmra.mxu2 %v3205_v9 }
 0x9c2   :  { %v461_v30 = vpop.f32.mrf.mxu2 }
 0x9c3   :  { %v465_v31 = vadd.f32 %v461_v30, %v3426_v29 }
 0x9c5   :  { %2874 = vtanh.f32 %v465_v31  ;;  %v2696_v40 = vmul.f32 -1.442695, %v465_v31 }
 0x9ca   :  { %v463_v32 = vpop.f32.mrf.mxu2 }
 0x9cb   :  { %v2875_v33 = vpop.eup %2874 }
 0x9cc   :  { %491 = vrot.lane.b32.xlu1 %v2875_v33, %s3201_s25 }
 0x9d2   :  { %v745_v34 = vpop.f32.mrf.mxu2 }
 0x9d3   :  { %v750_v36 = vrot.slane %v745_v34, 2 }
 0x9d5   :  { %v752_v37 = vadd.f32 %v750_v36, %v3433_v35 }
 0x9d7   :  { %2876 = vtanh.f32 %v752_v37  ;;  %v2711_v39 = vmul.f32 -1.442695, %v752_v37 }
 0x9d9   :  { %2878 = vpow2.f32 %v2711_v39 }
 0x9da   :  { %v747_v11 = vpop.f32.mrf.mxu2  ;;  %2880 = vpow2.f32 %v2696_v40 }
 0x9dd   :  { %v2877_v14 = vpop.eup %2876 }
 0x9de   :  { %775 = vrot.lane.b32.xlu2 %v2877_v14, %s3201_s25 }
 0x9df   :  { %v2879_v41 = vpop.eup %2878 }
 0x9e0   :  { %v756_v42 = vadd.f32 1.0, %v2879_v41  ;;  %v2881_v43 = vpop.eup %2880 }
 0x9e1   :  { %v469_v10 = vadd.f32 1.0, %v2881_v43 }
 0x9e2   :  { %2882 = vrcp.f32 %v756_v42  ;;  %v768_v52 = vand.u32 2147483648, %v756_v42  ;;  %vm762_vm3 = vweird.f32 %v756_v42  ;;  %v766_v6 = vand.u32 2147483647, %v756_v42 }
 0x9e3   :  { %2884 = vrcp.f32 %v469_v10  ;;  %v481_v59 = vand.u32 2147483648, %v469_v10  ;;  %vm475_vm7 = vweird.f32 %v469_v10  ;;  %v479_v61 = vand.u32 2147483647, %v469_v10 }
 0x9e4   :  { %v769_v55 = vor.u32 1.1754944e-38, %v768_v52  ;;  %vm767_vm5 = vcmp.eq.f32.partialorder %v766_v6, 8.507059e+37 }
 0x9e5   :  { %v482_v63 = vor.u32 1.1754944e-38, %v481_v59  ;;  %vm480_vm9 = vcmp.eq.f32.partialorder %v479_v61, 8.507059e+37 }
 0x9e8   :  { %v2883_v44 = vpop.eup %2882 }
 0x9e9   :  { %v758_v45 = vmul.f32 %v2883_v44, %v756_v42  ;;  %v2885_v46 = vpop.eup %2884  ;;  %vm763_vm2 = vweird.f32 %v2883_v44 }
 0x9ea   :  { %v471_v49 = vmul.f32 %v2885_v46, %v469_v10  ;;  %vm764_vm4 = vmor %vm762_vm3, %vm763_vm2  ;;  %vm476_vm6 = vweird.f32 %v2885_v46 }
 0x9eb   :  { %v759_v47 = vsub.f32 1.0, %v758_v45  ;;  %vm477_vm8 = vmor %vm475_vm7, %vm476_vm6 }
 0x9ec   :  { %v472_v51 = vsub.f32 1.0, %v471_v49 }
 0x9ed   :  { %v760_v50 = vmul.f32 %v2883_v44, %v759_v47 }
 0x9ee   :  { %v473_v53 = vmul.f32 %v2885_v46, %v472_v51 }
 0x9ef   :  { %v761_v8 = vadd.f32 %v2883_v44, %v760_v50 }
 0x9f0   :  { %v474_v56 = vadd.f32 %v2885_v46, %v473_v53 }
 0x9f1   :  { %v765_v54 = vsel %vm764_vm4, %v2883_v44, %v761_v8 }
 0x9f2   :  { %v770_v58 = vsel %vm767_vm5, %v769_v55, %v765_v54  ;;  %v478_v62 = vsel %vm477_vm8, %v2885_v46, %v474_v56 }
 0x9f3   :  { %v483_v1 = vsel %vm480_vm9, %v482_v63, %v478_v62  ;;  %v773_v5 = vmul.f32 0.0, %v770_v58 }
 0x9f4   :  { %v489_v15 = vmul.f32 %v487_v12, %v483_v1 }
 0xa38   :  { %v776_v57 = vpop.permute.xlu2 %775 }
 0xa39   :  { %v778_v60 = vmul.f32 %v776_v57, %v770_v58 }
 0xa3b   :  { %780 = vrot.lane.b32.xlu1 %v778_v60, %s3206_s4 }
 0xa3e   :  { %v492_v0 = vpop.permute.xlu1 %491 }
 0xa3f   :  { %v494_v3 = vmul.f32 %v492_v0, %v483_v1 }
 0xa41   :  { %496 = vrot.lane.b32.xlu0 %v494_v3, %s3206_s4 }
 0xaad   :  { %v781_v13 = vpop.permute.xlu1 %780 }
 0xaae   :  { %v3439_v7 = vadd.f32 %v781_v13, %v773_v5 }
 0xab0   :  { %2886 = vtanh.f32 %v3439_v7 }
 0xab3   :  { %v497_v16 = vpop.permute.xlu0 %496 }
 0xab4   :  { %v3443_v17 = vadd.f32 %v497_v16, %v489_v15 }
 0xab6   :  { %v2887_v18 = vpop.eup %2886  ;;  %2888 = vtanh.f32 %v3443_v17  ;;  %v556_v16 = vrot.slane %v3443_v17, 6 }
 0xab7   :  { %786 = vrot.lane.b32.xlu0 %v2887_v18, %s3201_s25 }
 0xabc   :  { %v2889_v19 = vpop.eup %2888 }
 0xabd   :  { %502 = vrot.lane.b32.xlu2 %v2889_v19, %s3201_s25 }
 0xb17   :  { %v503_v21 = vpop.permute.xlu2 %502 }
 0xb18   :  { %v3448_v22 = vmul.f32 %v503_v21, %v483_v1 }
 0xb1a   :  { %v511_v20 = vpack.c.bf16 %v3448_v22, %v3448_v22 }
 0xb1c   :  { %513 = vrot.lane.b32.xlu1 %v511_v20, %s3206_s4 }
 0xb29   :  { %v787_v24 = vpop.permute.xlu0 %786 }
 0xb2a   :  { %v3453_v25 = vmul.f32 %v787_v24, %v770_v58  ;;  %v841_v24 = vrot.slane %v3439_v7, 2 }
 0xb2c   :  { %v795_v28 = vpack.c.bf16 %v3453_v25, %v3453_v25 }
 0xb2e   :  { %v797_v30 = vrot.slane %v795_v28, 3 }
 0xb30   :  { %798 = vrot.lane.b32.xlu2 %v797_v30, %s3206_s4 }
 0xb8a   :  { %v799_v32 = vpop.permute.xlu2 %798 }
 0xb8e   :  { %v514_v31 = vpop.permute.xlu1 %513 }
 0xb8f   :  { %2697 = vmatmul.msk.bf16.vlgmr.msrb.gmra.mxu3 %vm124_vm0, %v514_v31 }
 0xb90   :  { %1085 = vmatpush.bf16.msrb.mxu3 %v3404_v26 }
 0xb94   :  { %1086 = vmatpush.bf16.msrb.mxu3 %v3410_v27 }
 0xb9f   :  { %2712 = vmatmul.msk.bf16.vlgmr.msra.gmra.mxu3 %vm124_vm0, %v799_v32 }
 0xc12   :  { %v527_v33 = vpop.f32.mrf.mxu3 }
 0xc13   :  { %v532_v34 = vrot.slane %v527_v33, 6 }
 0xc15   :  { %v534_v36 = vadd.f32 %v532_v34, %v3426_v29 }
 0xc17   :  { %2890 = vtanh.f32 %v534_v36  ;;  %v2698_v43 = vmul.f32 -1.442695, %v534_v36 }
 0xc1a   :  { %v529_v37 = vpop.f32.mrf.mxu3 }
 0xc1d   :  { %v2891_v11 = vpop.eup %2890 }
 0xc1e   :  { %560 = vrot.lane.b32.xlu0 %v2891_v11, %s3201_s25 }
 0xc22   :  { %v812_v14 = vpop.f32.mrf.mxu3 }
 0xc23   :  { %v817_v39 = vrot.slane %v812_v14, 4 }
 0xc25   :  { %v819_v40 = vadd.f32 %v817_v39, %v3433_v35 }
 0xc27   :  { %2892 = vtanh.f32 %v819_v40  ;;  %v2713_v45 = vmul.f32 -1.442695, %v819_v40 }
 0xc28   :  { %2894 = vpow2.f32 %v2698_v43 }
 0xc2a   :  { %v814_v41 = vpop.f32.mrf.mxu3 }
 0xc2d   :  { %v2893_v42 = vpop.eup %2892 }
 0xc2e   :  { %845 = vrot.lane.b32.xlu1 %v2893_v42, %s3201_s25  ;;  %v2895_v10 = vpop.eup %2894 }
 0xc2f   :  { %v538_v44 = vadd.f32 1.0, %v2895_v10 }
 0xc31   :  { %2896 = vrcp.f32 %v538_v44  ;;  %v550_v53 = vand.u32 2147483648, %v538_v44  ;;  %vm544_vm11 = vweird.f32 %v538_v44  ;;  %v548_v54 = vand.u32 2147483647, %v538_v44 }
 0xc32   :  { %2898 = vpow2.f32 %v2713_v45 }
 0xc33   :  { %v551_v57 = vor.u32 1.1754944e-38, %v550_v53  ;;  %vm549_vm13 = vcmp.eq.f32.partialorder %v548_v54, 8.507059e+37 }
 0xc37   :  { %v2897_v46 = vpop.eup %2896 }
 0xc38   :  { %v2899_v47 = vpop.eup %2898  ;;  %v540_v49 = vmul.f32 %v2897_v46, %v538_v44  ;;  %vm545_vm10 = vweird.f32 %v2897_v46 }
 0xc39   :  { %v823_v50 = vadd.f32 1.0, %v2899_v47  ;;  %vm546_vm12 = vmor %vm544_vm11, %vm545_vm10 }
 0xc3a   :  { %v541_v51 = vsub.f32 1.0, %v540_v49 }
 0xc3b   :  { %2900 = vrcp.f32 %v823_v50  ;;  %v835_v0 = vand.u32 2147483648, %v823_v50  ;;  %vm829_vm15 = vweird.f32 %v823_v50  ;;  %v833_v1 = vand.u32 2147483647, %v823_v50 }
 0xc3c   :  { %v542_v8 = vmul.f32 %v2897_v46, %v541_v51 }
 0xc3d   :  { %v836_v5 = vor.u32 1.1754944e-38, %v835_v0  ;;  %vm834_vm2 = vcmp.eq.f32.partialorder %v833_v1, 8.507059e+37 }
 0xc3e   :  { %v543_v52 = vadd.f32 %v2897_v46, %v542_v8 }
 0xc40   :  { %v547_v55 = vsel %vm546_vm12, %v2897_v46, %v543_v52 }
 0xc41   :  { %v2901_v6 = vpop.eup %2900  ;;  %v552_v58 = vsel %vm549_vm13, %v551_v57, %v547_v55 }
 0xc42   :  { %v825_v56 = vmul.f32 %v2901_v6, %v823_v50  ;;  %vm830_vm14 = vweird.f32 %v2901_v6  ;;  %v558_v18 = vmul.f32 %v556_v16, %v552_v58 }
 0xc43   :  { %vm831_vm1 = vmor %vm829_vm15, %vm830_vm14 }
 0xc44   :  { %v826_v61 = vsub.f32 1.0, %v825_v56 }
 0xc46   :  { %v827_v62 = vmul.f32 %v2901_v6, %v826_v61 }
 0xc48   :  { %v828_v63 = vadd.f32 %v2901_v6, %v827_v62 }
 0xc4a   :  { %v832_v3 = vsel %vm831_vm1, %v2901_v6, %v828_v63 }
 0xc4b   :  { %v837_v12 = vsel %vm834_vm2, %v836_v5, %v832_v3 }
 0xc4c   :  { %v843_v28 = vmul.f32 %v841_v24, %v837_v12 }
 0xc90   :  { %v561_v59 = vpop.permute.xlu0 %560 }
 0xc91   :  { %v563_v60 = vmul.f32 %v561_v59, %v552_v58 }
 0xc93   :  { %565 = vrot.lane.b32.xlu2 %v563_v60, %s3206_s4 }
 0xca0   :  { %v846_v13 = vpop.permute.xlu1 %845 }
 0xca1   :  { %v848_v15 = vmul.f32 %v846_v13, %v837_v12 }
 0xca3   :  { %850 = vrot.lane.b32.xlu0 %v848_v15, %s3206_s4 }
 0xced   :  { %v566_v19 = vpop.permute.xlu2 %565 }
 0xcee   :  { %v3469_v21 = vadd.f32 %v566_v19, %v558_v18 }
 0xcf0   :  { %2902 = vtanh.f32 %v3469_v21 }
 0xcf6   :  { %v2903_v20 = vpop.eup %2902 }
 0xcf7   :  { %571 = vrot.lane.b32.xlu1 %v2903_v20, %s3201_s25 }
 0xd15   :  { %v851_v30 = vpop.permute.xlu0 %850 }
 0xd16   :  { %v3474_v31 = vadd.f32 %v851_v30, %v843_v28 }
 0xd18   :  { %2904 = vtanh.f32 %v3474_v31 }
 0xd1e   :  { %v2905_v32 = vpop.eup %2904 }
 0xd1f   :  { %856 = vrot.lane.b32.xlu2 %v2905_v32, %s3201_s25 }
 0xd69   :  { %v572_v17 = vpop.permute.xlu1 %571 }
 0xd6a   :  { %v3478_v33 = vmul.f32 %v572_v17, %v552_v58  ;;  %v626_v17 = vrot.slane %v3469_v21, 6 }
 0xd6c   :  { %v580_v34 = vpack.c.bf16 %v3478_v33, %v3478_v33 }
 0xd6e   :  { %v582_v36 = vrot.slane %v580_v34, 1 }
 0xd70   :  { %583 = vrot.lane.b32.xlu0 %v582_v36, %s3206_s4 }
 0xd79   :  { %v857_v37 = vpop.permute.xlu2 %856 }
 0xd7a   :  { %v3483_v7 = vmul.f32 %v857_v37, %v837_v12 }
 0xd7c   :  { %v865_v11 = vpack.c.bf16 %v3483_v7, %v3483_v7 }
 0xd7e   :  { %v867_v14 = vrot.slane %v865_v11, 2 }
 0xd80   :  { %868 = vrot.lane.b32.xlu1 %v867_v14, %s3206_s4  ;;  %v911_v14 = vrot.slane %v3474_v31, 2 }
 0xde2   :  { %v584_v39 = vpop.permute.xlu0 %583 }
 0xde3   :  { %2699 = vmatmul.msk.bf16.vlgmr.msra.gmra.mxu0 %vm124_vm0, %v584_v39 }
 0xde4   :  { %1155 = vmatpush.bf16.msra.mxu0 %v3404_v26 }
 0xde8   :  { %1156 = vmatpush.bf16.msra.mxu0 %v3410_v27 }
 0xdf2   :  { %v869_v40 = vpop.permute.xlu1 %868 }
 0xdf3   :  { %2714 = vmatmul.msk.bf16.vlgmr.msrb.gmra.mxu0 %vm124_vm0, %v869_v40 }
 0xe60   :  { %v597_v41 = vpop.f32.mrf.mxu0 }
 0xe61   :  { %v602_v42 = vrot.slane %v597_v41, 4 }
 0xe63   :  { %v604_v43 = vadd.f32 %v602_v42, %v3426_v29 }
 0xe65   :  { %2906 = vtanh.f32 %v604_v43  ;;  %v2700_v51 = vmul.f32 -1.442695, %v604_v43 }
 0xe68   :  { %v599_v10 = vpop.f32.mrf.mxu0 }
 0xe6b   :  { %v2907_v44 = vpop.eup %2906 }
 0xe6c   :  { %630 = vrot.lane.b32.xlu2 %v2907_v44, %s3201_s25 }
 0xe70   :  { %v882_v45 = vpop.f32.mrf.mxu0 }
 0xe71   :  { %v887_v46 = vrot.slane %v882_v45, 6 }
 0xe73   :  { %v889_v47 = vadd.f32 %v887_v46, %v3433_v35 }
 0xe75   :  { %2908 = vtanh.f32 %v889_v47  ;;  %v2715_v58 = vmul.f32 -1.442695, %v889_v47 }
 0xe76   :  { %2910 = vpow2.f32 %v2700_v51 }
 0xe78   :  { %v884_v49 = vpop.f32.mrf.mxu0 }
 0xe7b   :  { %v2909_v50 = vpop.eup %2908 }
 0xe7c   :  { %915 = vrot.lane.b32.xlu0 %v2909_v50, %s3201_s25  ;;  %v2911_v8 = vpop.eup %2910 }
 0xe7d   :  { %v608_v52 = vadd.f32 1.0, %v2911_v8 }
 0xe7f   :  { %2912 = vrcp.f32 %v608_v52  ;;  %v620_v57 = vand.u32 2147483648, %v608_v52  ;;  %vm614_vm4 = vweird.f32 %v608_v52  ;;  %v618_v59 = vand.u32 2147483647, %v608_v52 }
 0xe80   :  { %2914 = vpow2.f32 %v2715_v58 }
 0xe81   :  { %v621_v61 = vor.u32 1.1754944e-38, %v620_v57  ;;  %vm619_vm6 = vcmp.eq.f32.partialorder %v618_v59, 8.507059e+37 }
 0xe85   :  { %v2913_v6 = vpop.eup %2912 }
 0xe86   :  { %v610_v53 = vmul.f32 %v2913_v6, %v608_v52  ;;  %vm615_vm3 = vweird.f32 %v2913_v6  ;;  %v2915_v1 = vpop.eup %2914 }
 0xe87   :  { %vm616_vm5 = vmor %vm614_vm4, %vm615_vm3  ;;  %v893_v3 = vadd.f32 1.0, %v2915_v1 }
 0xe88   :  { %v611_v54 = vsub.f32 1.0, %v610_v53 }
 0xe89   :  { %2916 = vrcp.f32 %v893_v3  ;;  %v905_v18 = vand.u32 2147483648, %v893_v3  ;;  %vm899_vm8 = vweird.f32 %v893_v3  ;;  %v903_v19 = vand.u32 2147483647, %v893_v3 }
 0xe8a   :  { %v612_v55 = vmul.f32 %v2913_v6, %v611_v54 }
 0xe8b   :  { %v906_v24 = vor.u32 1.1754944e-38, %v905_v18  ;;  %vm904_vm10 = vcmp.eq.f32.partialorder %v903_v19, 8.507059e+37 }
 0xe8c   :  { %v613_v56 = vadd.f32 %v2913_v6, %v612_v55 }
 0xe8e   :  { %v617_v60 = vsel %vm616_vm5, %v2913_v6, %v613_v56 }
 0xe8f   :  { %v622_v63 = vsel %vm619_vm6, %v621_v61, %v617_v60  ;;  %v2917_v5 = vpop.eup %2916 }
 0xe90   :  { %v895_v13 = vmul.f32 %v2917_v5, %v893_v3  ;;  %vm900_vm7 = vweird.f32 %v2917_v5  ;;  %v628_v34 = vmul.f32 %v626_v17, %v622_v63 }
 0xe91   :  { %vm901_vm9 = vmor %vm899_vm8, %vm900_vm7 }
 0xe92   :  { %v896_v12 = vsub.f32 1.0, %v895_v13 }
 0xe94   :  { %v897_v15 = vmul.f32 %v2917_v5, %v896_v12 }
 0xe96   :  { %v898_v16 = vadd.f32 %v2917_v5, %v897_v15 }
 0xe98   :  { %v902_v20 = vsel %vm901_vm9, %v2917_v5, %v898_v16 }
 0xe99   :  { %v907_v30 = vsel %vm904_vm10, %v906_v24, %v902_v20 }
 0xe9a   :  { %v913_v39 = vmul.f32 %v911_v14, %v907_v30 }
 0xec6   :  { %v631_v62 = vpop.permute.xlu2 %630 }
 0xec7   :  { %v633_v0 = vmul.f32 %v631_v62, %v622_v63 }
 0xec9   :  { %635 = vrot.lane.b32.xlu1 %v633_v0, %s3206_s4 }
 0xeee   :  { %v916_v28 = vpop.permute.xlu0 %915 }
 0xeef   :  { %v918_v32 = vmul.f32 %v916_v28, %v907_v30 }
 0xef1   :  { %920 = vrot.lane.b32.xlu2 %v918_v32, %s3206_s4 }
 0xf3b   :  { %v636_v36 = vpop.permute.xlu1 %635 }
 0xf3c   :  { %v3499_v37 = vadd.f32 %v636_v36, %v628_v34 }
 0xf3e   :  { %2918 = vtanh.f32 %v3499_v37 }
 0xf44   :  { %v2919_v11 = vpop.eup %2918 }
 0xf45   :  { %641 = vrot.lane.b32.xlu0 %v2919_v11, %s3201_s25 }
 0xf4b   :  { %v921_v40 = vpop.permute.xlu2 %920 }
 0xf4c   :  { %v923_v41 = vadd.f32 %v921_v40, %v913_v39 }
 0xf4e   :  { %2920 = vtanh.f32 %v923_v41  ;;  %v978_v5 = vrot.slane %v923_v41, 2 }
 0xf54   :  { %v2921_v42 = vpop.eup %2920 }
 0xf55   :  { %926 = vrot.lane.b32.xlu1 %v2921_v42, %s3201_s25 }
 0xfb7   :  { %v642_v43 = vpop.permute.xlu0 %641 }
 0xfb8   :  { %v3505_v21 = vmul.f32 %v642_v43, %v622_v63 }
 0xfba   :  { %v650_v10 = vpack.c.bf16 %v3505_v21, %v3505_v21 }
 0xfbc   :  { %v652_v44 = vrot.slane %v650_v10, 2 }
 0xfbe   :  { %653 = vrot.lane.b32.xlu2 %v652_v44, %s3206_s4 }
 0xfc7   :  { %v927_v45 = vpop.permute.xlu1 %926 }
 0xfc8   :  { %v3510_v46 = vmul.f32 %v927_v45, %v907_v30 }
 0xfca   :  { %v935_v31 = vpack.c.bf16 %v3510_v46, %v3510_v46 }
 0xfcc   :  { %v937_v47 = vrot.slane %v935_v31, 1 }
 0xfce   :  { %938 = vrot.lane.b32.xlu0 %v937_v47, %s3206_s4 }
0x1018   :  { %v654_v49 = vpop.permute.xlu2 %653 }
0x1019   :  { %2701 = vmatmul.msk.bf16.vlgmr.msra.gmra.mxu1 %vm124_vm0, %v654_v49 }
0x101a   :  { %1225 = vmatpush.bf16.msra.mxu1 %v3404_v26 }
0x101e   :  { %1226 = vmatpush.bf16.msra.mxu1 %v3410_v27 }
0x1040   :  { %v939_v50 = vpop.permute.xlu0 %938 }
0x1041   :  { %2716 = vmatmul.msk.bf16.vlgmr.msrb.gmra.mxu1 %vm124_vm0, %v939_v50 }
0x1096   :  { %v3519_v51 = vpop.f32.mrf.mxu1 }
0x109e   :  { %v669_v8 = vpop.f32.mrf.mxu1 }
0x10be   :  { %v952_v52 = vpop.f32.mrf.mxu1 }
0x10bf   :  { %v956_v6 = vadd.f32 %v952_v52, %v3433_v35 }
0x10c1   :  { %2922 = vtanh.f32 %v956_v6  ;;  %v2717_v55 = vmul.f32 -1.442695, %v956_v6 }
0x10c3   :  { %2924 = vpow2.f32 %v2717_v55 }
0x10c6   :  { %v954_v53 = vpop.f32.mrf.mxu1 }
0x10c7   :  { %v2923_v54 = vpop.eup %2922 }
0x10c8   :  { %982 = vrot.lane.b32.xlu1 %v2923_v54, %s3201_s25 }
0x10c9   :  { %v2925_v56 = vpop.eup %2924 }
0x10ca   :  { %v960_v26 = vadd.f32 1.0, %v2925_v56 }
0x10cc   :  { %2926 = vrcp.f32 %v960_v26  ;;  %v972_v61 = vand.u32 2147483648, %v960_v26  ;;  %vm966_vm12 = vweird.f32 %v960_v26  ;;  %v970_v62 = vand.u32 2147483647, %v960_v26 }
0x10ce   :  { %v973_v63 = vor.u32 1.1754944e-38, %v972_v61  ;;  %vm971_vm14 = vcmp.eq.f32.partialorder %v970_v62, 8.507059e+37 }
0x10d2   :  { %v2927_v27 = vpop.eup %2926 }
0x10d3   :  { %v962_v57 = vmul.f32 %v2927_v27, %v960_v26  ;;  %vm967_vm11 = vweird.f32 %v2927_v27 }
0x10d4   :  { %vm968_vm13 = vmor %vm966_vm12, %vm967_vm11 }
0x10d5   :  { %v963_v58 = vsub.f32 1.0, %v962_v57 }
0x10d7   :  { %v964_v59 = vmul.f32 %v2927_v27, %v963_v58 }
0x10d9   :  { %v965_v60 = vadd.f32 %v2927_v27, %v964_v59 }
0x10db   :  { %v969_v35 = vsel %vm968_vm13, %v2927_v27, %v965_v60 }
0x10dc   :  { %v974_v1 = vsel %vm971_vm14, %v973_v63, %v969_v35 }
0x10dd   :  { %v980_v13 = vmul.f32 %v978_v5, %v974_v1 }
0x113a   :  { %v983_v0 = vpop.permute.xlu1 %982 }
0x113b   :  { %v985_v3 = vmul.f32 %v983_v0, %v974_v1 }
0x113d   :  { %987 = vrot.lane.b32.xlu2 %v985_v3, %s3206_s4 }
0x1197   :  { %v988_v12 = vpop.permute.xlu2 %987 }
0x1198   :  { %v990_v15 = vadd.f32 %v988_v12, %v980_v13 }
0x119a   :  { %2928 = vtanh.f32 %v990_v15  ;;  %v1047_v8 = vrot.slane %v990_v15, 2 }
0x11a0   :  { %v2929_v16 = vpop.eup %2928 }
0x11a1   :  { %993 = vrot.lane.b32.xlu0 %v2929_v16, %s3201_s25 }
0x1213   :  { %v994_v18 = vpop.permute.xlu0 %993 }
0x1214   :  { %v3525_v19 = vmul.f32 %v994_v18, %v974_v1 }
0x1216   :  { %v1002_v20 = vpack.c.bf16 %v3525_v19, %v3525_v19 }
0x1218   :  { %1004 = vrot.lane.b32.xlu1 %v1002_v20, %s3206_s4 }
0x128a   :  { %v1005_v24 = vpop.permute.xlu1 %1004 }
0x128b   :  { %2718 = vmatmul.msk.bf16.vlgmr.msrb.gmra.mxu2 %vm124_vm0, %v1005_v24 }
0x130e   :  { %v1018_v28 = vpop.f32.mrf.mxu2 }
0x130f   :  { %v1023_v30 = vrot.slane %v1018_v28, 2 }
0x1311   :  { %v1025_v32 = vadd.f32 %v1023_v30, %v3385_v2 }
0x1313   :  { %2930 = vtanh.f32 %v1025_v32  ;;  %v2719_v36 = vmul.f32 -1.442695, %v1025_v32 }
0x1315   :  { %2932 = vpow2.f32 %v2719_v36 }
0x1316   :  { %v1020_v17 = vpop.f32.mrf.mxu2 }
0x1319   :  { %v2931_v34 = vpop.eup %2930 }
0x131a   :  { %1051 = vrot.lane.b32.xlu2 %v2931_v34, %s3201_s25 }
0x131b   :  { %v2933_v11 = vpop.eup %2932 }
0x131c   :  { %v1029_v14 = vadd.f32 1.0, %v2933_v11 }
0x131e   :  { %2934 = vrcp.f32 %v1029_v14  ;;  %v1041_v10 = vand.u32 2147483648, %v1029_v14  ;;  %vm1035_vm1 = vweird.f32 %v1029_v14  ;;  %v1039_v44 = vand.u32 2147483647, %v1029_v14 }
0x1320   :  { %v1042_v31 = vor.u32 1.1754944e-38, %v1041_v10  ;;  %vm1040_vm3 = vcmp.eq.f32.partialorder %v1039_v44, 8.507059e+37 }
0x1324   :  { %v2935_v39 = vpop.eup %2934 }
0x1325   :  { %v1031_v40 = vmul.f32 %v2935_v39, %v1029_v14  ;;  %vm1036_vm15 = vweird.f32 %v2935_v39 }
0x1326   :  { %vm1037_vm2 = vmor %vm1035_vm1, %vm1036_vm15 }
0x1327   :  { %v1032_v41 = vsub.f32 1.0, %v1031_v40 }
0x1329   :  { %v1033_v42 = vmul.f32 %v2935_v39, %v1032_v41 }
0x132b   :  { %v1034_v43 = vadd.f32 %v2935_v39, %v1033_v42 }
0x132d   :  { %v1038_v45 = vsel %vm1037_vm2, %v2935_v39, %v1034_v43 }
0x132e   :  { %v1043_v49 = vsel %vm1040_vm3, %v1042_v31, %v1038_v45 }
0x132f   :  { %v1049_v52 = vmul.f32 %v1047_v8, %v1043_v49 }
0x1374   :  { %v1052_v47 = vpop.permute.xlu2 %1051 }
0x1375   :  { %v1054_v50 = vmul.f32 %v1052_v47, %v1043_v49 }
0x1377   :  { %1056 = vrot.lane.b32.xlu0 %v1054_v50, %s3206_s4 }
0x13e9   :  { %v1057_v6 = vpop.permute.xlu0 %1056 }
0x13ea   :  { %v1059_v53 = vadd.f32 %v1057_v6, %v1049_v52 }
0x13ec   :  { %2936 = vtanh.f32 %v1059_v53  ;;  %v1117_v32 = vrot.slane %v1059_v53, 2 }
0x13f2   :  { %v2937_v54 = vpop.eup %2936 }
0x13f3   :  { %1062 = vrot.lane.b32.xlu1 %v2937_v54, %s3201_s25 }
0x1465   :  { %v1063_v55 = vpop.permute.xlu1 %1062 }
0x1466   :  { %v3535_v56 = vmul.f32 %v1063_v55, %v1043_v49 }
0x1468   :  { %v1071_v26 = vpack.c.bf16 %v3535_v56, %v3535_v56 }
0x146a   :  { %v1073_v27 = vrot.slane %v1071_v26, 3 }
0x146c   :  { %1074 = vrot.lane.b32.xlu2 %v1073_v27, %s3206_s4 }
0x14c6   :  { %v1075_v57 = vpop.permute.xlu2 %1074 }
0x14c7   :  { %2720 = vmatmul.msk.bf16.vlgmr.msrb.gmra.mxu3 %vm124_vm0, %v1075_v57 }
0x154a   :  { %v1088_v58 = vpop.f32.mrf.mxu3 }
0x154b   :  { %v1093_v59 = vrot.slane %v1088_v58, 4 }
0x154d   :  { %v1095_v60 = vadd.f32 %v1093_v59, %v3385_v2 }
0x154f   :  { %2938 = vtanh.f32 %v1095_v60  ;;  %v2721_v35 = vmul.f32 -1.442695, %v1095_v60 }
0x1551   :  { %2940 = vpow2.f32 %v2721_v35 }
0x1552   :  { %v1090_v61 = vpop.f32.mrf.mxu3 }
0x1555   :  { %v2939_v62 = vpop.eup %2938 }
0x1556   :  { %1121 = vrot.lane.b32.xlu0 %v2939_v62, %s3201_s25 }
0x1557   :  { %v2941_v63 = vpop.eup %2940 }
0x1558   :  { %v1099_v0 = vadd.f32 1.0, %v2941_v63 }
0x155a   :  { %2942 = vrcp.f32 %v1099_v0  ;;  %v1111_v15 = vand.u32 2147483648, %v1099_v0  ;;  %vm1105_vm5 = vweird.f32 %v1099_v0  ;;  %v1109_v16 = vand.u32 2147483647, %v1099_v0 }
0x155c   :  { %v1112_v20 = vor.u32 1.1754944e-38, %v1111_v15  ;;  %vm1110_vm7 = vcmp.eq.f32.partialorder %v1109_v16, 8.507059e+37 }
0x1560   :  { %v2943_v1 = vpop.eup %2942 }
0x1561   :  { %v1101_v3 = vmul.f32 %v2943_v1, %v1099_v0  ;;  %vm1106_vm4 = vweird.f32 %v2943_v1  ;;  %v672_v0 = vrot.slane %v3519_v51, 2 }
0x1562   :  { %vm1107_vm6 = vmor %vm1105_vm5, %vm1106_vm4  ;;  %vm442_vm5 = vcmask 261126  }
0x1563   :  { %v1102_v5 = vsub.f32 1.0, %v1101_v3 }
0x1565   :  { %v1103_v13 = vmul.f32 %v2943_v1, %v1102_v5 }
0x1567   :  { %v1104_v12 = vadd.f32 %v2943_v1, %v1103_v13 }
0x1569   :  { %v1108_v18 = vsel %vm1107_vm6, %v2943_v1, %v1104_v12  ;;  %v674_v1 = vadd.f32 %v672_v0, %v3426_v29  ;;  %vm230_vm6 = vcmask 254976  }
0x156a   :  { %v1113_v28 = vsel %vm1110_vm7, %v1112_v20, %v1108_v18  ;;  %vm300_vm7 = vcmask 257026  }
0x156b   :  { %v1119_v17 = vmul.f32 %v1117_v32, %v1113_v28  ;;  %v2702_v51 = vmul.f32 -1.442695, %v674_v1 }
0x15c8   :  { %v1122_v24 = vpop.permute.xlu0 %1121 }
0x15c9   :  { %v1124_v30 = vmul.f32 %v1122_v24, %v1113_v28 }
0x15cb   :  { %1126 = vrot.lane.b32.xlu1 %v1124_v30, %s3206_s4 }
0x163d   :  { %v1127_v34 = vpop.permute.xlu1 %1126 }
0x163e   :  { %v1129_v36 = vadd.f32 %v1127_v34, %v1119_v17 }
0x1640   :  { %2944 = vtanh.f32 %v1129_v36  ;;  %v1187_v61 = vrot.slane %v1129_v36, 2 }
0x1646   :  { %v2945_v11 = vpop.eup %2944 }
0x1647   :  { %1132 = vrot.lane.b32.xlu2 %v2945_v11, %s3201_s25 }
0x16a1   :  { %v1133_v14 = vpop.permute.xlu2 %1132 }
0x16a2   :  { %v3545_v39 = vmul.f32 %v1133_v14, %v1113_v28 }
0x16a4   :  { %v1141_v40 = vpack.c.bf16 %v3545_v39, %v3545_v39 }
0x16a6   :  { %v1143_v41 = vrot.slane %v1141_v40, 2 }
0x16a8   :  { %1144 = vrot.lane.b32.xlu0 %v1143_v41, %s3206_s4 }
0x171a   :  { %v1145_v42 = vpop.permute.xlu0 %1144 }
0x171b   :  { %2722 = vmatmul.msk.bf16.vlgmr.msra.gmra.mxu0 %vm124_vm0, %v1145_v42 }
0x1798   :  { %v1158_v43 = vpop.f32.mrf.mxu0 }
0x1799   :  { %v1163_v10 = vrot.slane %v1158_v43, 6 }
0x179b   :  { %v1165_v44 = vadd.f32 %v1163_v10, %v3385_v2 }
0x179d   :  { %2946 = vtanh.f32 %v1165_v44  ;;  %v2723_v47 = vmul.f32 -1.442695, %v1165_v44 }
0x179f   :  { %2948 = vpow2.f32 %v2723_v47 }
0x17a0   :  { %v1160_v45 = vpop.f32.mrf.mxu0 }
0x17a3   :  { %v2947_v31 = vpop.eup %2946 }
0x17a4   :  { %1191 = vrot.lane.b32.xlu1 %v2947_v31, %s3201_s25 }
0x17a5   :  { %v2949_v49 = vpop.eup %2948 }
0x17a6   :  { %v1169_v50 = vadd.f32 1.0, %v2949_v49 }
0x17a8   :  { %2950 = vrcp.f32 %v1169_v50  ;;  %v1181_v55 = vand.u32 2147483648, %v1169_v50  ;;  %vm1175_vm9 = vweird.f32 %v1169_v50  ;;  %v1179_v26 = vand.u32 2147483647, %v1169_v50 }
0x17aa   :  { %v1182_v57 = vor.u32 1.1754944e-38, %v1181_v55  ;;  %vm1180_vm11 = vcmp.eq.f32.partialorder %v1179_v26, 8.507059e+37  ;;  %v696_v26 = vrot.slane %v3499_v37, 6 }
0x17ae   :  { %v2951_v8 = vpop.eup %2950 }
0x17af   :  { %v1171_v52 = vmul.f32 %v2951_v8, %v1169_v50  ;;  %vm1176_vm8 = vweird.f32 %v2951_v8 }
0x17b0   :  { %vm1177_vm10 = vmor %vm1175_vm9, %vm1176_vm8  ;;  %vm371_vm8 = vcmask 259076  }
0x17b1   :  { %v1172_v6 = vsub.f32 1.0, %v1171_v52 }
0x17b3   :  { %v1173_v53 = vmul.f32 %v2951_v8, %v1172_v6 }
0x17b5   :  { %v1174_v54 = vadd.f32 %v2951_v8, %v1173_v53 }
0x17b7   :  { %v1178_v27 = vsel %vm1177_vm10, %v2951_v8, %v1174_v54 }
0x17b8   :  { %v1183_v59 = vsel %vm1180_vm11, %v1182_v57, %v1178_v27 }
0x17b9   :  { %v1189_v62 = vmul.f32 %v1187_v61, %v1183_v59 }
0x1816   :  { %v1192_v58 = vpop.permute.xlu1 %1191 }
0x1817   :  { %v1194_v60 = vmul.f32 %v1192_v58, %v1183_v59 }
0x1819   :  { %1196 = vrot.lane.b32.xlu2 %v1194_v60, %s3206_s4 }
0x1873   :  { %v1197_v35 = vpop.permute.xlu2 %1196 }
0x1874   :  { %v3554_v63 = vadd.f32 %v1197_v35, %v1189_v62 }
0x1876   :  { %2952 = vtanh.f32 %v3554_v63 }
0x1877   :  { %2954 = vtanh.f32 %v674_v1 }
0x1878   :  { %2956 = vpow2.f32 %v2702_v51 }
0x187c   :  { %v2953_v3 = vpop.eup %2952 }
0x187d   :  { %1202 = vrot.lane.b32.xlu0 %v2953_v3, %s3201_s25  ;;  %v2955_v5 = vpop.eup %2954 }
0x187e   :  { %v2957_v20 = vpop.eup %2956 }
0x187f   :  { %v678_v29 = vadd.f32 1.0, %v2957_v20 }
0x1881   :  { %2958 = vrcp.f32 %v678_v29  ;;  %v690_v40 = vand.u32 2147483648, %v678_v29  ;;  %vm684_vm13 = vweird.f32 %v678_v29  ;;  %v688_v41 = vand.u32 2147483647, %v678_v29 }
0x1883   :  { %v691_v43 = vor.u32 1.1754944e-38, %v690_v40  ;;  %vm689_vm15 = vcmp.eq.f32.partialorder %v688_v41, 8.507059e+37  ;;  %v2824_v40 = vld [vmem:[%s4008_s5 + $0x14] sm:$0xf0] }
0x1885   :  { %700 = vrot.lane.b32.xlu0 %v2955_v5, %s3201_s25 }
0x1887   :  { %v2959_v24 = vpop.eup %2958 }
0x1888   :  { %v680_v28 = vmul.f32 %v2959_v24, %v678_v29  ;;  %vm685_vm12 = vweird.f32 %v2959_v24 }
0x1889   :  { %vm686_vm14 = vmor %vm684_vm13, %vm685_vm12 }
0x188a   :  { %v681_v30 = vsub.f32 1.0, %v680_v28  ;;  %v2826_v28 = vld [vmem:[%s4008_s5 + $0x24] sm:$0xf0] }
0x188c   :  { %v682_v34 = vmul.f32 %v2959_v24, %v681_v30  ;;  %v2827_v30 = vld [vmem:[%s4008_s5 + $0x34] sm:$0xf] }
0x188e   :  { %v683_v36 = vadd.f32 %v2959_v24, %v682_v34 }
0x1890   :  { %v687_v42 = vsel %vm686_vm14, %v2959_v24, %v683_v36  ;;  %v2728_v24 = vld [vmem:[%s4008_s5 + $0x20] sm:$0xf] }
0x1891   :  { %v3565_v44 = vsel %vm689_vm15, %v691_v43, %v687_v42  ;;  %v2829_v42 = vld [vmem:[#allocation7] sm:$0xff]  ;;  %v2823_v43 = vld [vmem:[%s4008_s5 + $0x14] sm:$0xf] }
0x1892   :  { %v698_v27 = vmul.f32 %v696_v26, %v3565_v44  ;;  %v3677_v26 = vld [vmem:[%s4011_s8] sm:$0x3] }
0x18ef   :  { %v1203_v13 = vpop.permute.xlu0 %1202 }
0x18f0   :  { %v1205_v12 = vmul.f32 %v1203_v13, %v1183_v59 }
0x18f2   :  { %v1211_v15 = vpack.c.bf16 %v1205_v12, %v1205_v12 }
0x18f4   :  { %v1213_v16 = vrot.slane %v1211_v15, 1  ;;  %v2828_v15 = vld [vmem:[%s4008_s5 + $0x34] sm:$0xf0] }
0x18f6   :  { %1214 = vrot.lane.b32.xlu1 %v1213_v16, %s3206_s4 }
0x18f7   :  { %v701_v10 = vpop.permute.xlu0 %700 }
0x1968   :  { %v1215_v18 = vpop.permute.xlu1 %1214 }
0x1969   :  { %2724 = vmatmul.msk.bf16.vlgmr.msra.gmra.mxu1 %vm124_vm0, %v1215_v18 }
0x19e6   :  { %v1228_v32 = vpop.f32.mrf.mxu1 }
0x19e7   :  { %v1232_v17 = vadd.f32 %v1228_v32, %v3385_v2  ;;  %v703_v2 = vmul.f32 %v701_v10, %v3565_v44  ;;  %v2729_v32 = vor.u32 %v2826_v28, %v2728_v24  ;;  %v2756_v10 = vld [vmem:[%s4008_s5 + $0x18] sm:$0xf0] }
0x19e9   :  { %2960 = vtanh.f32 %v1232_v17  ;;  %v2725_v45 = vmul.f32 -1.442695, %v1232_v17  ;;  %v2730_v17 = vld [vmem:[%s4008_s5 + $0x28] sm:$0xf0] }
0x19eb   :  { %2962 = vpow2.f32 %v2725_v45  ;;  %v2822_v45 = vld [vmem:[%s4008_s5 + $0x4] sm:$0xf0] }
0x19ee   :  { %v1230_v11 = vpop.f32.mrf.mxu1 }
0x19ef   :  { %v2961_v14 = vpop.eup %2960  ;;  %v2830_v11 = vld [vmem:[#allocation7 + $0x8] sm:$0xff] }
0x19f0   :  { %1258 = vrot.lane.b32.xlu2 %v2961_v14, %s3201_s25  ;;  %v2754_v14 = vld [vmem:[%s4008_s5 + $0x10] sm:$0xf] }
0x19f1   :  { %v2963_v31 = vpop.eup %2962  ;;  %v2755_v41 = vor.u32 %v2824_v40, %v2754_v14 }
0x19f2   :  { %v1236_v47 = vadd.f32 1.0, %v2963_v31  ;;  %v2821_v31 = vld [vmem:[%s4008_s5 + $0x4] sm:$0xf] }
0x19f3   :  { %1373 = vmatpush.bf16.msrb.mxu0 %v2755_v41 }
0x19f4   :  { %2964 = vrcp.f32 %v1236_v47  ;;  %vm1242_vm2 = vweird.f32 %v1236_v47  ;;  %v1246_v6 = vand.u32 2147483647, %v1236_v47 }
0x19f6   :  { %vm1247_vm4 = vcmp.eq.f32.partialorder %v1246_v6, 8.507059e+37 }
0x19f8   :  { %705 = vrot.lane.b32.xlu2 %v703_v2, %s3206_s4  ;;  %v2746_v2 = vld [vmem:[%s4008_s5] sm:$0xf] }
0x19fa   :  { %v2965_v49 = vpop.eup %2964 }
0x19fb   :  { %v1238_v50 = vmul.f32 %v2965_v49, %v1236_v47  ;;  %vm1243_vm1 = vweird.f32 %v2965_v49 }
0x19fc   :  { %vm1244_vm3 = vmor %vm1242_vm2, %vm1243_vm1 }
0x19fd   :  { %v1239_v8 = vsub.f32 1.0, %v1238_v50 }
0x1a00   :  { %791 = vrot.lane.b32.xlu2 %v3453_v25, %s3206_s4  ;;  %v1240_v25 = vmul.f32 %v2965_v49, %v1239_v8 }
0x1a02   :  { %v1241_v52 = vadd.f32 %v2965_v49, %v1240_v25 }
0x1a04   :  { %v1245_v53 = vsel %vm1244_vm3, %v2965_v49, %v1241_v52  ;;  %v2748_v49 = vld [vmem:[%s4008_s5 + $0x8] sm:$0xf0] }
0x1a05   :  { %v2751_v50 = vor.u32 %v2821_v31, %v2748_v49 }
0x1a08   :  { %998 = vrot.lane.b32.xlu2 %v3525_v19, %s3206_s4  ;;  %v1248_v19 = vand.u32 2147483648, %v1236_v47  ;;  %v2747_v47 = vor.u32 %v2822_v45, %v2746_v2 }
0x1a0a   :  { %1374 = vmatpush.bf16.msrb.mxu0 %v2747_v47 }
0x1a0e   :  { %1559 = vmatpush.bf16.msra.mxu0 %v2830_v11 }
0x1a10   :  { %1207 = vrot.lane.b32.xlu2 %v1205_v12, %s3206_s4 }
0x1a12   :  { %1560 = vmatpush.bf16.msra.mxu0 %v2829_v42 }
0x1a18   :  { %297 = vrot.lane.b32.xlu2 %v3346_v4, %s3206_s4  ;;  %v1249_v4 = vor.u32 1.1754944e-38, %v1248_v19 }
0x1a1a   :  { %v1250_v55 = vsel %vm1247_vm4, %v1249_v4, %v1245_v53 }
0x1a20   :  { %507 = vrot.lane.b32.xlu2 %v3448_v22, %s3206_s4 }
0x1a4a   :  { %v1259_v54 = vpop.permute.xlu2 %1258 }
0x1a4b   :  { %v1261_v22 = vmul.f32 %v1259_v54, %v1250_v55 }
0x1a4d   :  { %1263 = vrot.lane.b32.xlu1 %v1261_v22, %s3206_s4 }
0x1a52   :  { %v706_v57 = vpop.permute.xlu2 %705 }
0x1a53   :  { %v708_v58 = vadd.f32 %v706_v57, %v698_v27 }
0x1a55   :  { %2966 = vtanh.f32 %v708_v58  ;;  %v1397_v58 = vperm.slane %v3677_v26, 1 }
0x1a5a   :  { %v792_v59 = vpop.permute.xlu2 %791 }
0x1a5b   :  { %v2967_v60 = vpop.eup %2966  ;;  %794 = vst.msk [vmem:[#allocation3 + $0x8] sm:$0xc0] %vm442_vm5, %v792_v59 }
0x1a5c   :  { %711 = vrot.lane.b32.xlu1 %v2967_v60, %s3201_s25 }
0x1a62   :  { %v999_v61 = vpop.permute.xlu2 %998 }
0x1a63   :  { %1001 = vst.msk [vmem:[#allocation3 + $0x8] sm:$0x3] %vm230_vm6, %v999_v61 }
0x1a64   :  { %931 = vrot.lane.b32.xlu1 %v3510_v46, %s3206_s4  ;;  %v1254_v46 = vrot.slane %v3554_v63, 2 }
0x1a66   :  { %v1256_v0 = vmul.f32 %v1254_v46, %v1250_v55 }
0x1a6a   :  { %v1208_v37 = vpop.permute.xlu2 %1207 }
0x1a6b   :  { %1210 = vst.msk [vmem:[#allocation3] sm:$0xc] %vm300_vm7, %v1208_v37 }
0x1a6c   :  { %1137 = vrot.lane.b32.xlu1 %v3545_v39, %s3206_s4 }
0x1a72   :  { %v298_v62 = vpop.permute.xlu2 %297 }
0x1a73   :  { %301 = vst.msk [vmem:[#allocation2] sm:$0xc] %vm300_vm7, %v298_v62  ;;  %v1396_v62 = vperm.slane %v3677_v26, 0 }
0x1a74   :  { %227 = vrot.lane.b32.xlu1 %v3336_v38, %s3206_s4 }
0x1a7a   :  { %v508_v35 = vpop.permute.xlu2 %507 }
0x1a7b   :  { %510 = vst.msk [vmem:[#allocation2 + $0x8] sm:$0x3] %vm230_vm6, %v508_v35 }
0x1a7c   :  { %439 = vrot.lane.b32.xlu1 %v3396_v23, %s3206_s4 }
0x1a84   :  { %646 = vrot.lane.b32.xlu1 %v3505_v21, %s3206_s4 }
0x1abf   :  { %v1264_v1 = vpop.permute.xlu1 %1263 }
0x1ac0   :  { %v1266_v39 = vadd.f32 %v1264_v1, %v1256_v0 }
0x1ac2   :  { %2968 = vtanh.f32 %v1266_v39 }
0x1ac8   :  { %v2969_v3 = vpop.eup %2968 }
0x1ac9   :  { %1269 = vrot.lane.b32.xlu0 %v2969_v3, %s3201_s25 }
0x1ace   :  { %v712_v5 = vpop.permute.xlu1 %711 }
0x1acf   :  { %v714_v38 = vmul.f32 %v712_v5, %v3565_v44  ;;  %v2759_v44 = vor.u32 %v2823_v43, %v2756_v10 }
0x1ad1   :  { %861 = vrot.lane.b32.xlu0 %v3483_v7, %s3206_s4  ;;  %716 = vrot.lane.b32.xlu2 %v714_v38, %s3206_s4 }
0x1ad2   :  { %1387 = vmatpush.bf16.msrb.mxu1 %v2759_v44 }
0x1ad6   :  { %v932_v23 = vpop.permute.xlu1 %931  ;;  %1388 = vmatpush.bf16.msrb.mxu1 %v2751_v50 }
0x1ad7   :  { %934 = vst.msk [vmem:[#allocation3 + $0x8] sm:$0xc] %vm300_vm7, %v932_v23 }
0x1ad9   :  { %1067 = vrot.lane.b32.xlu0 %v3535_v56, %s3206_s4  ;;  %v2736_v56 = vld [vmem:[%s4008_s5 + $0x30] sm:$0xf] }
0x1ada   :  { %v2737_v16 = vor.u32 %v2828_v15, %v2736_v56  ;;  %1629 = vmatpush.bf16.msra.mxu1 %v2830_v11 }
0x1adc   :  { %1322 = vmatpush.bf16.msra.mxu2 %v2737_v16 }
0x1ade   :  { %v1138_v21 = vpop.permute.xlu1 %1137  ;;  %1630 = vmatpush.bf16.msra.mxu1 %v2829_v42 }
0x1adf   :  { %1140 = vst.msk [vmem:[#allocation3] sm:$0x30] %vm371_vm8, %v1138_v21 }
0x1ae0   :  { %1323 = vmatpush.bf16.msra.mxu2 %v2729_v32 }
0x1ae4   :  { %1426 = vmatpush.bf16.msrb.mxu2 %v2830_v11 }
0x1ae6   :  { %v228_v63 = vpop.permute.xlu1 %227 }
0x1ae7   :  { %231 = vst.msk [vmem:[#allocation2] sm:$0x3] %vm230_vm6, %v228_v63 }
0x1ae8   :  { %1427 = vmatpush.bf16.msrb.mxu2 %v2829_v42 }
0x1aee   :  { %v440_v13 = vpop.permute.xlu1 %439 }
0x1aef   :  { %443 = vst.msk [vmem:[#allocation2] sm:$0xc0] %vm442_vm5, %v440_v13 }
0x1af6   :  { %v647_v12 = vpop.permute.xlu1 %646 }
0x1af7   :  { %649 = vst.msk [vmem:[#allocation2 + $0x8] sm:$0x30] %vm371_vm8, %v647_v12 }
0x1b2b   :  { %v717_v7 = vpop.permute.xlu2 %716 }
0x1b2c   :  { %719 = vst.msk [vmem:[#allocation2 + $0x8] sm:$0xc0] %vm442_vm5, %v717_v7 }
0x1b3b   :  { %v1270_v18 = vpop.permute.xlu0 %1269 }
0x1b3c   :  { %v1272_v51 = vmul.f32 %v1270_v18, %v1250_v55 }
0x1b3e   :  { %1274 = vrot.lane.b32.xlu0 %v1272_v51, %s3206_s4 }
0x1b43   :  { %v862_v20 = vpop.permute.xlu0 %861 }
0x1b44   :  { %864 = vst.msk [vmem:[#allocation3 + $0x8] sm:$0x30] %vm371_vm8, %v862_v20 }
0x1b46   :  { %368 = vrot.lane.b32.xlu0 %v3376_v48, %s3206_s4  ;;  %v2738_v48 = vld [vmem:[%s4008_s5 + $0x38] sm:$0xf0] }
0x1b47   :  { %v2741_v34 = vor.u32 %v2827_v30, %v2738_v48 }
0x1b49   :  { %1336 = vmatpush.bf16.msra.mxu3 %v2741_v34 }
0x1b4b   :  { %v1068_v29 = vpop.permute.xlu0 %1067  ;;  %v1291_v19 = vld [vmem:[#allocation3 + $0x8] sm:$0xff] }
0x1b4c   :  { %1070 = vst.msk [vmem:[#allocation3] sm:$0xc0] %vm442_vm5, %v1068_v29 }
0x1b4e   :  { %576 = vrot.lane.b32.xlu0 %v3478_v33, %s3206_s4  ;;  %v2825_v33 = vld [vmem:[%s4008_s5 + $0x24] sm:$0xf] }
0x1b4f   :  { %v2733_v36 = vor.u32 %v2825_v33, %v2730_v17 }
0x1b51   :  { %1337 = vmatpush.bf16.msra.mxu3 %v2733_v36 }
0x1b55   :  { %1489 = vmatpush.bf16.msrb.mxu3 %v2830_v11 }
0x1b59   :  { %1490 = vmatpush.bf16.msrb.mxu3 %v2829_v42 }
0x1bb0   :  { %v1275_v8 = vpop.permute.xlu0 %1274 }
0x1bb1   :  { %1277 = vst.msk [vmem:[#allocation3] sm:$0x3] %vm230_vm6, %v1275_v8 }
0x1bb8   :  { %v369_v25 = vpop.permute.xlu0 %368  ;;  %v1290_v52 = vld [vmem:[#allocation3] sm:$0xff] }
0x1bb9   :  { %372 = vst.msk [vmem:[#allocation2] sm:$0x30] %vm371_vm8, %v369_v25  ;;  %v1292_v6 = vpack.c.bf16 %v1291_v19, %v1290_v52 }
0x1bbb   :  { %2742 = vmatmul.msk.bf16.vlgmr.msra.gmra.mxu2 %vm124_vm0, %v1292_v6  ;;  %2743 = vmatmul.msk.bf16.vlgmr.msra.gmra.mxu3 %vm124_vm0, %v1292_v6 }
0x1bbc   :  { %1699 = vmatpush.bf16.msra.mxu2 %v2830_v11  ;;  %1765 = vmatpush.bf16.msra.mxu3 %v2830_v11 }
0x1bc0   :  { %v577_v53 = vpop.permute.xlu0 %576  ;;  %1700 = vmatpush.bf16.msra.mxu2 %v2829_v42  ;;  %1766 = vmatpush.bf16.msra.mxu3 %v2829_v42  ;;  %v1287_v4 = vld [vmem:[#allocation2] sm:$0xff] }
0x1bc1   :  { %579 = vst.msk [vmem:[#allocation2 + $0x8] sm:$0xc] %vm300_vm7, %v577_v53 }
0x1bc8   :  { %v1288_v54 = vld [vmem:[#allocation2 + $0x8] sm:$0xff] }
0x1bc9   :  { %v1289_v55 = vpack.c.bf16 %v1288_v54, %v1287_v4 }
0x1bcb   :  { %2760 = vmatmul.msk.bf16.vlgmr.msrb.gmra.mxu0 %vm124_vm0, %v1289_v55  ;;  %2761 = vmatmul.msk.bf16.vlgmr.msrb.gmra.mxu1 %vm124_vm0, %v1289_v55 }
0x1bcc   :  { %1428 = vmatmul.bf16.vlgmr.msrb.gmra.mxu2 %v3205_v9  ;;  %1835 = vmatpush.bf16.msrb.mxu0 %v2830_v11 }
0x1bcd   :  { %1905 = vmatpush.bf16.msrb.mxu1 %v2830_v11 }
0x1bd0   :  { %1836 = vmatpush.bf16.msrb.mxu0 %v2829_v42 }
0x1bd1   :  { %1906 = vmatpush.bf16.msrb.mxu1 %v2829_v42 }
0x1c3e   :  { %v1325_v22 = vpop.f32.mrf.mxu2  ;;  %v1339_v57 = vpop.f32.mrf.mxu3 }
0x1c46   :  { %v1327_v27 = vpop.f32.mrf.mxu2  ;;  %v3699_v40 = vpop.f32.mrf.mxu3 }
0x1c48   :  { %v1376_v59 = vpop.f32.mrf.mxu0  ;;  %v1390_v60 = vpop.f32.mrf.mxu1 }
0x1c49   :  { %v1391_v61 = vadd.f32 %v1390_v60, %v1339_v57  ;;  %v1377_v37 = vadd.f32 %v1376_v59, %v1325_v22 }
0x1c4b   :  { %v3683_v35 = vadd.f32 %v1397_v58, %v1391_v61  ;;  %v3685_v46 = vadd.f32 %v1396_v62, %v1377_v37 }
0x1c4f   :  { %v1429_v0 = vpop.f32.mrf.mxu2 }
0x1c50   :  { %v1433_v1 = vadd.f32 %v1429_v0, %v3685_v46  ;;  %v1378_v39 = vpop.f32.mrf.mxu0 }
0x1c51   :  { %v1379_v3 = vadd.f32 %v1378_v39, %v1327_v27 }
0x1c52   :  { %2970 = vtanh.f32 %v1433_v1  ;;  %v2770_v21 = vmul.f32 -1.442695, %v1433_v1 }
0x1c53   :  { %v3688_v5 = vadd.f32 %v1396_v62, %v1379_v3 }
0x1c54   :  { %2972 = vpow2.f32 %v2770_v21 }
0x1c57   :  { %v1431_v38 = vpop.f32.mrf.mxu2 }
0x1c58   :  { %v2971_v23 = vpop.eup %2970 }
0x1c59   :  { %1456 = vrot.lane.b32.xlu0 %v2971_v23, %s3201_s25 }
0x1c5a   :  { %v2973_v63 = vpop.eup %2972 }
0x1c5b   :  { %v1437_v13 = vadd.f32 1.0, %v2973_v63 }
0x1c5d   :  { %2974 = vrcp.f32 %v1437_v13  ;;  %v1449_v18 = vand.u32 2147483648, %v1437_v13  ;;  %vm1443_vm10 = vweird.f32 %v1437_v13  ;;  %v1447_v51 = vand.u32 2147483647, %v1437_v13 }
0x1c5f   :  { %v1450_v29 = vor.u32 1.1754944e-38, %v1449_v18  ;;  %vm1448_vm12 = vcmp.eq.f32.partialorder %v1447_v51, 8.507059e+37 }
0x1c63   :  { %v2975_v12 = vpop.eup %2974 }
0x1c64   :  { %v1439_v7 = vmul.f32 %v2975_v12, %v1437_v13  ;;  %vm1444_vm9 = vweird.f32 %v2975_v12 }
0x1c65   :  { %vm1445_vm11 = vmor %vm1443_vm10, %vm1444_vm9 }
0x1c66   :  { %v1440_v56 = vsub.f32 1.0, %v1439_v7 }
0x1c68   :  { %v1441_v15 = vmul.f32 %v2975_v12, %v1440_v56 }
0x1c6a   :  { %v1442_v16 = vadd.f32 %v2975_v12, %v1441_v15 }
0x1c6c   :  { %v1446_v20 = vsel %vm1445_vm11, %v2975_v12, %v1442_v16 }
0x1c6d   :  { %v1451_v28 = vsel %vm1448_vm12, %v1450_v29, %v1446_v20 }
0x1c6e   :  { %v1454_v32 = vmul.f32 0.0, %v1451_v28 }
0x1ccb   :  { %v1457_v24 = vpop.permute.xlu0 %1456 }
0x1ccc   :  { %v1459_v30 = vmul.f32 %v1457_v24, %v1451_v28 }
0x1cce   :  { %1461 = vrot.lane.b32.xlu1 %v1459_v30, %s3206_s4 }
0x1d40   :  { %v1462_v48 = vpop.permute.xlu1 %1461 }
0x1d41   :  { %v1464_v33 = vadd.f32 %v1462_v48, %v1454_v32 }
0x1d43   :  { %2976 = vtanh.f32 %v1464_v33  ;;  %v1521_v22 = vrot.slane %v1464_v33, 6 }
0x1d49   :  { %v2977_v17 = vpop.eup %2976 }
0x1d4a   :  { %1467 = vrot.lane.b32.xlu2 %v2977_v17, %s3201_s25 }
0x1da4   :  { %v1468_v34 = vpop.permute.xlu2 %1467 }
0x1da5   :  { %v3693_v36 = vmul.f32 %v1468_v34, %v1451_v28 }
0x1da7   :  { %v1476_v11 = vpack.c.bf16 %v3693_v36, %v3693_v36 }
0x1da9   :  { %1478 = vrot.lane.b32.xlu0 %v1476_v11, %s3206_s4 }
0x1e1b   :  { %v1479_v14 = vpop.permute.xlu0 %1478 }
0x1e1c   :  { %2771 = vmatmul.msk.bf16.vlgmr.msrb.gmra.mxu3 %vm124_vm0, %v1479_v14 }
0x1e9f   :  { %v1492_v41 = vpop.f32.mrf.mxu3 }
0x1ea0   :  { %v1497_v42 = vrot.slane %v1492_v41, 6 }
0x1ea2   :  { %v1499_v43 = vadd.f32 %v1497_v42, %v3685_v46 }
0x1ea4   :  { %2978 = vtanh.f32 %v1499_v43  ;;  %v2772_v2 = vmul.f32 -1.442695, %v1499_v43 }
0x1ea6   :  { %2980 = vpow2.f32 %v2772_v2 }
0x1ea7   :  { %v1494_v10 = vpop.f32.mrf.mxu3 }
0x1eaa   :  { %v2979_v44 = vpop.eup %2978 }
0x1eab   :  { %1525 = vrot.lane.b32.xlu1 %v2979_v44, %s3201_s25  ;;  %v3721_v44 = vpop.f32.mrf.mxu1 }
0x1eac   :  { %v2981_v45 = vpop.eup %2980 }
0x1ead   :  { %v1503_v31 = vadd.f32 1.0, %v2981_v45 }
0x1eaf   :  { %2982 = vrcp.f32 %v1503_v31  ;;  %v1515_v52 = vand.u32 2147483648, %v1503_v31  ;;  %vm1509_vm14 = vweird.f32 %v1503_v31  ;;  %v1513_v19 = vand.u32 2147483647, %v1503_v31 }
0x1eb1   :  { %v1516_v53 = vor.u32 1.1754944e-38, %v1515_v52  ;;  %vm1514_vm1 = vcmp.eq.f32.partialorder %v1513_v19, 8.507059e+37 }
0x1eb5   :  { %v2983_v47 = vpop.eup %2982 }
0x1eb6   :  { %v1505_v49 = vmul.f32 %v2983_v47, %v1503_v31  ;;  %vm1510_vm13 = vweird.f32 %v2983_v47 }
0x1eb7   :  { %vm1511_vm15 = vmor %vm1509_vm14, %vm1510_vm13 }
0x1eb8   :  { %v1506_v50 = vsub.f32 1.0, %v1505_v49 }
0x1eba   :  { %v1507_v8 = vmul.f32 %v2983_v47, %v1506_v50 }
0x1ebc   :  { %v1508_v25 = vadd.f32 %v2983_v47, %v1507_v8 }
0x1ebe   :  { %v1512_v6 = vsel %vm1511_vm15, %v2983_v47, %v1508_v25 }
0x1ebf   :  { %v1517_v54 = vsel %vm1514_vm1, %v1516_v53, %v1512_v6 }
0x1ec0   :  { %v1523_v27 = vmul.f32 %v1521_v22, %v1517_v54 }
0x1f1d   :  { %v1526_v4 = vpop.permute.xlu1 %1525 }
0x1f1e   :  { %v1528_v55 = vmul.f32 %v1526_v4, %v1517_v54 }
0x1f20   :  { %1530 = vrot.lane.b32.xlu2 %v1528_v55, %s3206_s4 }
0x1f7a   :  { %v1531_v57 = vpop.permute.xlu2 %1530 }
0x1f7b   :  { %v1533_v59 = vadd.f32 %v1531_v57, %v1523_v27 }
0x1f7d   :  { %2984 = vtanh.f32 %v1533_v59  ;;  %v1591_v48 = vrot.slane %v1533_v59, 6 }
0x1f83   :  { %v2985_v60 = vpop.eup %2984 }
0x1f84   :  { %1536 = vrot.lane.b32.xlu0 %v2985_v60, %s3201_s25 }
0x1ff6   :  { %v1537_v61 = vpop.permute.xlu0 %1536 }
0x1ff7   :  { %v3705_v37 = vmul.f32 %v1537_v61, %v1517_v54 }
0x1ff9   :  { %v1545_v62 = vpack.c.bf16 %v3705_v37, %v3705_v37 }
0x1ffb   :  { %v1547_v0 = vrot.slane %v1545_v62, 1 }
0x1ffd   :  { %1548 = vrot.lane.b32.xlu1 %v1547_v0, %s3206_s4 }
0x206f   :  { %v1549_v1 = vpop.permute.xlu1 %1548 }
0x2070   :  { %2773 = vmatmul.msk.bf16.vlgmr.msra.gmra.mxu0 %vm124_vm0, %v1549_v1 }
0x20ed   :  { %v1562_v39 = vpop.f32.mrf.mxu0 }
0x20ee   :  { %v1567_v3 = vrot.slane %v1562_v39, 4 }
0x20f0   :  { %v1569_v38 = vadd.f32 %v1567_v3, %v3685_v46 }
0x20f2   :  { %2986 = vtanh.f32 %v1569_v38  ;;  %v2774_v63 = vmul.f32 -1.442695, %v1569_v38 }
0x20f4   :  { %2988 = vpow2.f32 %v2774_v63  ;;  %v3738_v63 = vld [vmem:[#allocation9] sm:$0xff] }
0x20f5   :  { %v1564_v23 = vpop.f32.mrf.mxu0 }
0x20f8   :  { %v2987_v21 = vpop.eup %2986 }
0x20f9   :  { %1595 = vrot.lane.b32.xlu2 %v2987_v21, %s3201_s25  ;;  %v3735_v21 = vld [vmem:[#allocation9 + $0x8] sm:$0xff] }
0x20fa   :  { %v2989_v13 = vpop.eup %2988  ;;  %1983 = vmatpush.bf16.msrb.mxu2 %v3735_v21  ;;  %2050 = vmatpush.bf16.msrb.mxu3 %v3735_v21 }
0x20fb   :  { %v1573_v12 = vadd.f32 1.0, %v2989_v13  ;;  %2120 = vmatpush.bf16.msra.mxu0 %v3735_v21 }
0x20fd   :  { %2990 = vrcp.f32 %v1573_v12  ;;  %v1585_v51 = vand.u32 2147483648, %v1573_v12  ;;  %vm1579_vm3 = vweird.f32 %v1573_v12  ;;  %v1583_v20 = vand.u32 2147483647, %v1573_v12 }
0x20fe   :  { %1984 = vmatpush.bf16.msrb.mxu2 %v3738_v63  ;;  %2051 = vmatpush.bf16.msrb.mxu3 %v3738_v63 }
0x20ff   :  { %v1586_v24 = vor.u32 1.1754944e-38, %v1585_v51  ;;  %vm1584_vm9 = vcmp.eq.f32.partialorder %v1583_v20, 8.507059e+37  ;;  %2121 = vmatpush.bf16.msra.mxu0 %v3738_v63 }
0x2103   :  { %v2991_v7 = vpop.eup %2990 }
0x2104   :  { %v1575_v56 = vmul.f32 %v2991_v7, %v1573_v12  ;;  %vm1580_vm2 = vweird.f32 %v2991_v7 }
0x2105   :  { %vm1581_vm4 = vmor %vm1579_vm3, %vm1580_vm2 }
0x2106   :  { %v1576_v15 = vsub.f32 1.0, %v1575_v56 }
0x2108   :  { %v1577_v16 = vmul.f32 %v2991_v7, %v1576_v15 }
0x210a   :  { %v1578_v18 = vadd.f32 %v2991_v7, %v1577_v16  ;;  %v1393_v16 = vadd.f32 %v3721_v44, %v3699_v40 }
0x210c   :  { %v1582_v29 = vsel %vm1581_vm4, %v2991_v7, %v1578_v18  ;;  %v3757_v51 = vadd.f32 %v1397_v58, %v1393_v16 }
0x210d   :  { %v1587_v30 = vsel %vm1584_vm9, %v1586_v24, %v1582_v29 }
0x210e   :  { %v1593_v33 = vmul.f32 %v1591_v48, %v1587_v30 }
0x2153   :  { %v1596_v28 = vpop.permute.xlu2 %1595 }
0x2154   :  { %v1598_v32 = vmul.f32 %v1596_v28, %v1587_v30 }
0x2156   :  { %1600 = vrot.lane.b32.xlu0 %v1598_v32, %s3206_s4 }
0x21c8   :  { %v1601_v17 = vpop.permute.xlu0 %1600 }
0x21c9   :  { %v1603_v34 = vadd.f32 %v1601_v17, %v1593_v33 }
0x21cb   :  { %2992 = vtanh.f32 %v1603_v34  ;;  %v1661_v60 = vrot.slane %v1603_v34, 6 }
0x21d1   :  { %v2993_v11 = vpop.eup %2992 }
0x21d2   :  { %1606 = vrot.lane.b32.xlu1 %v2993_v11, %s3201_s25 }
0x2244   :  { %v1607_v14 = vpop.permute.xlu1 %1606 }
0x2245   :  { %v3715_v41 = vmul.f32 %v1607_v14, %v1587_v30 }
0x2247   :  { %v1615_v42 = vpack.c.bf16 %v3715_v41, %v3715_v41 }
0x2249   :  { %v1617_v43 = vrot.slane %v1615_v42, 2 }
0x224b   :  { %1618 = vrot.lane.b32.xlu2 %v1617_v43, %s3206_s4 }
0x22a5   :  { %v1619_v10 = vpop.permute.xlu2 %1618 }
0x22a6   :  { %2775 = vmatmul.msk.bf16.vlgmr.msra.gmra.mxu1 %vm124_vm0, %v1619_v10 }
0x22a7   :  { %2190 = vmatpush.bf16.msra.mxu1 %v3735_v21 }
0x22ab   :  { %2191 = vmatpush.bf16.msra.mxu1 %v3738_v63 }
0x2323   :  { %v1632_v2 = vpop.f32.mrf.mxu1 }
0x2324   :  { %v1637_v45 = vrot.slane %v1632_v2, 2 }
0x2326   :  { %v1639_v31 = vadd.f32 %v1637_v45, %v3685_v46 }
0x2328   :  { %2994 = vtanh.f32 %v1639_v31  ;;  %v2776_v50 = vmul.f32 -1.442695, %v1639_v31 }
0x232a   :  { %2996 = vpow2.f32 %v2776_v50 }
0x232b   :  { %v1634_v47 = vpop.f32.mrf.mxu1 }
0x232e   :  { %v2995_v49 = vpop.eup %2994 }
0x232f   :  { %1665 = vrot.lane.b32.xlu0 %v2995_v49, %s3201_s25 }
0x2330   :  { %v2997_v8 = vpop.eup %2996 }
0x2331   :  { %v1643_v25 = vadd.f32 1.0, %v2997_v8 }
0x2333   :  { %2998 = vrcp.f32 %v1643_v25  ;;  %v1655_v54 = vand.u32 2147483648, %v1643_v25  ;;  %vm1649_vm11 = vweird.f32 %v1643_v25  ;;  %v1653_v55 = vand.u32 2147483647, %v1643_v25 }
0x2335   :  { %v1656_v22 = vor.u32 1.1754944e-38, %v1655_v54  ;;  %vm1654_vm13 = vcmp.eq.f32.partialorder %v1653_v55, 8.507059e+37 }
0x2339   :  { %v2999_v52 = vpop.eup %2998 }
0x233a   :  { %v1645_v19 = vmul.f32 %v2999_v52, %v1643_v25  ;;  %vm1650_vm10 = vweird.f32 %v2999_v52 }
0x233b   :  { %vm1651_vm12 = vmor %vm1649_vm11, %vm1650_vm10 }
0x233c   :  { %v1646_v6 = vsub.f32 1.0, %v1645_v19 }
0x233e   :  { %v1647_v53 = vmul.f32 %v2999_v52, %v1646_v6 }
0x2340   :  { %v1648_v4 = vadd.f32 %v2999_v52, %v1647_v53 }
0x2342   :  { %v1652_v46 = vsel %vm1651_vm12, %v2999_v52, %v1648_v4 }
0x2343   :  { %v1657_v57 = vsel %vm1654_vm13, %v1656_v22, %v1652_v46 }
0x2344   :  { %v1663_v61 = vmul.f32 %v1661_v60, %v1657_v57 }
0x23a1   :  { %v1666_v27 = vpop.permute.xlu0 %1665 }
0x23a2   :  { %v1668_v59 = vmul.f32 %v1666_v27, %v1657_v57 }
0x23a4   :  { %1670 = vrot.lane.b32.xlu1 %v1668_v59, %s3206_s4 }
0x2416   :  { %v1671_v62 = vpop.permute.xlu1 %1670 }
0x2417   :  { %v3726_v0 = vadd.f32 %v1671_v62, %v1663_v61 }
0x2419   :  { %3000 = vtanh.f32 %v3726_v0  ;;  %v1728_v27 = vrot.slane %v3726_v0, 6 }
0x241f   :  { %v3001_v1 = vpop.eup %3000 }
0x2420   :  { %1676 = vrot.lane.b32.xlu2 %v3001_v1, %s3201_s25 }
0x247a   :  { %v1677_v39 = vpop.permute.xlu2 %1676 }
0x247b   :  { %v3730_v3 = vmul.f32 %v1677_v39, %v1657_v57 }
0x247d   :  { %v1685_v38 = vpack.c.bf16 %v3730_v3, %v3730_v3 }
0x247f   :  { %v1687_v23 = vrot.slane %v1685_v38, 3 }
0x2481   :  { %1688 = vrot.lane.b32.xlu0 %v1687_v23, %s3206_s4 }
0x24f3   :  { %v1689_v13 = vpop.permute.xlu0 %1688 }
0x24f4   :  { %2777 = vmatmul.msk.bf16.vlgmr.msra.gmra.mxu2 %vm124_vm0, %v1689_v13 }
0x24f5   :  { %2256 = vmatpush.bf16.msra.mxu2 %v3735_v21 }
0x24f9   :  { %2257 = vmatpush.bf16.msra.mxu2 %v3738_v63 }
0x2504   :  { %1985 = vmatmul.bf16.vlgmr.msrb.gmra.mxu2 %v3205_v9 }
0x2577   :  { %v1702_v12 = vpop.f32.mrf.mxu2 }
0x2578   :  { %v1706_v7 = vadd.f32 %v1702_v12, %v3688_v5 }
0x257a   :  { %3002 = vtanh.f32 %v1706_v7  ;;  %v2778_v30 = vmul.f32 -1.442695, %v1706_v7 }
0x257f   :  { %v1704_v56 = vpop.f32.mrf.mxu2 }
0x2580   :  { %v3003_v15 = vpop.eup %3002 }
0x2581   :  { %1732 = vrot.lane.b32.xlu1 %v3003_v15, %s3201_s25 }
0x2587   :  { %v1986_v18 = vpop.f32.mrf.mxu2 }
0x2588   :  { %v1991_v20 = vrot.slane %v1986_v18, 2 }
0x258a   :  { %v1993_v29 = vadd.f32 %v1991_v20, %v3757_v51 }
0x258c   :  { %3004 = vtanh.f32 %v1993_v29  ;;  %v2793_v28 = vmul.f32 -1.442695, %v1993_v29 }
0x258e   :  { %3006 = vpow2.f32 %v2793_v28 }
0x258f   :  { %v1988_v9 = vpop.f32.mrf.mxu2  ;;  %3008 = vpow2.f32 %v2778_v30 }
0x2592   :  { %v3005_v24 = vpop.eup %3004 }
0x2593   :  { %2016 = vrot.lane.b32.xlu2 %v3005_v24, %s3201_s25 }
0x2594   :  { %v3007_v32 = vpop.eup %3006 }
0x2595   :  { %v1997_v48 = vadd.f32 1.0, %v3007_v32  ;;  %v3009_v40 = vpop.eup %3008 }
0x2596   :  { %v1710_v33 = vadd.f32 1.0, %v3009_v40 }
0x2597   :  { %3010 = vrcp.f32 %v1997_v48  ;;  %v2009_v10 = vand.u32 2147483648, %v1997_v48  ;;  %vm2003_vm15 = vweird.f32 %v1997_v48  ;;  %v2007_v44 = vand.u32 2147483647, %v1997_v48 }
0x2598   :  { %3012 = vrcp.f32 %v1710_v33  ;;  %v1722_v8 = vand.u32 2147483648, %v1710_v33  ;;  %vm1716_vm4 = vweird.f32 %v1710_v33  ;;  %v1720_v52 = vand.u32 2147483647, %v1710_v33 }
0x2599   :  { %v2010_v31 = vor.u32 1.1754944e-38, %v2009_v10  ;;  %vm2008_vm2 = vcmp.eq.f32.partialorder %v2007_v44, 8.507059e+37 }
0x259a   :  { %v1723_v6 = vor.u32 1.1754944e-38, %v1722_v8  ;;  %vm1721_vm10 = vcmp.eq.f32.partialorder %v1720_v52, 8.507059e+37 }
0x259d   :  { %v3011_v26 = vpop.eup %3010 }
0x259e   :  { %v1999_v58 = vmul.f32 %v3011_v26, %v1997_v48  ;;  %v3013_v17 = vpop.eup %3012  ;;  %vm2004_vm14 = vweird.f32 %v3011_v26 }
0x259f   :  { %v1712_v11 = vmul.f32 %v3013_v17, %v1710_v33  ;;  %vm2005_vm1 = vmor %vm2003_vm15, %vm2004_vm14  ;;  %vm1717_vm3 = vweird.f32 %v3013_v17 }
0x25a0   :  { %v2000_v34 = vsub.f32 1.0, %v1999_v58  ;;  %vm1718_vm9 = vmor %vm1716_vm4, %vm1717_vm3 }
0x25a1   :  { %v1713_v42 = vsub.f32 1.0, %v1712_v11 }
0x25a2   :  { %v2001_v14 = vmul.f32 %v3011_v26, %v2000_v34 }
0x25a3   :  { %v1714_v2 = vmul.f32 %v3013_v17, %v1713_v42 }
0x25a4   :  { %v2002_v43 = vadd.f32 %v3011_v26, %v2001_v14 }
0x25a5   :  { %v1715_v47 = vadd.f32 %v3013_v17, %v1714_v2 }
0x25a6   :  { %v2006_v45 = vsel %vm2005_vm1, %v3011_v26, %v2002_v43 }
0x25a7   :  { %v2011_v50 = vsel %vm2008_vm2, %v2010_v31, %v2006_v45  ;;  %v1719_v19 = vsel %vm1718_vm9, %v3013_v17, %v1715_v47 }
0x25a8   :  { %v1724_v4 = vsel %vm1721_vm10, %v1723_v6, %v1719_v19  ;;  %v2014_v55 = vmul.f32 0.0, %v2011_v50 }
0x25a9   :  { %v1730_v57 = vmul.f32 %v1728_v27, %v1724_v4 }
0x25ed   :  { %v2017_v49 = vpop.permute.xlu2 %2016 }
0x25ee   :  { %v2019_v25 = vmul.f32 %v2017_v49, %v2011_v50 }
0x25f0   :  { %2021 = vrot.lane.b32.xlu1 %v2019_v25, %s3206_s4 }
0x25f3   :  { %v1733_v53 = vpop.permute.xlu1 %1732 }
0x25f4   :  { %v1735_v54 = vmul.f32 %v1733_v53, %v1724_v4 }
0x25f6   :  { %1737 = vrot.lane.b32.xlu0 %v1735_v54, %s3206_s4 }
0x2662   :  { %v2022_v46 = vpop.permute.xlu1 %2021 }
0x2663   :  { %v3763_v22 = vadd.f32 %v2022_v46, %v2014_v55 }
0x2665   :  { %3014 = vtanh.f32 %v3763_v22 }
0x2668   :  { %v1738_v59 = vpop.permute.xlu0 %1737 }
0x2669   :  { %v3767_v60 = vadd.f32 %v1738_v59, %v1730_v57 }
0x266b   :  { %v3015_v61 = vpop.eup %3014  ;;  %3016 = vtanh.f32 %v3767_v60  ;;  %v1797_v57 = vrot.slane %v3767_v60, 6 }
0x266c   :  { %2027 = vrot.lane.b32.xlu0 %v3015_v61, %s3201_s25 }
0x2671   :  { %v3017_v62 = vpop.eup %3016 }
0x2672   :  { %1743 = vrot.lane.b32.xlu2 %v3017_v62, %s3201_s25 }
0x26cc   :  { %v1744_v1 = vpop.permute.xlu2 %1743 }
0x26cd   :  { %v3772_v39 = vmul.f32 %v1744_v1, %v1724_v4 }
0x26cf   :  { %v1752_v0 = vpack.c.bf16 %v3772_v39, %v3772_v39 }
0x26d1   :  { %1754 = vrot.lane.b32.xlu1 %v1752_v0, %s3206_s4  ;;  %v2082_v0 = vrot.slane %v3763_v22, 2 }
0x26de   :  { %v2028_v38 = vpop.permute.xlu0 %2027 }
0x26df   :  { %v3777_v23 = vmul.f32 %v2028_v38, %v2011_v50 }
0x26e1   :  { %v2036_v13 = vpack.c.bf16 %v3777_v23, %v3777_v23 }
0x26e3   :  { %v2038_v12 = vrot.slane %v2036_v13, 3 }
0x26e5   :  { %2039 = vrot.lane.b32.xlu2 %v2038_v12, %s3206_s4 }
0x273f   :  { %v2040_v56 = vpop.permute.xlu2 %2039 }
0x2743   :  { %v1755_v7 = vpop.permute.xlu1 %1754 }
0x2744   :  { %2779 = vmatmul.msk.bf16.vlgmr.msra.gmra.mxu3 %vm124_vm0, %v1755_v7 }
0x2745   :  { %2326 = vmatpush.bf16.msra.mxu3 %v3735_v21 }
0x2749   :  { %2327 = vmatpush.bf16.msra.mxu3 %v3738_v63 }
0x2754   :  { %2794 = vmatmul.msk.bf16.vlgmr.msrb.gmra.mxu3 %vm124_vm0, %v2040_v56 }
0x27c7   :  { %v1768_v15 = vpop.f32.mrf.mxu3 }
0x27c8   :  { %v1773_v16 = vrot.slane %v1768_v15, 6 }
0x27ca   :  { %v1775_v18 = vadd.f32 %v1773_v16, %v3688_v5 }
0x27cc   :  { %3018 = vtanh.f32 %v1775_v18  ;;  %v2780_v48 = vmul.f32 -1.442695, %v1775_v18 }
0x27cf   :  { %v1770_v20 = vpop.f32.mrf.mxu3 }
0x27d2   :  { %v3019_v29 = vpop.eup %3018 }
0x27d3   :  { %1801 = vrot.lane.b32.xlu0 %v3019_v29, %s3201_s25 }
0x27d7   :  { %v2053_v9 = vpop.f32.mrf.mxu3 }
0x27d8   :  { %v2058_v24 = vrot.slane %v2053_v9, 4 }
0x27da   :  { %v2060_v28 = vadd.f32 %v2058_v24, %v3757_v51 }
0x27dc   :  { %3020 = vtanh.f32 %v2060_v28  ;;  %v2795_v26 = vmul.f32 -1.442695, %v2060_v28 }
0x27dd   :  { %3022 = vpow2.f32 %v2780_v48 }
0x27df   :  { %v2055_v30 = vpop.f32.mrf.mxu3 }
0x27e2   :  { %v3021_v32 = vpop.eup %3020 }
0x27e3   :  { %2086 = vrot.lane.b32.xlu1 %v3021_v32, %s3201_s25  ;;  %v3023_v40 = vpop.eup %3022 }
0x27e4   :  { %v1779_v33 = vadd.f32 1.0, %v3023_v40 }
0x27e6   :  { %3024 = vrcp.f32 %v1779_v33  ;;  %v1791_v44 = vand.u32 2147483648, %v1779_v33  ;;  %vm1785_vm12 = vweird.f32 %v1779_v33  ;;  %v1789_v2 = vand.u32 2147483647, %v1779_v33 }
0x27e7   :  { %3026 = vpow2.f32 %v2795_v26 }
0x27e8   :  { %v1792_v47 = vor.u32 1.1754944e-38, %v1791_v44  ;;  %vm1790_vm14 = vcmp.eq.f32.partialorder %v1789_v2, 8.507059e+37 }
0x27ec   :  { %v3025_v58 = vpop.eup %3024 }
0x27ed   :  { %v3027_v17 = vpop.eup %3026  ;;  %v1781_v34 = vmul.f32 %v3025_v58, %v1779_v33  ;;  %vm1786_vm11 = vweird.f32 %v3025_v58 }
0x27ee   :  { %v2064_v11 = vadd.f32 1.0, %v3027_v17  ;;  %vm1787_vm13 = vmor %vm1785_vm12, %vm1786_vm11 }
0x27ef   :  { %v1782_v14 = vsub.f32 1.0, %v1781_v34 }
0x27f0   :  { %3028 = vrcp.f32 %v2064_v11  ;;  %v2076_v6 = vand.u32 2147483648, %v2064_v11  ;;  %vm2070_vm1 = vweird.f32 %v2064_v11  ;;  %v2074_v53 = vand.u32 2147483647, %v2064_v11 }
0x27f1   :  { %v1783_v42 = vmul.f32 %v3025_v58, %v1782_v14 }
0x27f2   :  { %v2077_v54 = vor.u32 1.1754944e-38, %v2076_v6  ;;  %vm2075_vm3 = vcmp.eq.f32.partialorder %v2074_v53, 8.507059e+37 }
0x27f3   :  { %v1784_v43 = vadd.f32 %v3025_v58, %v1783_v42 }
0x27f5   :  { %v1788_v45 = vsel %vm1787_vm13, %v3025_v58, %v1784_v43 }
0x27f6   :  { %v3029_v10 = vpop.eup %3028  ;;  %v1793_v49 = vsel %vm1790_vm14, %v1792_v47, %v1788_v45 }
0x27f7   :  { %v2066_v31 = vmul.f32 %v3029_v10, %v2064_v11  ;;  %vm2071_vm15 = vweird.f32 %v3029_v10  ;;  %v1799_v59 = vmul.f32 %v1797_v57, %v1793_v49 }
0x27f8   :  { %vm2072_vm2 = vmor %vm2070_vm1, %vm2071_vm15 }
0x27f9   :  { %v2067_v25 = vsub.f32 1.0, %v2066_v31 }
0x27fb   :  { %v2068_v52 = vmul.f32 %v3029_v10, %v2067_v25 }
0x27fd   :  { %v2069_v19 = vadd.f32 %v3029_v10, %v2068_v52 }
0x27ff   :  { %v2073_v4 = vsel %vm2072_vm2, %v3029_v10, %v2069_v19 }
0x2800   :  { %v2078_v46 = vsel %vm2075_vm3, %v2077_v54, %v2073_v4 }
0x2801   :  { %v2084_v38 = vmul.f32 %v2082_v0, %v2078_v46 }
0x2845   :  { %v1802_v50 = vpop.permute.xlu0 %1801 }
0x2846   :  { %v1804_v8 = vmul.f32 %v1802_v50, %v1793_v49 }
0x2848   :  { %1806 = vrot.lane.b32.xlu2 %v1804_v8, %s3206_s4 }
0x2855   :  { %v2087_v55 = vpop.permute.xlu1 %2086 }
0x2856   :  { %v2089_v27 = vmul.f32 %v2087_v55, %v2078_v46 }
0x2858   :  { %2091 = vrot.lane.b32.xlu0 %v2089_v27, %s3206_s4 }
0x28a2   :  { %v1807_v61 = vpop.permute.xlu2 %1806 }
0x28a3   :  { %v3793_v62 = vadd.f32 %v1807_v61, %v1799_v59 }
0x28a5   :  { %3030 = vtanh.f32 %v3793_v62 }
0x28ab   :  { %v3031_v1 = vpop.eup %3030 }
0x28ac   :  { %1812 = vrot.lane.b32.xlu1 %v3031_v1, %s3201_s25 }
0x28ca   :  { %v2092_v13 = vpop.permute.xlu0 %2091 }
0x28cb   :  { %v3798_v12 = vadd.f32 %v2092_v13, %v2084_v38 }
0x28cd   :  { %3032 = vtanh.f32 %v3798_v12 }
0x28d3   :  { %v3033_v7 = vpop.eup %3032 }
0x28d4   :  { %2097 = vrot.lane.b32.xlu2 %v3033_v7, %s3201_s25  ;;  %v1867_v7 = vrot.slane %v3793_v62, 6 }
0x291e   :  { %v1813_v60 = vpop.permute.xlu1 %1812 }
0x291f   :  { %v3802_v56 = vmul.f32 %v1813_v60, %v1793_v49 }
0x2921   :  { %v1821_v15 = vpack.c.bf16 %v3802_v56, %v3802_v56 }
0x2923   :  { %v1823_v16 = vrot.slane %v1821_v15, 1 }
0x2925   :  { %1824 = vrot.lane.b32.xlu0 %v1823_v16, %s3206_s4 }
0x292e   :  { %v2098_v18 = vpop.permute.xlu2 %2097 }
0x292f   :  { %v3807_v22 = vmul.f32 %v2098_v18, %v2078_v46 }
0x2931   :  { %v2106_v20 = vpack.c.bf16 %v3807_v22, %v3807_v22 }
0x2933   :  { %v2108_v29 = vrot.slane %v2106_v20, 2  ;;  %v2152_v20 = vrot.slane %v3798_v12, 2 }
0x2935   :  { %2109 = vrot.lane.b32.xlu1 %v2108_v29, %s3206_s4 }
0x2997   :  { %v1825_v9 = vpop.permute.xlu0 %1824 }
0x2998   :  { %2781 = vmatmul.msk.bf16.vlgmr.msrb.gmra.mxu0 %vm124_vm0, %v1825_v9 }
0x2999   :  { %2396 = vmatpush.bf16.msrb.mxu0 %v3735_v21 }
0x299d   :  { %2397 = vmatpush.bf16.msrb.mxu0 %v3738_v63 }
0x29a7   :  { %v2110_v24 = vpop.permute.xlu1 %2109 }
0x29a8   :  { %2796 = vmatmul.msk.bf16.vlgmr.msra.gmra.mxu0 %vm124_vm0, %v2110_v24 }
0x2a15   :  { %v1838_v28 = vpop.f32.mrf.mxu0 }
0x2a16   :  { %v1843_v30 = vrot.slane %v1838_v28, 4 }
0x2a18   :  { %v1845_v32 = vadd.f32 %v1843_v30, %v3688_v5 }
0x2a1a   :  { %3034 = vtanh.f32 %v1845_v32  ;;  %v2782_v11 = vmul.f32 -1.442695, %v1845_v32 }
0x2a1d   :  { %v1840_v48 = vpop.f32.mrf.mxu0 }
0x2a20   :  { %v3035_v40 = vpop.eup %3034 }
0x2a21   :  { %1871 = vrot.lane.b32.xlu2 %v3035_v40, %s3201_s25 }
0x2a25   :  { %v2123_v33 = vpop.f32.mrf.mxu0 }
0x2a26   :  { %v2128_v26 = vrot.slane %v2123_v33, 6 }
0x2a28   :  { %v2130_v58 = vadd.f32 %v2128_v26, %v3757_v51 }
0x2a2a   :  { %3036 = vtanh.f32 %v2130_v58  ;;  %v2797_v47 = vmul.f32 -1.442695, %v2130_v58 }
0x2a2b   :  { %3038 = vpow2.f32 %v2782_v11 }
0x2a2d   :  { %v2125_v17 = vpop.f32.mrf.mxu0 }
0x2a30   :  { %v3037_v34 = vpop.eup %3036 }
0x2a31   :  { %2156 = vrot.lane.b32.xlu0 %v3037_v34, %s3201_s25  ;;  %v3039_v14 = vpop.eup %3038 }
0x2a32   :  { %v1849_v42 = vadd.f32 1.0, %v3039_v14 }
0x2a34   :  { %3040 = vrcp.f32 %v1849_v42  ;;  %v1861_v31 = vand.u32 2147483648, %v1849_v42  ;;  %vm1855_vm9 = vweird.f32 %v1849_v42  ;;  %v1859_v49 = vand.u32 2147483647, %v1849_v42 }
0x2a35   :  { %3042 = vpow2.f32 %v2797_v47 }
0x2a36   :  { %v1862_v8 = vor.u32 1.1754944e-38, %v1861_v31  ;;  %vm1860_vm11 = vcmp.eq.f32.partialorder %v1859_v49, 8.507059e+37 }
0x2a3a   :  { %v3041_v43 = vpop.eup %3040 }
0x2a3b   :  { %v1851_v10 = vmul.f32 %v3041_v43, %v1849_v42  ;;  %vm1856_vm4 = vweird.f32 %v3041_v43  ;;  %v3043_v6 = vpop.eup %3042 }
0x2a3c   :  { %vm1857_vm10 = vmor %vm1855_vm9, %vm1856_vm4  ;;  %v2134_v53 = vadd.f32 1.0, %v3043_v6 }
0x2a3d   :  { %v1852_v44 = vsub.f32 1.0, %v1851_v10 }
0x2a3e   :  { %3044 = vrcp.f32 %v2134_v53  ;;  %v2146_v57 = vand.u32 2147483648, %v2134_v53  ;;  %vm2140_vm13 = vweird.f32 %v2134_v53  ;;  %v2144_v59 = vand.u32 2147483647, %v2134_v53 }
0x2a3f   :  { %v1853_v2 = vmul.f32 %v3041_v43, %v1852_v44 }
0x2a40   :  { %v2147_v1 = vor.u32 1.1754944e-38, %v2146_v57  ;;  %vm2145_vm15 = vcmp.eq.f32.partialorder %v2144_v59, 8.507059e+37 }
0x2a41   :  { %v1854_v45 = vadd.f32 %v3041_v43, %v1853_v2 }
0x2a43   :  { %v1858_v50 = vsel %vm1857_vm10, %v3041_v43, %v1854_v45 }
0x2a44   :  { %v1863_v52 = vsel %vm1860_vm11, %v1862_v8, %v1858_v50  ;;  %v3045_v4 = vpop.eup %3044 }
0x2a45   :  { %v2136_v54 = vmul.f32 %v3045_v4, %v2134_v53  ;;  %vm2141_vm12 = vweird.f32 %v3045_v4  ;;  %v1869_v60 = vmul.f32 %v1867_v7, %v1863_v52 }
0x2a46   :  { %vm2142_vm14 = vmor %vm2140_vm13, %vm2141_vm12 }
0x2a47   :  { %v2137_v55 = vsub.f32 1.0, %v2136_v54 }
0x2a49   :  { %v2138_v46 = vmul.f32 %v3045_v4, %v2137_v55 }
0x2a4b   :  { %v2139_v27 = vadd.f32 %v3045_v4, %v2138_v46 }
0x2a4d   :  { %v2143_v61 = vsel %vm2142_vm14, %v3045_v4, %v2139_v27 }
0x2a4e   :  { %v2148_v38 = vsel %vm2145_vm15, %v2147_v1, %v2143_v61 }
0x2a4f   :  { %v2154_v29 = vmul.f32 %v2152_v20, %v2148_v38 }
0x2a7b   :  { %v1872_v25 = vpop.permute.xlu2 %1871 }
0x2a7c   :  { %v1874_v19 = vmul.f32 %v1872_v25, %v1863_v52 }
0x2a7e   :  { %1876 = vrot.lane.b32.xlu1 %v1874_v19, %s3206_s4 }
0x2aa3   :  { %v2157_v0 = vpop.permute.xlu0 %2156 }
0x2aa4   :  { %v2159_v13 = vmul.f32 %v2157_v0, %v2148_v38 }
0x2aa6   :  { %2161 = vrot.lane.b32.xlu2 %v2159_v13, %s3206_s4 }
0x2af0   :  { %v1877_v15 = vpop.permute.xlu1 %1876 }
0x2af1   :  { %v3823_v16 = vadd.f32 %v1877_v15, %v1869_v60 }
0x2af3   :  { %3046 = vtanh.f32 %v3823_v16 }
0x2af9   :  { %v3047_v18 = vpop.eup %3046 }
0x2afa   :  { %1882 = vrot.lane.b32.xlu0 %v3047_v18, %s3201_s25 }
0x2b00   :  { %v2162_v9 = vpop.permute.xlu2 %2161 }
0x2b01   :  { %v2164_v24 = vadd.f32 %v2162_v9, %v2154_v29 }
0x2b03   :  { %3048 = vtanh.f32 %v2164_v24  ;;  %v2219_v53 = vrot.slane %v2164_v24, 2 }
0x2b09   :  { %v3049_v28 = vpop.eup %3048 }
0x2b0a   :  { %2167 = vrot.lane.b32.xlu1 %v3049_v28, %s3201_s25 }
0x2b6c   :  { %v1883_v30 = vpop.permute.xlu0 %1882 }
0x2b6d   :  { %v3829_v62 = vmul.f32 %v1883_v30, %v1863_v52 }
0x2b6f   :  { %v1891_v32 = vpack.c.bf16 %v3829_v62, %v3829_v62 }
0x2b71   :  { %v1893_v48 = vrot.slane %v1891_v32, 2 }
0x2b73   :  { %1894 = vrot.lane.b32.xlu2 %v1893_v48, %s3206_s4 }
0x2b7c   :  { %v2168_v40 = vpop.permute.xlu1 %2167 }
0x2b7d   :  { %v3834_v33 = vmul.f32 %v2168_v40, %v2148_v38 }
0x2b7f   :  { %v2176_v12 = vpack.c.bf16 %v3834_v33, %v3834_v33 }
0x2b81   :  { %v2178_v26 = vrot.slane %v2176_v12, 1 }
0x2b83   :  { %2179 = vrot.lane.b32.xlu0 %v2178_v26, %s3206_s4 }
0x2bcd   :  { %v1895_v58 = vpop.permute.xlu2 %1894 }
0x2bce   :  { %2783 = vmatmul.msk.bf16.vlgmr.msrb.gmra.mxu1 %vm124_vm0, %v1895_v58 }
0x2bcf   :  { %2466 = vmatpush.bf16.msrb.mxu1 %v3735_v21 }
0x2bd3   :  { %2467 = vmatpush.bf16.msrb.mxu1 %v3738_v63 }
0x2bf5   :  { %v2180_v17 = vpop.permute.xlu0 %2179 }
0x2bf6   :  { %2798 = vmatmul.msk.bf16.vlgmr.msra.gmra.mxu1 %vm124_vm0, %v2180_v17 }
0x2c4b   :  { %v3843_v34 = vpop.f32.mrf.mxu1 }
0x2c53   :  { %v1910_v11 = vpop.f32.mrf.mxu1 }
0x2c73   :  { %v2193_v14 = vpop.f32.mrf.mxu1 }
0x2c74   :  { %v2197_v42 = vadd.f32 %v2193_v14, %v3757_v51 }
0x2c76   :  { %3050 = vtanh.f32 %v2197_v42  ;;  %v2799_v44 = vmul.f32 -1.442695, %v2197_v42 }
0x2c78   :  { %3052 = vpow2.f32 %v2799_v44 }
0x2c7b   :  { %v2195_v43 = vpop.f32.mrf.mxu1 }
0x2c7c   :  { %v3051_v10 = vpop.eup %3050 }
0x2c7d   :  { %2223 = vrot.lane.b32.xlu1 %v3051_v10, %s3201_s25 }
0x2c7e   :  { %v3053_v2 = vpop.eup %3052 }
0x2c7f   :  { %v2201_v21 = vadd.f32 1.0, %v3053_v2 }
0x2c81   :  { %3054 = vrcp.f32 %v2201_v21  ;;  %v2213_v50 = vand.u32 2147483648, %v2201_v21  ;;  %vm2207_vm2 = vweird.f32 %v2201_v21  ;;  %v2211_v8 = vand.u32 2147483647, %v2201_v21 }
0x2c83   :  { %v2214_v25 = vor.u32 1.1754944e-38, %v2213_v50  ;;  %vm2212_vm4 = vcmp.eq.f32.partialorder %v2211_v8, 8.507059e+37 }
0x2c87   :  { %v3055_v63 = vpop.eup %3054 }
0x2c88   :  { %v2203_v45 = vmul.f32 %v3055_v63, %v2201_v21  ;;  %vm2208_vm1 = vweird.f32 %v3055_v63 }
0x2c89   :  { %vm2209_vm3 = vmor %vm2207_vm2, %vm2208_vm1 }
0x2c8a   :  { %v2204_v31 = vsub.f32 1.0, %v2203_v45 }
0x2c8c   :  { %v2205_v47 = vmul.f32 %v3055_v63, %v2204_v31 }
0x2c8e   :  { %v2206_v49 = vadd.f32 %v3055_v63, %v2205_v47 }
0x2c90   :  { %v2210_v51 = vsel %vm2209_vm3, %v3055_v63, %v2206_v49 }
0x2c91   :  { %v2215_v19 = vsel %vm2212_vm4, %v2214_v25, %v2210_v51 }
0x2c92   :  { %v2221_v4 = vmul.f32 %v2219_v53, %v2215_v19 }
0x2cef   :  { %v2224_v52 = vpop.permute.xlu1 %2223 }
0x2cf0   :  { %v2226_v6 = vmul.f32 %v2224_v52, %v2215_v19 }
0x2cf2   :  { %2228 = vrot.lane.b32.xlu2 %v2226_v6, %s3206_s4 }
0x2d4c   :  { %v2229_v54 = vpop.permute.xlu2 %2228 }
0x2d4d   :  { %v2231_v55 = vadd.f32 %v2229_v54, %v2221_v4 }
0x2d4f   :  { %3056 = vtanh.f32 %v2231_v55  ;;  %v2288_v17 = vrot.slane %v2231_v55, 2 }
0x2d55   :  { %v3057_v46 = vpop.eup %3056 }
0x2d56   :  { %2234 = vrot.lane.b32.xlu0 %v3057_v46, %s3201_s25 }
0x2dc8   :  { %v2235_v27 = vpop.permute.xlu0 %2234 }
0x2dc9   :  { %v3849_v57 = vmul.f32 %v2235_v27, %v2215_v19 }
0x2dcb   :  { %v2243_v59 = vpack.c.bf16 %v3849_v57, %v3849_v57 }
0x2dcd   :  { %2245 = vrot.lane.b32.xlu1 %v2243_v59, %s3206_s4 }
0x2e3f   :  { %v2246_v61 = vpop.permute.xlu1 %2245 }
0x2e40   :  { %2800 = vmatmul.msk.bf16.vlgmr.msra.gmra.mxu2 %vm124_vm0, %v2246_v61 }
0x2ec3   :  { %v2259_v1 = vpop.f32.mrf.mxu2 }
0x2ec4   :  { %v2264_v0 = vrot.slane %v2259_v1, 2 }
0x2ec6   :  { %v2266_v38 = vadd.f32 %v2264_v0, %v3683_v35 }
0x2ec8   :  { %3058 = vtanh.f32 %v2266_v38  ;;  %v2801_v60 = vmul.f32 -1.442695, %v2266_v38 }
0x2eca   :  { %3060 = vpow2.f32 %v2801_v60 }
0x2ecb   :  { %v2261_v13 = vpop.f32.mrf.mxu2 }
0x2ece   :  { %v3059_v7 = vpop.eup %3058 }
0x2ecf   :  { %2292 = vrot.lane.b32.xlu2 %v3059_v7, %s3201_s25 }
0x2ed0   :  { %v3061_v15 = vpop.eup %3060 }
0x2ed1   :  { %v2270_v18 = vadd.f32 1.0, %v3061_v15 }
0x2ed3   :  { %3062 = vrcp.f32 %v2270_v18  ;;  %v2282_v30 = vand.u32 2147483648, %v2270_v18  ;;  %vm2276_vm10 = vweird.f32 %v2270_v18  ;;  %v2280_v32 = vand.u32 2147483647, %v2270_v18 }
0x2ed5   :  { %v2283_v40 = vor.u32 1.1754944e-38, %v2282_v30  ;;  %vm2281_vm12 = vcmp.eq.f32.partialorder %v2280_v32, 8.507059e+37 }
0x2ed9   :  { %v3063_v20 = vpop.eup %3062 }
0x2eda   :  { %v2272_v29 = vmul.f32 %v3063_v20, %v2270_v18  ;;  %vm2277_vm9 = vweird.f32 %v3063_v20 }
0x2edb   :  { %vm2278_vm11 = vmor %vm2276_vm10, %vm2277_vm9 }
0x2edc   :  { %v2273_v9 = vsub.f32 1.0, %v2272_v29 }
0x2ede   :  { %v2274_v24 = vmul.f32 %v3063_v20, %v2273_v9 }
0x2ee0   :  { %v2275_v28 = vadd.f32 %v3063_v20, %v2274_v24 }
0x2ee2   :  { %v2279_v48 = vsel %vm2278_vm11, %v3063_v20, %v2275_v28 }
0x2ee3   :  { %v2284_v26 = vsel %vm2281_vm12, %v2283_v40, %v2279_v48 }
0x2ee4   :  { %v2290_v11 = vmul.f32 %v2288_v17, %v2284_v26 }
0x2f29   :  { %v2293_v12 = vpop.permute.xlu2 %2292 }
0x2f2a   :  { %v2295_v58 = vmul.f32 %v2293_v12, %v2284_v26 }
0x2f2c   :  { %2297 = vrot.lane.b32.xlu0 %v2295_v58, %s3206_s4 }
0x2f9e   :  { %v2298_v14 = vpop.permute.xlu0 %2297 }
0x2f9f   :  { %v2300_v42 = vadd.f32 %v2298_v14, %v2290_v11 }
0x2fa1   :  { %3064 = vtanh.f32 %v2300_v42  ;;  %v2358_v0 = vrot.slane %v2300_v42, 2 }
0x2fa7   :  { %v3065_v43 = vpop.eup %3064 }
0x2fa8   :  { %2303 = vrot.lane.b32.xlu1 %v3065_v43, %s3201_s25 }
0x301a   :  { %v2304_v10 = vpop.permute.xlu1 %2303 }
0x301b   :  { %v3859_v44 = vmul.f32 %v2304_v10, %v2284_v26 }
0x301d   :  { %v2312_v2 = vpack.c.bf16 %v3859_v44, %v3859_v44 }
0x301f   :  { %v2314_v21 = vrot.slane %v2312_v2, 3 }
0x3021   :  { %2315 = vrot.lane.b32.xlu2 %v2314_v21, %s3206_s4 }
0x307b   :  { %v2316_v63 = vpop.permute.xlu2 %2315 }
0x307c   :  { %2802 = vmatmul.msk.bf16.vlgmr.msra.gmra.mxu3 %vm124_vm0, %v2316_v63 }
0x30ff   :  { %v2329_v45 = vpop.f32.mrf.mxu3 }
0x3100   :  { %v2334_v31 = vrot.slane %v2329_v45, 4 }
0x3102   :  { %v2336_v47 = vadd.f32 %v2334_v31, %v3683_v35 }
0x3104   :  { %3066 = vtanh.f32 %v2336_v47  ;;  %v2803_v8 = vmul.f32 -1.442695, %v2336_v47 }
0x3106   :  { %3068 = vpow2.f32 %v2803_v8 }
0x3107   :  { %v2331_v49 = vpop.f32.mrf.mxu3 }
0x310a   :  { %v3067_v50 = vpop.eup %3066 }
0x310b   :  { %2362 = vrot.lane.b32.xlu0 %v3067_v50, %s3201_s25 }
0x310c   :  { %v3069_v51 = vpop.eup %3068 }
0x310d   :  { %v2340_v25 = vadd.f32 1.0, %v3069_v51  ;;  %v1913_v51 = vrot.slane %v3843_v34, 2 }
0x310f   :  { %3070 = vrcp.f32 %v2340_v25  ;;  %v2352_v54 = vand.u32 2147483648, %v2340_v25  ;;  %vm2346_vm14 = vweird.f32 %v2340_v25  ;;  %v2350_v55 = vand.u32 2147483647, %v2340_v25 }
0x3111   :  { %v2353_v27 = vor.u32 1.1754944e-38, %v2352_v54  ;;  %vm2351_vm1 = vcmp.eq.f32.partialorder %v2350_v55, 8.507059e+37 }
0x3115   :  { %v3071_v52 = vpop.eup %3070 }
0x3116   :  { %v2342_v19 = vmul.f32 %v3071_v52, %v2340_v25  ;;  %vm2347_vm13 = vweird.f32 %v3071_v52  ;;  %v1915_v25 = vadd.f32 %v1913_v51, %v3688_v5 }
0x3117   :  { %vm2348_vm15 = vmor %vm2346_vm14, %vm2347_vm13 }
0x3118   :  { %v2343_v6 = vsub.f32 1.0, %v2342_v19  ;;  %v2784_v5 = vmul.f32 -1.442695, %v1915_v25 }
0x311a   :  { %v2344_v53 = vmul.f32 %v3071_v52, %v2343_v6 }
0x311c   :  { %v2345_v4 = vadd.f32 %v3071_v52, %v2344_v53 }
0x311e   :  { %v2349_v46 = vsel %vm2348_vm15, %v3071_v52, %v2345_v4 }
0x311f   :  { %v2354_v61 = vsel %vm2351_vm1, %v2353_v27, %v2349_v46 }
0x3120   :  { %v2360_v38 = vmul.f32 %v2358_v0, %v2354_v61 }
0x317d   :  { %v2363_v59 = vpop.permute.xlu0 %2362 }
0x317e   :  { %v2365_v1 = vmul.f32 %v2363_v59, %v2354_v61 }
0x3180   :  { %2367 = vrot.lane.b32.xlu1 %v2365_v1, %s3206_s4 }
0x31f2   :  { %v2368_v13 = vpop.permute.xlu1 %2367 }
0x31f3   :  { %v2370_v7 = vadd.f32 %v2368_v13, %v2360_v38 }
0x31f5   :  { %3072 = vtanh.f32 %v2370_v7  ;;  %v2428_v47 = vrot.slane %v2370_v7, 2 }
0x31fb   :  { %v3073_v60 = vpop.eup %3072 }
0x31fc   :  { %2373 = vrot.lane.b32.xlu2 %v3073_v60, %s3201_s25 }
0x3256   :  { %v2374_v15 = vpop.permute.xlu2 %2373 }
0x3257   :  { %v3869_v18 = vmul.f32 %v2374_v15, %v2354_v61 }
0x3259   :  { %v2382_v20 = vpack.c.bf16 %v3869_v18, %v3869_v18 }
0x325b   :  { %v2384_v29 = vrot.slane %v2382_v20, 2 }
0x325d   :  { %2385 = vrot.lane.b32.xlu0 %v2384_v29, %s3206_s4 }
0x32cf   :  { %v2386_v9 = vpop.permute.xlu0 %2385 }
0x32d0   :  { %2804 = vmatmul.msk.bf16.vlgmr.msrb.gmra.mxu0 %vm124_vm0, %v2386_v9 }
0x334d   :  { %v2399_v24 = vpop.f32.mrf.mxu0 }
0x334e   :  { %v2404_v28 = vrot.slane %v2399_v24, 6 }
0x3350   :  { %v2406_v30 = vadd.f32 %v2404_v28, %v3683_v35 }
0x3352   :  { %3074 = vtanh.f32 %v2406_v30  ;;  %v2805_v40 = vmul.f32 -1.442695, %v2406_v30 }
0x3354   :  { %3076 = vpow2.f32 %v2805_v40 }
0x3355   :  { %v2401_v32 = vpop.f32.mrf.mxu0 }
0x3358   :  { %v3075_v48 = vpop.eup %3074 }
0x3359   :  { %2432 = vrot.lane.b32.xlu1 %v3075_v48, %s3201_s25 }
0x335a   :  { %v3077_v12 = vpop.eup %3076 }
0x335b   :  { %v2410_v26 = vadd.f32 1.0, %v3077_v12 }
0x335d   :  { %3078 = vrcp.f32 %v2410_v26  ;;  %v2422_v43 = vand.u32 2147483648, %v2410_v26  ;;  %vm2416_vm3 = vweird.f32 %v2410_v26  ;;  %v2420_v10 = vand.u32 2147483647, %v2410_v26 }
0x335f   :  { %v2423_v21 = vor.u32 1.1754944e-38, %v2422_v43  ;;  %vm2421_vm9 = vcmp.eq.f32.partialorder %v2420_v10, 8.507059e+37 }
0x3363   :  { %v3079_v58 = vpop.eup %3078 }
0x3364   :  { %v2412_v17 = vmul.f32 %v3079_v58, %v2410_v26  ;;  %vm2417_vm2 = vweird.f32 %v3079_v58 }
0x3365   :  { %vm2418_vm4 = vmor %vm2416_vm3, %vm2417_vm2 }
0x3366   :  { %v2413_v11 = vsub.f32 1.0, %v2412_v17 }
0x3368   :  { %v2414_v14 = vmul.f32 %v3079_v58, %v2413_v11 }
0x336a   :  { %v2415_v42 = vadd.f32 %v3079_v58, %v2414_v14 }
0x336c   :  { %v2419_v2 = vsel %vm2418_vm4, %v3079_v58, %v2415_v42 }
0x336d   :  { %v2424_v45 = vsel %vm2421_vm9, %v2423_v21, %v2419_v2 }
0x336e   :  { %v2430_v49 = vmul.f32 %v2428_v47, %v2424_v45 }
0x33cb   :  { %v2433_v63 = vpop.permute.xlu1 %2432 }
0x33cc   :  { %v2435_v31 = vmul.f32 %v2433_v63, %v2424_v45  ;;  %v1937_v63 = vrot.slane %v3823_v16, 6 }
0x33ce   :  { %2437 = vrot.lane.b32.xlu2 %v2435_v31, %s3206_s4 }
0x3428   :  { %v2438_v50 = vpop.permute.xlu2 %2437 }
0x3429   :  { %v3878_v8 = vadd.f32 %v2438_v50, %v2430_v49 }
0x342b   :  { %3080 = vtanh.f32 %v3878_v8  ;;  %v2495_v50 = vrot.slane %v3878_v8, 2 }
0x342c   :  { %3082 = vtanh.f32 %v1915_v25 }
0x342d   :  { %3084 = vpow2.f32 %v2784_v5 }
0x3431   :  { %v3081_v52 = vpop.eup %3080 }
0x3432   :  { %2443 = vrot.lane.b32.xlu0 %v3081_v52, %s3201_s25  ;;  %v3083_v19 = vpop.eup %3082 }
0x3433   :  { %v3085_v55 = vpop.eup %3084 }
0x3434   :  { %v1919_v46 = vadd.f32 1.0, %v3085_v55 }
0x3436   :  { %3086 = vrcp.f32 %v1919_v46  ;;  %v1931_v15 = vand.u32 2147483648, %v1919_v46  ;;  %vm1925_vm11 = vweird.f32 %v1919_v46  ;;  %v1929_v20 = vand.u32 2147483647, %v1919_v46 }
0x3438   :  { %v1932_v9 = vor.u32 1.1754944e-38, %v1931_v15  ;;  %vm1930_vm13 = vcmp.eq.f32.partialorder %v1929_v20, 8.507059e+37 }
0x343a   :  { %1941 = vrot.lane.b32.xlu0 %v3083_v19, %s3201_s25 }
0x343c   :  { %v3087_v27 = vpop.eup %3086 }
0x343d   :  { %v1921_v59 = vmul.f32 %v3087_v27, %v1919_v46  ;;  %vm1926_vm10 = vweird.f32 %v3087_v27 }
0x343e   :  { %vm1927_vm12 = vmor %vm1925_vm11, %vm1926_vm10 }
0x343f   :  { %v1922_v61 = vsub.f32 1.0, %v1921_v59  ;;  %v2523_v59 = vld [vmem:[%s4012_s9 + $0x20] sm:$0xff] }
0x3441   :  { %v1923_v38 = vmul.f32 %v3087_v27, %v1922_v61  ;;  %v2534_v61 = vld [vmem:[%s4012_s9 + $0x78] sm:$0xff] }
0x3443   :  { %v1924_v13 = vadd.f32 %v3087_v27, %v1923_v38  ;;  %v2532_v38 = vld [vmem:[%s4012_s9 + $0x68] sm:$0xff] }
0x3445   :  { %v1928_v29 = vsel %vm1927_vm12, %v3087_v27, %v1924_v13  ;;  %v2527_v13 = vld [vmem:[%s4012_s9 + $0x40] sm:$0xff] }
0x3446   :  { %v1933_v28 = vsel %vm1930_vm13, %v1932_v9, %v1928_v29 }
0x34a4   :  { %v2444_v6 = vpop.permute.xlu0 %2443 }
0x34a5   :  { %v3885_v53 = vmul.f32 %v2444_v6, %v2424_v45  ;;  %v1939_v45 = vmul.f32 %v1937_v63, %v1933_v28 }
0x34a7   :  { %v2452_v4 = vpack.c.bf16 %v3885_v53, %v3885_v53 }
0x34a9   :  { %v2454_v54 = vrot.slane %v2452_v4, 1 }
0x34ab   :  { %2455 = vrot.lane.b32.xlu1 %v2454_v54, %s3206_s4 }
0x34ac   :  { %v1942_v24 = vpop.permute.xlu0 %1941 }
0x34ad   :  { %v1944_v30 = vmul.f32 %v1942_v24, %v1933_v28 }
0x351d   :  { %v2456_v34 = vpop.permute.xlu1 %2455 }
0x351e   :  { %2806 = vmatmul.msk.bf16.vlgmr.msrb.gmra.mxu1 %vm124_vm0, %v2456_v34 }
0x359b   :  { %v2469_v1 = vpop.f32.mrf.mxu1 }
0x359c   :  { %v2473_v0 = vadd.f32 %v2469_v1, %v3683_v35  ;;  %v2533_v1 = vld [vmem:[%s4012_s9 + $0x70] sm:$0xff] }
0x359e   :  { %3088 = vtanh.f32 %v2473_v0  ;;  %v2807_v35 = vmul.f32 -1.442695, %v2473_v0  ;;  %v2528_v0 = vld [vmem:[%s4012_s9 + $0x48] sm:$0xff] }
0x35a0   :  { %3090 = vpow2.f32 %v2807_v35 }
0x35a3   :  { %v2471_v7 = vpop.f32.mrf.mxu1 }
0x35a4   :  { %v3089_v60 = vpop.eup %3088  ;;  %v2531_v7 = vld [vmem:[%s4012_s9 + $0x60] sm:$0xff] }
0x35a5   :  { %2499 = vrot.lane.b32.xlu2 %v3089_v60, %s3201_s25 }
0x35a6   :  { %v3091_v32 = vpop.eup %3090 }
0x35a7   :  { %v2477_v48 = vadd.f32 1.0, %v3091_v32 }
0x35a9   :  { %3092 = vrcp.f32 %v2477_v48  ;;  %v2489_v11 = vand.u32 2147483648, %v2477_v48  ;;  %vm2483_vm15 = vweird.f32 %v2477_v48  ;;  %v2487_v14 = vand.u32 2147483647, %v2477_v48 }
0x35ab   :  { %v2490_v43 = vor.u32 1.1754944e-38, %v2489_v11  ;;  %vm2488_vm2 = vcmp.eq.f32.partialorder %v2487_v14, 8.507059e+37 }
0x35ad   :  { %1946 = vrot.lane.b32.xlu2 %v1944_v30, %s3206_s4 }
0x35af   :  { %v3093_v40 = vpop.eup %3092 }
0x35b0   :  { %v2479_v12 = vmul.f32 %v3093_v40, %v2477_v48  ;;  %vm2484_vm14 = vweird.f32 %v3093_v40 }
0x35b1   :  { %vm2485_vm1 = vmor %vm2483_vm15, %vm2484_vm14 }
0x35b2   :  { %v2480_v26 = vsub.f32 1.0, %v2479_v12 }
0x35b4   :  { %v2481_v58 = vmul.f32 %v3093_v40, %v2480_v26 }
0x35b6   :  { %v2482_v17 = vadd.f32 %v3093_v40, %v2481_v58  ;;  %v2841_v58 = vld [vmem:[%s4013_s10] ss:$0 sm:$0xff] }
0x35b8   :  { %v2486_v42 = vsel %vm2485_vm1, %v3093_v40, %v2482_v17 }
0x35b9   :  { %v2491_v2 = vsel %vm2488_vm2, %v2490_v43, %v2486_v42 }
0x35ba   :  { %v2497_v51 = vmul.f32 %v2495_v50, %v2491_v2 }
0x35ff   :  { %v2500_v10 = vpop.permute.xlu2 %2499 }
0x3600   :  { %v2502_v21 = vmul.f32 %v2500_v10, %v2491_v2 }
0x3602   :  { %2504 = vrot.lane.b32.xlu1 %v2502_v21, %s3206_s4 }
0x3607   :  { %v1947_v31 = vpop.permute.xlu2 %1946 }
0x3608   :  { %v1949_v47 = vadd.f32 %v1947_v31, %v1939_v45 }
0x360a   :  { %3094 = vtanh.f32 %v1949_v47 }
0x3610   :  { %v3095_v49 = vpop.eup %3094 }
0x3611   :  { %1952 = vrot.lane.b32.xlu1 %v3095_v49, %s3201_s25 }
0x3674   :  { %v2505_v25 = vpop.permute.xlu1 %2504 }
0x3675   :  { %v2507_v52 = vadd.f32 %v2505_v25, %v2497_v51 }
0x3677   :  { %3096 = vtanh.f32 %v2507_v52 }
0x367d   :  { %v3097_v19 = vpop.eup %3096 }
0x367e   :  { %2510 = vrot.lane.b32.xlu0 %v3097_v19, %s3201_s25 }
0x3683   :  { %v1953_v6 = vpop.permute.xlu1 %1952 }
0x3684   :  { %v1955_v4 = vmul.f32 %v1953_v6, %v1933_v28 }
0x3686   :  { %1472 = vrot.lane.b32.xlu0 %v3693_v36, %s3206_s4  ;;  %1957 = vrot.lane.b32.xlu1 %v1955_v4, %s3206_s4  ;;  %v2522_v36 = vld [vmem:[%s4012_s9 + $0x18] sm:$0xff] }
0x3687   :  { %2575 = vmatpush.msrb.mxu3 %v2522_v36 }
0x368e   :  { %1541 = vrot.lane.b32.xlu0 %v3705_v37, %s3206_s4  ;;  %1611 = vrot.lane.b32.xlu1 %v3715_v41, %s3206_s4  ;;  %v2521_v37 = vld [vmem:[%s4012_s9 + $0x10] sm:$0xff]  ;;  %v2520_v41 = vld [vmem:[%s4012_s9 + $0x8] sm:$0xff] }
0x368f   :  { %2576 = vmatpush.msrb.mxu3 %v2521_v37 }
0x3691   :  { %2577 = vmatpush.msrb.mxu3 %v2520_v41 }
0x3696   :  { %1748 = vrot.lane.b32.xlu0 %v3772_v39, %s3206_s4  ;;  %1817 = vrot.lane.b32.xlu1 %v3802_v56, %s3206_s4  ;;  %v2519_v39 = vld [vmem:[%s4012_s9] sm:$0xff] }
0x3697   :  { %2578 = vmatpush.msrb.mxu3 %v2519_v39 }
0x3699   :  { %2624 = vmatpush.msra.mxu3 %v2534_v61 }
0x369b   :  { %2625 = vmatpush.msra.mxu3 %v2533_v1 }
0x369d   :  { %2626 = vmatpush.msra.mxu3 %v2532_v38 }
0x369e   :  { %2102 = vrot.lane.b32.xlu0 %v3807_v22, %s3206_s4  ;;  %2172 = vrot.lane.b32.xlu1 %v3834_v33, %s3206_s4 }
0x369f   :  { %2627 = vmatpush.msra.mxu3 %v2531_v7 }
0x36a6   :  { %2308 = vrot.lane.b32.xlu0 %v3859_v44, %s3206_s4  ;;  %2378 = vrot.lane.b32.xlu1 %v3869_v18, %s3206_s4  ;;  %v2526_v44 = vld [vmem:[%s4012_s9 + $0x38] sm:$0xff]  ;;  %v2525_v18 = vld [vmem:[%s4012_s9 + $0x30] sm:$0xff] }
0x36a7   :  { %2552 = vmatpush.msrb.mxu2 %v2526_v44 }
0x36a9   :  { %2553 = vmatpush.msrb.mxu2 %v2525_v18 }
0x36f0   :  { %v2511_v56 = vpop.permute.xlu0 %2510 }
0x36f1   :  { %v2513_v22 = vmul.f32 %v2511_v56, %v2491_v2 }
0x36f3   :  { %2515 = vrot.lane.b32.xlu2 %v2513_v22, %s3206_s4 }
0x36f8   :  { %v1958_v16 = vpop.permute.xlu1 %1957  ;;  %v1473_v33 = vpop.permute.xlu0 %1472 }
0x36f9   :  { %1960 = vst.msk [vmem:[#allocation2 + $0x8] sm:$0xc0] %vm442_vm5, %v1958_v16 }
0x36fa   :  { %1475 = vst.msk [vmem:[#allocation2] sm:$0x3] %vm230_vm6, %v1473_v33 }
0x36fb   :  { %2032 = vrot.lane.b32.xlu2 %v3777_v23, %s3206_s4 }
0x3700   :  { %v1612_v8 = vpop.permute.xlu1 %1611  ;;  %v1542_v54 = vpop.permute.xlu0 %1541  ;;  %v2583_v9 = vld [vmem:[#allocation2 + $0xe] sm:$0x3] }
0x3701   :  { %1614 = vst.msk [vmem:[#allocation2] sm:$0x30] %vm371_vm8, %v1612_v8  ;;  %v2535_v34 = vld [vmem:[#allocation2] sm:$0x3] }
0x3702   :  { %1544 = vst.msk [vmem:[#allocation2] sm:$0xc] %vm300_vm7, %v1542_v54  ;;  %2809 = vmatmul.msk.f32.vlgmr.msrb.gmra.mxu3 %vm124_vm0, %v2535_v34 }
0x3703   :  { %1681 = vrot.lane.b32.xlu2 %v3730_v3, %s3206_s4 }
0x3708   :  { %v1818_v23 = vpop.permute.xlu1 %1817  ;;  %v1749_v5 = vpop.permute.xlu0 %1748 }
0x3709   :  { %1820 = vst.msk [vmem:[#allocation2 + $0x8] sm:$0xc] %vm300_vm7, %v1818_v23 }
0x370a   :  { %1751 = vst.msk [vmem:[#allocation2 + $0x8] sm:$0x3] %vm230_vm6, %v1749_v5 }
0x370b   :  { %1887 = vrot.lane.b32.xlu2 %v3829_v62, %s3206_s4  ;;  %v2524_v62 = vld [vmem:[%s4012_s9 + $0x28] sm:$0xff] }
0x370c   :  { %2554 = vmatpush.msrb.mxu2 %v2524_v62 }
0x370e   :  { %2555 = vmatpush.msrb.mxu2 %v2523_v59 }
0x3710   :  { %v2173_v55 = vpop.permute.xlu1 %2172  ;;  %v2103_v46 = vpop.permute.xlu0 %2102 }
0x3711   :  { %2175 = vst.msk [vmem:[#allocation3 + $0x8] sm:$0xc] %vm300_vm7, %v2173_v55 }
0x3712   :  { %2105 = vst.msk [vmem:[#allocation3 + $0x8] sm:$0x30] %vm371_vm8, %v2103_v46 }
0x3713   :  { %2239 = vrot.lane.b32.xlu2 %v3849_v57, %s3206_s4  ;;  %v2530_v57 = vld [vmem:[%s4012_s9 + $0x58] sm:$0xff] }
0x3714   :  { %2599 = vmatpush.msra.mxu2 %v2530_v57 }
0x3718   :  { %v2379_v27 = vpop.permute.xlu1 %2378  ;;  %v2309_v3 = vpop.permute.xlu0 %2308 }
0x3719   :  { %2381 = vst.msk [vmem:[#allocation3] sm:$0x30] %vm371_vm8, %v2379_v27 }
0x371a   :  { %2311 = vst.msk [vmem:[#allocation3] sm:$0xc0] %vm442_vm5, %v2309_v3 }
0x371b   :  { %2448 = vrot.lane.b32.xlu2 %v3885_v53, %s3206_s4  ;;  %v2529_v53 = vld [vmem:[%s4012_s9 + $0x50] sm:$0xff] }
0x371c   :  { %2600 = vmatpush.msra.mxu2 %v2529_v53 }
0x371e   :  { %2601 = vmatpush.msra.mxu2 %v2528_v0 }
0x3720   :  { %2602 = vmatpush.msra.mxu2 %v2527_v13 }
0x374d   :  { %v2516_v60 = vpop.permute.xlu2 %2515 }
0x374e   :  { %2518 = vst.msk [vmem:[#allocation3] sm:$0x3] %vm230_vm6, %v2516_v60 }
0x3755   :  { %v2033_v15 = vpop.permute.xlu2 %2032  ;;  %v2536_v20 = vld [vmem:[#allocation3] sm:$0x3] }
0x3756   :  { %2035 = vst.msk [vmem:[#allocation3 + $0x8] sm:$0xc0] %vm442_vm5, %v2033_v15  ;;  %2808 = vmatmul.msk.f32.vlgmr.msrb.gmra.mxu2 %vm124_vm0, %v2536_v20 }
0x375d   :  { %v1682_v29 = vpop.permute.xlu2 %1681  ;;  %v2608_v24 = vld [vmem:[#allocation3 + $0xe] sm:$0x3] }
0x375e   :  { %1684 = vst.msk [vmem:[#allocation2] sm:$0xc0] %vm442_vm5, %v1682_v29  ;;  %2810 = vmatmul.msk.f32.vlgmr.msra.gmra.mxu2 %vm124_vm0, %v2583_v9  ;;  %2811 = vmatmul.msk.f32.vlgmr.msra.gmra.mxu3 %vm124_vm0, %v2608_v24  ;;  %vm2638_vm0 = vcmask 9216  }
0x3765   :  { %v1888_v28 = vpop.permute.xlu2 %1887 }
0x3766   :  { %1890 = vst.msk [vmem:[#allocation2 + $0x8] sm:$0x30] %vm371_vm8, %v1888_v28 }
0x376d   :  { %v2240_v30 = vpop.permute.xlu2 %2239 }
0x376e   :  { %2242 = vst.msk [vmem:[#allocation3 + $0x8] sm:$0x3] %vm230_vm6, %v2240_v30 }
0x3775   :  { %v2449_v35 = vpop.permute.xlu2 %2448 }
0x3776   :  { %2451 = vst.msk [vmem:[#allocation3] sm:$0xc] %vm300_vm7, %v2449_v35 }
0x3785   :  { %v2580_v48 = vpop.f32.mrf.mxu3 }
0x37d9   :  { %v2557_v32 = vpop.f32.mrf.mxu2 }
0x37da   :  { %v2581_v40 = vadd.f32 %v2580_v48, %v2557_v32 }
0x37e1   :  { %v2604_v12 = vpop.f32.mrf.mxu2  ;;  %v2629_v17 = vpop.f32.mrf.mxu3 }
0x37e2   :  { %v2607_v26 = vadd.f32 %v2604_v12, %v2581_v40 }
0x37e4   :  { %v2632_v11 = vadd.f32 %v2629_v17, %v2607_v26 }
0x37e6   :  { %v2637_v14 = vadd.f32 %v2841_v58, %v2632_v11 }
0x37e8   :  { %2639 = vst.msk [vmem:[#allocation10] sm:$0x3] %vm2638_vm0, %v2637_v14 }
0x37e9   :  { %2650 = dma.vmem_to_hbm [thread:$0]  %s2646_s27, 32, %s2648_s30, [#allocation6]  }
0x37ea   :  { %3198 = dma.done.wait [#allocation6], 32  }
0x37eb   :  { %3199 = vsyncadd [#allocation6], 4294967264 }
0x37ec   :  { %2655 = vsyncpa [#allocation5], 1 }
0x37ed   :  { %2656 = vsyncpa [#allocation8], 1 }
0x37ee   :  { %2657 = vsyncpa [#allocation6], 1 }

</bundles_post_ra>
